<compile_context>
chip_gen: v7x
topology: tpu7x:2x2x1
jax: 0.10.0
libtpu: 0.0.40
codegen_flags: <defaults>
</compile_context>

<pallas_src>
import functools

import jax
import jax.numpy as jnp
from jax.experimental import pallas as pl
from jax.experimental.pallas import tpu as pltpu

KSIZE = 7
PAD = 3  # kernel_size=7 -> padding=3


def _round_up(v, m):
    return (v + m - 1) // m * m


def _divisors_leq(n, cap):
    return [d for d in range(1, min(n, cap) + 1) if n % d == 0]


def _vmem_capacity_bytes():
    try:
        cap = int(pltpu.get_tpu_info().vmem_capacity_bytes)
    except Exception:
        cap = 64 * 1024 * 1024  # conservative fallback (v7x-sized)
    return min(max(cap, 16 * 1024 * 1024), 128 * 1024 * 1024)


# --------------------------------------------------------------------------
# Shared 7x7 (2 -> 1) conv + gate on flattened, zero-padded avg/max maps.
# --------------------------------------------------------------------------
def _conv7x7_gate(pad_a_ref, pad_m_ref, w_ref, *, rows, hw, width, poff):
    """pad_*_ref: (rows, hw + 2*poff) f32, interior at [poff, poff+hw), pads zeroed.

    Returns gate = 1 + sigmoid(relu(conv)) as (rows, hw) f32.
    """
    # 6 column-boundary masks (dx == PAD needs none); row-OOB taps read zeros
    # from the zeroed pad lanes, so no row masks are needed.
    col = jax.lax.broadcasted_iota(jnp.int32, (1, hw), 1) % width
    col_ok = {}
    for dx in range(KSIZE):
        if dx == PAD:
            continue
        off = dx - PAD
        col_ok[dx] = ((col + off) >= 0) & ((col + off) < width)

    n_acc = 4  # break the 49-deep serial accumulation chain
    accs = [jnp.zeros((rows, hw), jnp.float32) for _ in range(n_acc)]
    t = 0
    for dy in range(KSIZE):
        base = poff + (dy - PAD) * width
        for dx in range(KSIZE):
            st = base + (dx - PAD)
            w_avg = w_ref[dy * KSIZE + dx]
            w_max = w_ref[KSIZE * KSIZE + dy * KSIZE + dx]
            contrib = (w_avg * pad_a_ref[:, st:st + hw]
                       + w_max * pad_m_ref[:, st:st + hw])
            if dx != PAD:
                contrib = jnp.where(col_ok[dx], contrib, 0.0)
            accs[t % n_acc] = accs[t % n_acc] + contrib
            t += 1
    conv = accs[0]
    for a in accs[1:]:
        conv = conv + a
    # TODO(synk): if a bundle dump shows the vld slot saturating here, load one
    # dy-window per dy and generate the +-3-lane dx shifts with pltpu.roll.
    return jax.nn.sigmoid(jnp.maximum(conv, 0.0)) + 1.0


# --------------------------------------------------------------------------
# Fused single-pass kernel (C*HW block fits the VMEM budget).
# --------------------------------------------------------------------------
def _fused_kernel(x_ref, w_ref, o_ref, pad_a_ref, pad_m_ref,
                  *, bt, height, width, poff):
    hw = height * width

    # Zero only the pad lanes, once per grid step.
    zp = jnp.zeros((bt, poff), jnp.float32)
    pad_a_ref[:, 0:poff] = zp
    pad_a_ref[:, poff + hw:poff + hw + poff] = zp
    pad_m_ref[:, 0:poff] = zp
    pad_m_ref[:, poff + hw:poff + hw + poff] = zp

    # Channel reductions; maps of all bt batch elements are stacked along the
    # sublane dimension of the conv scratch for dense VPU work in the conv.
    for bi in range(bt):
        xb = x_ref[bi].astype(jnp.float32)                     # (C, HW)
        pad_a_ref[bi:bi + 1, poff:poff + hw] = jnp.mean(xb, axis=0, keepdims=True)
        pad_m_ref[bi:bi + 1, poff:poff + hw] = jnp.max(xb, axis=0, keepdims=True)

    gate = _conv7x7_gate(pad_a_ref, pad_m_ref, w_ref,
                         rows=bt, hw=hw, width=width, poff=poff)  # (bt, HW) f32

    # Apply: re-read x from the ref (never kept live across the conv) and do a
    # single fused multiply/store per element, in the input dtype.
    for bi in range(bt):
        g = gate[bi:bi + 1].astype(o_ref.dtype)                # (1, HW)
        o_ref[bi] = (x_ref[bi] * g).astype(o_ref.dtype)


# --------------------------------------------------------------------------
# Two-phase C-tiled schedule (large C*HW).
# Phase 1: stream C tiles, accumulate channel sum/max, compute the gate once.
# --------------------------------------------------------------------------
def _reduce_gate_kernel(x_ref, w_ref, gate_ref, sum_ref, max_ref,
                        pad_a_ref, pad_m_ref,
                        *, bg, channels, height, width, poff):
    hw = height * width
    c = pl.program_id(1)

    @pl.when(c == 0)
    def _():
        sum_ref[...] = jnp.zeros_like(sum_ref)
        max_ref[...] = jnp.full_like(max_ref, -jnp.inf)

    for bi in range(bg):
        t = x_ref[bi].astype(jnp.float32)                      # (ct, HW)
        sum_ref[bi:bi + 1] += jnp.sum(t, axis=0, keepdims=True)
        max_ref[bi:bi + 1] = jnp.maximum(max_ref[bi:bi + 1],
                                         jnp.max(t, axis=0, keepdims=True))

    @pl.when(c == pl.num_programs(1) - 1)
    def _():
        zp = jnp.zeros((bg, poff), jnp.float32)
        pad_a_ref[:, 0:poff] = zp
        pad_a_ref[:, poff + hw:poff + hw + poff] = zp
        pad_m_ref[:, 0:poff] = zp
        pad_m_ref[:, poff + hw:poff + hw + poff] = zp
        pad_a_ref[:, poff:poff + hw] = sum_ref[...] * (1.0 / channels)
        pad_m_ref[:, poff:poff + hw] = max_ref[...]
        gate = _conv7x7_gate(pad_a_ref, pad_m_ref, w_ref,
                             rows=bg, hw=hw, width=width, poff=poff)
        for bi in range(bg):
            gate_ref[bi] = gate[bi:bi + 1].astype(gate_ref.dtype)


# Phase 2: re-stream C tiles of x and apply x * (1 + sigmoid(relu(conv))).
def _apply_kernel(x_ref, gate_ref, o_ref, *, bg):
    for bi in range(bg):
        g = gate_ref[bi]                                       # (1, HW), x dtype
        o_ref[bi] = (x_ref[bi] * g).astype(o_ref.dtype)


# --------------------------------------------------------------------------
# Wrappers
# --------------------------------------------------------------------------
def _run_fused(x2, w_flat, B, C, H, W, poff, budget, itemsize, vmem_limit):
    HW = H * W
    cands = [d for d in _divisors_leq(B, 8) if d * C * HW * itemsize <= budget] or [1]
    # Prefer keeping >= 2 grid steps so the batch axis can shard across v7x's
    # two TensorCores.  TODO(synk): for B == 1 add a second parallel (spatial
    # or channel-apply) grid axis instead of a single grid step.
    pref = [d for d in cands if B // d >= 2] or cands
    bt = max(pref)

    kernel = functools.partial(_fused_kernel, bt=bt, height=H, width=W, poff=poff)
    cost = pl.CostEstimate(
        flops=int(B * HW * (2 * C + 4 * KSIZE * KSIZE + 8)),
        transcendentals=int(B * HW),
        bytes_accessed=int(2 * B * C * HW * itemsize))

    return pl.pallas_call(
        kernel,
        out_shape=jax.ShapeDtypeStruct((B, C, HW), x2.dtype),
        grid_spec=pltpu.PrefetchScalarGridSpec(
            num_scalar_prefetch=0,
            grid=(B // bt,),
            in_specs=[
                pl.BlockSpec((bt, C, HW), lambda b: (b, 0, 0)),
                pl.BlockSpec(memory_space=pltpu.MemorySpace.SMEM),
            ],
            out_specs=pl.BlockSpec((bt, C, HW), lambda b: (b, 0, 0)),
            scratch_shapes=[
                pltpu.VMEM((bt, HW + 2 * poff), jnp.float32),   # avg maps
                pltpu.VMEM((bt, HW + 2 * poff), jnp.float32),   # max maps
            ],
        ),
        compiler_params=pltpu.CompilerParams(
            dimension_semantics=("parallel",),
            vmem_limit_bytes=vmem_limit,
        ),
        cost_estimate=cost,
    )(x2, w_flat)


def _run_two_phase(x2, w_flat, B, C, H, W, poff, budget, itemsize, vmem_limit):
    HW = H * W
    # Batch group per grid step (also the sublane stacking factor of the conv).
    bg_cands = [d for d in _divisors_leq(B, 8) if d * HW * itemsize <= budget] or [1]
    bg_pref = [d for d in bg_cands if B // d >= 2] or bg_cands
    bg = max(bg_pref)
    # Channel tile: multiple of 8 (sublane tiling of the block) or the full C.
    ct_aligned = [d for d in range(1, C + 1) if C % d == 0 and (d % 8 == 0 or d == C)]
    ct_fit = [d for d in ct_aligned if bg * d * HW * itemsize <= budget]
    ct = max(ct_fit) if ct_fit else min(ct_aligned)
    n_ct = C // ct
    # TODO(synk): if even (bg=1, ct=min) exceeds the budget (enormous H*W), add
    # a spatial tile axis; not needed for SSDGL shapes.

    # ---- Phase 1: channel reduce + conv + gate (small output) ----
    reduce_kernel = functools.partial(
        _reduce_gate_kernel, bg=bg, channels=C, height=H, width=W, poff=poff)
    cost1 = pl.CostEstimate(
        flops=int(B * HW * (2 * C + 4 * KSIZE * KSIZE + 8)),
        transcendentals=int(B * HW),
        bytes_accessed=int(B * C * HW * itemsize + B * HW * itemsize))
    gate = pl.pallas_call(
        reduce_kernel,
        out_shape=jax.ShapeDtypeStruct((B, 1, HW), x2.dtype),
        grid_spec=pltpu.PrefetchScalarGridSpec(
            num_scalar_prefetch=0,
            grid=(B // bg, n_ct),
            in_specs=[
                pl.BlockSpec((bg, ct, HW), lambda b, c: (b, c, 0)),
                pl.BlockSpec(memory_space=pltpu.MemorySpace.SMEM),
            ],
            out_specs=pl.BlockSpec((bg, 1, HW), lambda b, c: (b, 0, 0)),
            scratch_shapes=[
                pltpu.VMEM((bg, HW), jnp.float32),              # channel sum
                pltpu.VMEM((bg, HW), jnp.float32),              # channel max
                pltpu.VMEM((bg, HW + 2 * poff), jnp.float32),   # avg maps (padded)
                pltpu.VMEM((bg, HW + 2 * poff), jnp.float32),   # max maps (padded)
            ],
        ),
        compiler_params=pltpu.CompilerParams(
            dimension_semantics=("parallel", "arbitrary"),
            vmem_limit_bytes=vmem_limit,
        ),
        cost_estimate=cost1,
    )(x2, w_flat)

    # ---- Phase 2: apply the gate (1 load of x + 1 store of y per element) ----
    apply_kernel = functools.partial(_apply_kernel, bg=bg)
    cost2 = pl.CostEstimate(
        flops=int(B * C * HW),
        transcendentals=0,
        bytes_accessed=int(2 * B * C * HW * itemsize + B * HW * itemsize))
    return pl.pallas_call(
        apply_kernel,
        out_shape=jax.ShapeDtypeStruct((B, C, HW), x2.dtype),
        grid_spec=pltpu.PrefetchScalarGridSpec(
            num_scalar_prefetch=0,
            grid=(B // bg, n_ct),
            in_specs=[
                pl.BlockSpec((bg, ct, HW), lambda b, c: (b, c, 0)),
                pl.BlockSpec((bg, 1, HW), lambda b, c: (b, 0, 0)),
            ],
            out_specs=pl.BlockSpec((bg, ct, HW), lambda b, c: (b, c, 0)),
        ),
        compiler_params=pltpu.CompilerParams(
            dimension_semantics=("parallel", "parallel"),
            vmem_limit_bytes=vmem_limit,
        ),
        cost_estimate=cost2,
    )(x2, gate)


def spatial_attention(x, w, *, block_budget_bytes=None):
    """x: (B, C, H, W); w: (1, 2, 7, 7) conv1 weight (no bias). Returns x*att + x."""
    B, C, H, W = x.shape
    HW = H * W
    itemsize = jnp.dtype(x.dtype).itemsize
    # Spare lanes on each side of the flattened maps, rounded up to 128 so the
    # interior store is lane-aligned; covers every tap offset (<= 3*W + 3).
    poff = _round_up(PAD * W + PAD, 128)

    vmem_cap = _vmem_capacity_bytes()
    vmem_limit = (vmem_cap * 3) // 4
    # in + out blocks are each double-buffered -> ~4 blocks live, plus the conv
    # scratch; keep headroom.
    budget = (block_budget_bytes if block_budget_bytes is not None
              else max(vmem_limit // 5, 1 << 20))

    x2 = x.reshape(B, C, HW)                       # lane-dense heavy path
    w_flat = w.reshape(-1).astype(jnp.float32)     # (98,) SMEM scalars

    if C * HW * itemsize <= budget:
        y2 = _run_fused(x2, w_flat, B, C, H, W, poff, budget, itemsize, vmem_limit)
    else:
        y2 = _run_two_phase(x2, w_flat, B, C, H, W, poff, budget, itemsize, vmem_limit)
    return y2.reshape(B, C, H, W)


# --------------------------------------------------------------------------
# Pure-JAX reference mirroring the PyTorch forward.
# --------------------------------------------------------------------------
def _reference(x, w):
    avg_out = jnp.mean(x, axis=1, keepdims=True)
    max_out = jnp.max(x, axis=1, keepdims=True)
    out = jnp.concatenate([avg_out, max_out], axis=1)
    conv = jax.lax.conv_general_dilated(
        out, w, window_strides=(1, 1), padding=((PAD, PAD), (PAD, PAD)),
        dimension_numbers=("NCHW", "OIHW", "NCHW"),
        precision=jax.lax.Precision.HIGHEST)
    att = jax.nn.sigmoid(jnp.maximum(conv, 0.0))
    return x * att + x


if __name__ == "__main__":
    key = jax.random.PRNGKey(0)
    kw, kx1, kx2, kx3 = jax.random.split(key, 4)

    # Deterministic synthetic conv1 weight: nn.Conv2d(2, 1, 7, bias=False).
    w = 0.1 * jax.random.normal(kw, (1, 2, KSIZE, KSIZE), dtype=jnp.float32)

    # 1) Small shape -> fused single-pass path (bt=1, grid=2).
    x1 = jax.random.normal(kx1, (2, 4, 16, 16), dtype=jnp.float32)
    y1 = spatial_attention(x1, w)
    jax.block_until_ready(y1)
    assert y1.shape == x1.shape
    assert jnp.allclose(y1, _reference(x1, w), atol=1e-5, rtol=1e-5), "fused mismatch"

    # 2) Fused path with sublane-stacked conv (bt=2, grid=2).
    x2 = jax.random.normal(kx2, (4, 8, 16, 16), dtype=jnp.float32)
    y2 = spatial_attention(x2, w)
    jax.block_until_ready(y2)
    assert jnp.allclose(y2, _reference(x2, w), atol=1e-5, rtol=1e-5), "stacked mismatch"

    # 3) Force the two-phase C-tiled schedule with a tiny block budget
    #    (exercises the production-shape code path on a small problem).
    x3 = jax.random.normal(kx3, (2, 32, 16, 16), dtype=jnp.float32)
    y3 = spatial_attention(x3, w, block_budget_bytes=24 * 1024)
    jax.block_until_ready(y3)
    assert jnp.allclose(y3, _reference(x3, w), atol=1e-5, rtol=1e-5), "two-phase mismatch"

    print("KERNEL_OK")
</pallas_src>

<mosaic_0001>
module attributes {stable_mosaic.version = 11 : i64} {
  func.func @_fused_kernel(%arg0: i32, %arg1: memref<1x4x256xf32, #tpu.memory_space<vmem>>, %arg2: memref<98xf32, #tpu.memory_space<smem>>, %arg3: memref<1x4x256xf32, #tpu.memory_space<vmem>>, %arg4: memref<1x512xf32, #tpu.memory_space<vmem>>, %arg5: memref<1x512xf32, #tpu.memory_space<vmem>>) attributes {dimension_semantics = [#tpu.dimension_semantics<parallel>], iteration_bounds = array<i64: 2>, scalar_prefetch = 0 : i64, scratch_operands = 2 : i64, tpu.core_type = #tpu.core_type<tc>, window_params = [{transform_indices = @transform_0, window_bounds = array<i64: 1, 4, 256>}, {transform_indices = @transform_1, window_bounds = array<i64: 98>}, {transform_indices = @transform_2, window_bounds = array<i64: 1, 4, 256>}]} {
    %cst = arith.constant 0.000000e+00 : f32
    %0 = vector.broadcast %cst : f32 to vector<1x128xf32>
    %c0 = arith.constant 0 : index
    %c0_0 = arith.constant 0 : index
    %1 = vector.load %arg4[%c0, %c0_0] : memref<1x512xf32, #tpu.memory_space<vmem>>, vector<1x128xf32>
    tpu.vector_store %arg4[%c0, %c0_0], %0 {strides = array<i32>} : memref<1x512xf32, #tpu.memory_space<vmem>>, vector<1x128xf32>,
    %c0_1 = arith.constant 0 : index
    %c384 = arith.constant 384 : index
    %2 = vector.load %arg4[%c0_1, %c384] : memref<1x512xf32, #tpu.memory_space<vmem>>, vector<1x128xf32>
    tpu.vector_store %arg4[%c0_1, %c384], %0 {strides = array<i32>} : memref<1x512xf32, #tpu.memory_space<vmem>>, vector<1x128xf32>,
    %c0_2 = arith.constant 0 : index
    %c0_3 = arith.constant 0 : index
    %3 = vector.load %arg5[%c0_2, %c0_3] : memref<1x512xf32, #tpu.memory_space<vmem>>, vector<1x128xf32>
    tpu.vector_store %arg5[%c0_2, %c0_3], %0 {strides = array<i32>} : memref<1x512xf32, #tpu.memory_space<vmem>>, vector<1x128xf32>,
    %c0_4 = arith.constant 0 : index
    %c384_5 = arith.constant 384 : index
    %4 = vector.load %arg5[%c0_4, %c384_5] : memref<1x512xf32, #tpu.memory_space<vmem>>, vector<1x128xf32>
    tpu.vector_store %arg5[%c0_4, %c384_5], %0 {strides = array<i32>} : memref<1x512xf32, #tpu.memory_space<vmem>>, vector<1x128xf32>,
    %c0_6 = arith.constant 0 : index
    %c0_7 = arith.constant 0 : index
    %c0_8 = arith.constant 0 : index
    %5 = vector.load %arg1[%c0_6, %c0_7, %c0_8] : memref<1x4x256xf32, #tpu.memory_space<vmem>>, vector<1x4x256xf32>
    %6 = vector.shape_cast %5 : vector<1x4x256xf32> to vector<4x256xf32>
    %cst_9 = arith.constant dense<0.000000e+00> : vector<256xf32>
    %7 = vector.multi_reduction <add>, %6, %cst_9 [0] : vector<4x256xf32> to vector<256xf32>
    %8 = vector.shape_cast %7 : vector<256xf32> to vector<1x256xf32>
    %cst_10 = arith.constant 4.000000e+00 : f32
    %9 = vector.broadcast %cst_10 : f32 to vector<1x256xf32>
    %10 = arith.divf %8, %9 : vector<1x256xf32>
    %c0_11 = arith.constant 0 : index
    %c128 = arith.constant 128 : index
    %11 = vector.load %arg4[%c0_11, %c128] : memref<1x512xf32, #tpu.memory_space<vmem>>, vector<1x256xf32>
    tpu.vector_store %arg4[%c0_11, %c128], %10 {strides = array<i32>} : memref<1x512xf32, #tpu.memory_space<vmem>>, vector<1x256xf32>,
    %cst_12 = arith.constant dense<0xFF800000> : vector<256xf32>
    %12 = vector.multi_reduction <maximumf>, %6, %cst_12 [0] : vector<4x256xf32> to vector<256xf32>
    %13 = vector.shape_cast %12 : vector<256xf32> to vector<1x256xf32>
    %c0_13 = arith.constant 0 : index
    %c128_14 = arith.constant 128 : index
    %14 = vector.load %arg5[%c0_13, %c128_14] : memref<1x512xf32, #tpu.memory_space<vmem>>, vector<1x256xf32>
    tpu.vector_store %arg5[%c0_13, %c128_14], %13 {strides = array<i32>} : memref<1x512xf32, #tpu.memory_space<vmem>>, vector<1x256xf32>,
    %15 = tpu.iota {dimensions = array<i32: 1>} : vector<1x256xi32>
    %c16_i32 = arith.constant 16 : i32
    %c0_i32 = arith.constant 0 : i32
    %16 = arith.cmpi eq, %c16_i32, %c0_i32 : i32
    %c1_i32 = arith.constant 1 : i32
    %17 = arith.select %16, %c1_i32, %c16_i32 : i32
    %18 = vector.broadcast %17 : i32 to vector<1x256xi32>
    %19 = arith.remsi %15, %18 : vector<1x256xi32>
    %c0_i32_15 = arith.constant 0 : i32
    %20 = vector.broadcast %c0_i32_15 : i32 to vector<1x256xi32>
    %21 = arith.cmpi ne, %19, %20 : vector<1x256xi32>
    %c0_i32_16 = arith.constant 0 : i32
    %22 = vector.broadcast %c0_i32_16 : i32 to vector<1x256xi32>
    %23 = arith.cmpi slt, %19, %22 : vector<1x256xi32>
    %c0_i32_17 = arith.constant 0 : i32
    %24 = arith.cmpi slt, %17, %c0_i32_17 : i32
    %25 = vector.broadcast %24 : i1 to vector<1x256xi1>
    %26 = vector.broadcast %25 : vector<1x256xi1> to vector<1x256xi1>
    %27 = arith.xori %23, %26 : vector<1x256xi1>
    %28 = arith.andi %27, %21 : vector<1x256xi1>
    %29 = vector.broadcast %17 : i32 to vector<1x256xi32>
    %30 = arith.addi %19, %29 : vector<1x256xi32>
    %31 = arith.select %28, %30, %19 : vector<1x256xi1>, vector<1x256xi32>
    %c-3_i32 = arith.constant -3 : i32
    %32 = vector.broadcast %c-3_i32 : i32 to vector<1x256xi32>
    %33 = arith.addi %31, %32 : vector<1x256xi32>
    %c0_i32_18 = arith.constant 0 : i32
    %34 = vector.broadcast %c0_i32_18 : i32 to vector<1x256xi32>
    %35 = arith.cmpi sge, %33, %34 : vector<1x256xi32>
    %c-3_i32_19 = arith.constant -3 : i32
    %36 = vector.broadcast %c-3_i32_19 : i32 to vector<1x256xi32>
    %37 = arith.addi %31, %36 : vector<1x256xi32>
    %c16_i32_20 = arith.constant 16 : i32
    %38 = vector.broadcast %c16_i32_20 : i32 to vector<1x256xi32>
    %39 = arith.cmpi slt, %37, %38 : vector<1x256xi32>
    %40 = arith.andi %35, %39 : vector<1x256xi1>
    %c-2_i32 = arith.constant -2 : i32
    %41 = vector.broadcast %c-2_i32 : i32 to vector<1x256xi32>
    %42 = arith.addi %31, %41 : vector<1x256xi32>
    %c0_i32_21 = arith.constant 0 : i32
    %43 = vector.broadcast %c0_i32_21 : i32 to vector<1x256xi32>
    %44 = arith.cmpi sge, %42, %43 : vector<1x256xi32>
    %c-2_i32_22 = arith.constant -2 : i32
    %45 = vector.broadcast %c-2_i32_22 : i32 to vector<1x256xi32>
    %46 = arith.addi %31, %45 : vector<1x256xi32>
    %c16_i32_23 = arith.constant 16 : i32
    %47 = vector.broadcast %c16_i32_23 : i32 to vector<1x256xi32>
    %48 = arith.cmpi slt, %46, %47 : vector<1x256xi32>
    %49 = arith.andi %44, %48 : vector<1x256xi1>
    %c-1_i32 = arith.constant -1 : i32
    %50 = vector.broadcast %c-1_i32 : i32 to vector<1x256xi32>
    %51 = arith.addi %31, %50 : vector<1x256xi32>
    %c0_i32_24 = arith.constant 0 : i32
    %52 = vector.broadcast %c0_i32_24 : i32 to vector<1x256xi32>
    %53 = arith.cmpi sge, %51, %52 : vector<1x256xi32>
    %c-1_i32_25 = arith.constant -1 : i32
    %54 = vector.broadcast %c-1_i32_25 : i32 to vector<1x256xi32>
    %55 = arith.addi %31, %54 : vector<1x256xi32>
    %c16_i32_26 = arith.constant 16 : i32
    %56 = vector.broadcast %c16_i32_26 : i32 to vector<1x256xi32>
    %57 = arith.cmpi slt, %55, %56 : vector<1x256xi32>
    %58 = arith.andi %53, %57 : vector<1x256xi1>
    %c1_i32_27 = arith.constant 1 : i32
    %59 = vector.broadcast %c1_i32_27 : i32 to vector<1x256xi32>
    %60 = arith.addi %31, %59 : vector<1x256xi32>
    %c0_i32_28 = arith.constant 0 : i32
    %61 = vector.broadcast %c0_i32_28 : i32 to vector<1x256xi32>
    %62 = arith.cmpi sge, %60, %61 : vector<1x256xi32>
    %c1_i32_29 = arith.constant 1 : i32
    %63 = vector.broadcast %c1_i32_29 : i32 to vector<1x256xi32>
    %64 = arith.addi %31, %63 : vector<1x256xi32>
    %c16_i32_30 = arith.constant 16 : i32
    %65 = vector.broadcast %c16_i32_30 : i32 to vector<1x256xi32>
    %66 = arith.cmpi slt, %64, %65 : vector<1x256xi32>
    %67 = arith.andi %62, %66 : vector<1x256xi1>
    %c2_i32 = arith.constant 2 : i32
    %68 = vector.broadcast %c2_i32 : i32 to vector<1x256xi32>
    %69 = arith.addi %31, %68 : vector<1x256xi32>
    %c0_i32_31 = arith.constant 0 : i32
    %70 = vector.broadcast %c0_i32_31 : i32 to vector<1x256xi32>
    %71 = arith.cmpi sge, %69, %70 : vector<1x256xi32>
    %c2_i32_32 = arith.constant 2 : i32
    %72 = vector.broadcast %c2_i32_32 : i32 to vector<1x256xi32>
    %73 = arith.addi %31, %72 : vector<1x256xi32>
    %c16_i32_33 = arith.constant 16 : i32
    %74 = vector.broadcast %c16_i32_33 : i32 to vector<1x256xi32>
    %75 = arith.cmpi slt, %73, %74 : vector<1x256xi32>
    %76 = arith.andi %71, %75 : vector<1x256xi1>
    %c3_i32 = arith.constant 3 : i32
    %77 = vector.broadcast %c3_i32 : i32 to vector<1x256xi32>
    %78 = arith.addi %31, %77 : vector<1x256xi32>
    %c0_i32_34 = arith.constant 0 : i32
    %79 = vector.broadcast %c0_i32_34 : i32 to vector<1x256xi32>
    %80 = arith.cmpi sge, %78, %79 : vector<1x256xi32>
    %c3_i32_35 = arith.constant 3 : i32
    %81 = vector.broadcast %c3_i32_35 : i32 to vector<1x256xi32>
    %82 = arith.addi %31, %81 : vector<1x256xi32>
    %c16_i32_36 = arith.constant 16 : i32
    %83 = vector.broadcast %c16_i32_36 : i32 to vector<1x256xi32>
    %84 = arith.cmpi slt, %82, %83 : vector<1x256xi32>
    %85 = arith.andi %80, %84 : vector<1x256xi1>
    %cst_37 = arith.constant 0.000000e+00 : f32
    %86 = vector.broadcast %cst_37 : f32 to vector<1x256xf32>
    %cst_38 = arith.constant 0.000000e+00 : f32
    %87 = vector.broadcast %cst_38 : f32 to vector<1x256xf32>
    %cst_39 = arith.constant 0.000000e+00 : f32
    %88 = vector.broadcast %cst_39 : f32 to vector<1x256xf32>
    %cst_40 = arith.constant 0.000000e+00 : f32
    %89 = vector.broadcast %cst_40 : f32 to vector<1x256xf32>
    %c0_41 = arith.constant 0 : index
    %90 = memref.load %arg2[%c0_41] : memref<98xf32, #tpu.memory_space<smem>>
    %c49 = arith.constant 49 : index
    %91 = memref.load %arg2[%c49] : memref<98xf32, #tpu.memory_space<smem>>
    %c0_42 = arith.constant 0 : index
    %c77 = arith.constant 77 : index
    %92 = vector.load %arg4[%c0_42, %c77] : memref<1x512xf32, #tpu.memory_space<vmem>>, vector<1x256xf32>
    %93 = vector.broadcast %90 : f32 to vector<1x256xf32>
    %94 = arith.mulf %93, %92 : vector<1x256xf32>
    %c0_43 = arith.constant 0 : index
    %c77_44 = arith.constant 77 : index
    %95 = vector.load %arg5[%c0_43, %c77_44] : memref<1x512xf32, #tpu.memory_space<vmem>>, vector<1x256xf32>
    %96 = vector.broadcast %91 : f32 to vector<1x256xf32>
    %97 = arith.mulf %96, %95 : vector<1x256xf32>
    %98 = arith.addf %94, %97 : vector<1x256xf32>
    %cst_45 = arith.constant 0.000000e+00 : f32
    %99 = vector.broadcast %cst_45 : f32 to vector<1x256xf32>
    %100 = arith.select %40, %98, %99 : vector<1x256xi1>, vector<1x256xf32>
    %101 = arith.addf %86, %100 : vector<1x256xf32>
    %c1 = arith.constant 1 : index
    %102 = memref.load %arg2[%c1] : memref<98xf32, #tpu.memory_space<smem>>
    %c50 = arith.constant 50 : index
    %103 = memref.load %arg2[%c50] : memref<98xf32, #tpu.memory_space<smem>>
    %c0_46 = arith.constant 0 : index
    %c78 = arith.constant 78 : index
    %104 = vector.load %arg4[%c0_46, %c78] : memref<1x512xf32, #tpu.memory_space<vmem>>, vector<1x256xf32>
    %105 = vector.broadcast %102 : f32 to vector<1x256xf32>
    %106 = arith.mulf %105, %104 : vector<1x256xf32>
    %c0_47 = arith.constant 0 : index
    %c78_48 = arith.constant 78 : index
    %107 = vector.load %arg5[%c0_47, %c78_48] : memref<1x512xf32, #tpu.memory_space<vmem>>, vector<1x256xf32>
    %108 = vector.broadcast %103 : f32 to vector<1x256xf32>
    %109 = arith.mulf %108, %107 : vector<1x256xf32>
    %110 = arith.addf %106, %109 : vector<1x256xf32>
    %cst_49 = arith.constant 0.000000e+00 : f32
    %111 = vector.broadcast %cst_49 : f32 to vector<1x256xf32>
    %112 = arith.select %49, %110, %111 : vector<1x256xi1>, vector<1x256xf32>
    %113 = arith.addf %87, %112 : vector<1x256xf32>
    %c2 = arith.constant 2 : index
    %114 = memref.load %arg2[%c2] : memref<98xf32, #tpu.memory_space<smem>>
    %c51 = arith.constant 51 : index
    %115 = memref.load %arg2[%c51] : memref<98xf32, #tpu.memory_space<smem>>
    %c0_50 = arith.constant 0 : index
    %c79 = arith.constant 79 : index
    %116 = vector.load %arg4[%c0_50, %c79] : memref<1x512xf32, #tpu.memory_space<vmem>>, vector<1x256xf32>
    %117 = vector.broadcast %114 : f32 to vector<1x256xf32>
    %118 = arith.mulf %117, %116 : vector<1x256xf32>
    %c0_51 = arith.constant 0 : index
    %c79_52 = arith.constant 79 : index
    %119 = vector.load %arg5[%c0_51, %c79_52] : memref<1x512xf32, #tpu.memory_space<vmem>>, vector<1x256xf32>
    %120 = vector.broadcast %115 : f32 to vector<1x256xf32>
    %121 = arith.mulf %120, %119 : vector<1x256xf32>
    %122 = arith.addf %118, %121 : vector<1x256xf32>
    %cst_53 = arith.constant 0.000000e+00 : f32
    %123 = vector.broadcast %cst_53 : f32 to vector<1x256xf32>
    %124 = arith.select %58, %122, %123 : vector<1x256xi1>, vector<1x256xf32>
    %125 = arith.addf %88, %124 : vector<1x256xf32>
    %c3 = arith.constant 3 : index
    %126 = memref.load %arg2[%c3] : memref<98xf32, #tpu.memory_space<smem>>
    %c52 = arith.constant 52 : index
    %127 = memref.load %arg2[%c52] : memref<98xf32, #tpu.memory_space<smem>>
    %c0_54 = arith.constant 0 : index
    %c80 = arith.constant 80 : index
    %128 = vector.load %arg4[%c0_54, %c80] : memref<1x512xf32, #tpu.memory_space<vmem>>, vector<1x256xf32>
    %129 = vector.broadcast %126 : f32 to vector<1x256xf32>
    %130 = arith.mulf %129, %128 : vector<1x256xf32>
    %c0_55 = arith.constant 0 : index
    %c80_56 = arith.constant 80 : index
    %131 = vector.load %arg5[%c0_55, %c80_56] : memref<1x512xf32, #tpu.memory_space<vmem>>, vector<1x256xf32>
    %132 = vector.broadcast %127 : f32 to vector<1x256xf32>
    %133 = arith.mulf %132, %131 : vector<1x256xf32>
    %134 = arith.addf %130, %133 : vector<1x256xf32>
    %135 = arith.addf %89, %134 : vector<1x256xf32>
    %c4 = arith.constant 4 : index
    %136 = memref.load %arg2[%c4] : memref<98xf32, #tpu.memory_space<smem>>
    %c53 = arith.constant 53 : index
    %137 = memref.load %arg2[%c53] : memref<98xf32, #tpu.memory_space<smem>>
    %c0_57 = arith.constant 0 : index
    %c81 = arith.constant 81 : index
    %138 = vector.load %arg4[%c0_57, %c81] : memref<1x512xf32, #tpu.memory_space<vmem>>, vector<1x256xf32>
    %139 = vector.broadcast %136 : f32 to vector<1x256xf32>
    %140 = arith.mulf %139, %138 : vector<1x256xf32>
    %c0_58 = arith.constant 0 : index
    %c81_59 = arith.constant 81 : index
    %141 = vector.load %arg5[%c0_58, %c81_59] : memref<1x512xf32, #tpu.memory_space<vmem>>, vector<1x256xf32>
    %142 = vector.broadcast %137 : f32 to vector<1x256xf32>
    %143 = arith.mulf %142, %141 : vector<1x256xf32>
    %144 = arith.addf %140, %143 : vector<1x256xf32>
    %cst_60 = arith.constant 0.000000e+00 : f32
    %145 = vector.broadcast %cst_60 : f32 to vector<1x256xf32>
    %146 = arith.select %67, %144, %145 : vector<1x256xi1>, vector<1x256xf32>
    %147 = arith.addf %101, %146 : vector<1x256xf32>
    %c5 = arith.constant 5 : index
    %148 = memref.load %arg2[%c5] : memref<98xf32, #tpu.memory_space<smem>>
    %c54 = arith.constant 54 : index
    %149 = memref.load %arg2[%c54] : memref<98xf32, #tpu.memory_space<smem>>
    %c0_61 = arith.constant 0 : index
    %c82 = arith.constant 82 : index
    %150 = vector.load %arg4[%c0_61, %c82] : memref<1x512xf32, #tpu.memory_space<vmem>>, vector<1x256xf32>
    %151 = vector.broadcast %148 : f32 to vector<1x256xf32>
    %152 = arith.mulf %151, %150 : vector<1x256xf32>
    %c0_62 = arith.constant 0 : index
    %c82_63 = arith.constant 82 : index
    %153 = vector.load %arg5[%c0_62, %c82_63] : memref<1x512xf32, #tpu.memory_space<vmem>>, vector<1x256xf32>
    %154 = vector.broadcast %149 : f32 to vector<1x256xf32>
    %155 = arith.mulf %154, %153 : vector<1x256xf32>
    %156 = arith.addf %152, %155 : vector<1x256xf32>
    %cst_64 = arith.constant 0.000000e+00 : f32
    %157 = vector.broadcast %cst_64 : f32 to vector<1x256xf32>
    %158 = arith.select %76, %156, %157 : vector<1x256xi1>, vector<1x256xf32>
    %159 = arith.addf %113, %158 : vector<1x256xf32>
    %c6 = arith.constant 6 : index
    %160 = memref.load %arg2[%c6] : memref<98xf32, #tpu.memory_space<smem>>
    %c55 = arith.constant 55 : index
    %161 = memref.load %arg2[%c55] : memref<98xf32, #tpu.memory_space<smem>>
    %c0_65 = arith.constant 0 : index
    %c83 = arith.constant 83 : index
    %162 = vector.load %arg4[%c0_65, %c83] : memref<1x512xf32, #tpu.memory_space<vmem>>, vector<1x256xf32>
    %163 = vector.broadcast %160 : f32 to vector<1x256xf32>
    %164 = arith.mulf %163, %162 : vector<1x256xf32>
    %c0_66 = arith.constant 0 : index
    %c83_67 = arith.constant 83 : index
    %165 = vector.load %arg5[%c0_66, %c83_67] : memref<1x512xf32, #tpu.memory_space<vmem>>, vector<1x256xf32>
    %166 = vector.broadcast %161 : f32 to vector<1x256xf32>
    %167 = arith.mulf %166, %165 : vector<1x256xf32>
    %168 = arith.addf %164, %167 : vector<1x256xf32>
    %cst_68 = arith.constant 0.000000e+00 : f32
    %169 = vector.broadcast %cst_68 : f32 to vector<1x256xf32>
    %170 = arith.select %85, %168, %169 : vector<1x256xi1>, vector<1x256xf32>
    %171 = arith.addf %125, %170 : vector<1x256xf32>
    %c7 = arith.constant 7 : index
    %172 = memref.load %arg2[%c7] : memref<98xf32, #tpu.memory_space<smem>>
    %c56 = arith.constant 56 : index
    %173 = memref.load %arg2[%c56] : memref<98xf32, #tpu.memory_space<smem>>
    %c0_69 = arith.constant 0 : index
    %c93 = arith.constant 93 : index
    %174 = vector.load %arg4[%c0_69, %c93] : memref<1x512xf32, #tpu.memory_space<vmem>>, vector<1x256xf32>
    %175 = vector.broadcast %172 : f32 to vector<1x256xf32>
    %176 = arith.mulf %175, %174 : vector<1x256xf32>
    %c0_70 = arith.constant 0 : index
    %c93_71 = arith.constant 93 : index
    %177 = vector.load %arg5[%c0_70, %c93_71] : memref<1x512xf32, #tpu.memory_space<vmem>>, vector<1x256xf32>
    %178 = vector.broadcast %173 : f32 to vector<1x256xf32>
    %179 = arith.mulf %178, %177 : vector<1x256xf32>
    %180 = arith.addf %176, %179 : vector<1x256xf32>
    %cst_72 = arith.constant 0.000000e+00 : f32
    %181 = vector.broadcast %cst_72 : f32 to vector<1x256xf32>
    %182 = arith.select %40, %180, %181 : vector<1x256xi1>, vector<1x256xf32>
    %183 = arith.addf %135, %182 : vector<1x256xf32>
    %c8 = arith.constant 8 : index
    %184 = memref.load %arg2[%c8] : memref<98xf32, #tpu.memory_space<smem>>
    %c57 = arith.constant 57 : index
    %185 = memref.load %arg2[%c57] : memref<98xf32, #tpu.memory_space<smem>>
    %c0_73 = arith.constant 0 : index
    %c94 = arith.constant 94 : index
    %186 = vector.load %arg4[%c0_73, %c94] : memref<1x512xf32, #tpu.memory_space<vmem>>, vector<1x256xf32>
    %187 = vector.broadcast %184 : f32 to vector<1x256xf32>
    %188 = arith.mulf %187, %186 : vector<1x256xf32>
    %c0_74 = arith.constant 0 : index
    %c94_75 = arith.constant 94 : index
    %189 = vector.load %arg5[%c0_74, %c94_75] : memref<1x512xf32, #tpu.memory_space<vmem>>, vector<1x256xf32>
    %190 = vector.broadcast %185 : f32 to vector<1x256xf32>
    %191 = arith.mulf %190, %189 : vector<1x256xf32>
    %192 = arith.addf %188, %191 : vector<1x256xf32>
    %cst_76 = arith.constant 0.000000e+00 : f32
    %193 = vector.broadcast %cst_76 : f32 to vector<1x256xf32>
    %194 = arith.select %49, %192, %193 : vector<1x256xi1>, vector<1x256xf32>
    %195 = arith.addf %147, %194 : vector<1x256xf32>
    %c9 = arith.constant 9 : index
    %196 = memref.load %arg2[%c9] : memref<98xf32, #tpu.memory_space<smem>>
    %c58 = arith.constant 58 : index
    %197 = memref.load %arg2[%c58] : memref<98xf32, #tpu.memory_space<smem>>
    %c0_77 = arith.constant 0 : index
    %c95 = arith.constant 95 : index
    %198 = vector.load %arg4[%c0_77, %c95] : memref<1x512xf32, #tpu.memory_space<vmem>>, vector<1x256xf32>
    %199 = vector.broadcast %196 : f32 to vector<1x256xf32>
    %200 = arith.mulf %199, %198 : vector<1x256xf32>
    %c0_78 = arith.constant 0 : index
    %c95_79 = arith.constant 95 : index
    %201 = vector.load %arg5[%c0_78, %c95_79] : memref<1x512xf32, #tpu.memory_space<vmem>>, vector<1x256xf32>
    %202 = vector.broadcast %197 : f32 to vector<1x256xf32>
    %203 = arith.mulf %202, %201 : vector<1x256xf32>
    %204 = arith.addf %200, %203 : vector<1x256xf32>
    %cst_80 = arith.constant 0.000000e+00 : f32
    %205 = vector.broadcast %cst_80 : f32 to vector<1x256xf32>
    %206 = arith.select %58, %204, %205 : vector<1x256xi1>, vector<1x256xf32>
    %207 = arith.addf %159, %206 : vector<1x256xf32>
    %c10 = arith.constant 10 : index
    %208 = memref.load %arg2[%c10] : memref<98xf32, #tpu.memory_space<smem>>
    %c59 = arith.constant 59 : index
    %209 = memref.load %arg2[%c59] : memref<98xf32, #tpu.memory_space<smem>>
    %c0_81 = arith.constant 0 : index
    %c96 = arith.constant 96 : index
    %210 = vector.load %arg4[%c0_81, %c96] : memref<1x512xf32, #tpu.memory_space<vmem>>, vector<1x256xf32>
    %211 = vector.broadcast %208 : f32 to vector<1x256xf32>
    %212 = arith.mulf %211, %210 : vector<1x256xf32>
    %c0_82 = arith.constant 0 : index
    %c96_83 = arith.constant 96 : index
    %213 = vector.load %arg5[%c0_82, %c96_83] : memref<1x512xf32, #tpu.memory_space<vmem>>, vector<1x256xf32>
    %214 = vector.broadcast %209 : f32 to vector<1x256xf32>
    %215 = arith.mulf %214, %213 : vector<1x256xf32>
    %216 = arith.addf %212, %215 : vector<1x256xf32>
    %217 = arith.addf %171, %216 : vector<1x256xf32>
    %c11 = arith.constant 11 : index
    %218 = memref.load %arg2[%c11] : memref<98xf32, #tpu.memory_space<smem>>
    %c60 = arith.constant 60 : index
    %219 = memref.load %arg2[%c60] : memref<98xf32, #tpu.memory_space<smem>>
    %c0_84 = arith.constant 0 : index
    %c97 = arith.constant 97 : index
    %220 = vector.load %arg4[%c0_84, %c97] : memref<1x512xf32, #tpu.memory_space<vmem>>, vector<1x256xf32>
    %221 = vector.broadcast %218 : f32 to vector<1x256xf32>
    %222 = arith.mulf %221, %220 : vector<1x256xf32>
    %c0_85 = arith.constant 0 : index
    %c97_86 = arith.constant 97 : index
    %223 = vector.load %arg5[%c0_85, %c97_86] : memref<1x512xf32, #tpu.memory_space<vmem>>, vector<1x256xf32>
    %224 = vector.broadcast %219 : f32 to vector<1x256xf32>
    %225 = arith.mulf %224, %223 : vector<1x256xf32>
    %226 = arith.addf %222, %225 : vector<1x256xf32>
    %cst_87 = arith.constant 0.000000e+00 : f32
    %227 = vector.broadcast %cst_87 : f32 to vector<1x256xf32>
    %228 = arith.select %67, %226, %227 : vector<1x256xi1>, vector<1x256xf32>
    %229 = arith.addf %183, %228 : vector<1x256xf32>
    %c12 = arith.constant 12 : index
    %230 = memref.load %arg2[%c12] : memref<98xf32, #tpu.memory_space<smem>>
    %c61 = arith.constant 61 : index
    %231 = memref.load %arg2[%c61] : memref<98xf32, #tpu.memory_space<smem>>
    %c0_88 = arith.constant 0 : index
    %c98 = arith.constant 98 : index
    %232 = vector.load %arg4[%c0_88, %c98] : memref<1x512xf32, #tpu.memory_space<vmem>>, vector<1x256xf32>
    %233 = vector.broadcast %230 : f32 to vector<1x256xf32>
    %234 = arith.mulf %233, %232 : vector<1x256xf32>
    %c0_89 = arith.constant 0 : index
    %c98_90 = arith.constant 98 : index
    %235 = vector.load %arg5[%c0_89, %c98_90] : memref<1x512xf32, #tpu.memory_space<vmem>>, vector<1x256xf32>
    %236 = vector.broadcast %231 : f32 to vector<1x256xf32>
    %237 = arith.mulf %236, %235 : vector<1x256xf32>
    %238 = arith.addf %234, %237 : vector<1x256xf32>
    %cst_91 = arith.constant 0.000000e+00 : f32
    %239 = vector.broadcast %cst_91 : f32 to vector<1x256xf32>
    %240 = arith.select %76, %238, %239 : vector<1x256xi1>, vector<1x256xf32>
    %241 = arith.addf %195, %240 : vector<1x256xf32>
    %c13 = arith.constant 13 : index
    %242 = memref.load %arg2[%c13] : memref<98xf32, #tpu.memory_space<smem>>
    %c62 = arith.constant 62 : index
    %243 = memref.load %arg2[%c62] : memref<98xf32, #tpu.memory_space<smem>>
    %c0_92 = arith.constant 0 : index
    %c99 = arith.constant 99 : index
    %244 = vector.load %arg4[%c0_92, %c99] : memref<1x512xf32, #tpu.memory_space<vmem>>, vector<1x256xf32>
    %245 = vector.broadcast %242 : f32 to vector<1x256xf32>
    %246 = arith.mulf %245, %244 : vector<1x256xf32>
    %c0_93 = arith.constant 0 : index
    %c99_94 = arith.constant 99 : index
    %247 = vector.load %arg5[%c0_93, %c99_94] : memref<1x512xf32, #tpu.memory_space<vmem>>, vector<1x256xf32>
    %248 = vector.broadcast %243 : f32 to vector<1x256xf32>
    %249 = arith.mulf %248, %247 : vector<1x256xf32>
    %250 = arith.addf %246, %249 : vector<1x256xf32>
    %cst_95 = arith.constant 0.000000e+00 : f32
    %251 = vector.broadcast %cst_95 : f32 to vector<1x256xf32>
    %252 = arith.select %85, %250, %251 : vector<1x256xi1>, vector<1x256xf32>
    %253 = arith.addf %207, %252 : vector<1x256xf32>
    %c14 = arith.constant 14 : index
    %254 = memref.load %arg2[%c14] : memref<98xf32, #tpu.memory_space<smem>>
    %c63 = arith.constant 63 : index
    %255 = memref.load %arg2[%c63] : memref<98xf32, #tpu.memory_space<smem>>
    %c0_96 = arith.constant 0 : index
    %c109 = arith.constant 109 : index
    %256 = vector.load %arg4[%c0_96, %c109] : memref<1x512xf32, #tpu.memory_space<vmem>>, vector<1x256xf32>
    %257 = vector.broadcast %254 : f32 to vector<1x256xf32>
    %258 = arith.mulf %257, %256 : vector<1x256xf32>
    %c0_97 = arith.constant 0 : index
    %c109_98 = arith.constant 109 : index
    %259 = vector.load %arg5[%c0_97, %c109_98] : memref<1x512xf32, #tpu.memory_space<vmem>>, vector<1x256xf32>
    %260 = vector.broadcast %255 : f32 to vector<1x256xf32>
    %261 = arith.mulf %260, %259 : vector<1x256xf32>
    %262 = arith.addf %258, %261 : vector<1x256xf32>
    %cst_99 = arith.constant 0.000000e+00 : f32
    %263 = vector.broadcast %cst_99 : f32 to vector<1x256xf32>
    %264 = arith.select %40, %262, %263 : vector<1x256xi1>, vector<1x256xf32>
    %265 = arith.addf %217, %264 : vector<1x256xf32>
    %c15 = arith.constant 15 : index
    %266 = memref.load %arg2[%c15] : memref<98xf32, #tpu.memory_space<smem>>
    %c64 = arith.constant 64 : index
    %267 = memref.load %arg2[%c64] : memref<98xf32, #tpu.memory_space<smem>>
    %c0_100 = arith.constant 0 : index
    %c110 = arith.constant 110 : index
    %268 = vector.load %arg4[%c0_100, %c110] : memref<1x512xf32, #tpu.memory_space<vmem>>, vector<1x256xf32>
    %269 = vector.broadcast %266 : f32 to vector<1x256xf32>
    %270 = arith.mulf %269, %268 : vector<1x256xf32>
    %c0_101 = arith.constant 0 : index
    %c110_102 = arith.constant 110 : index
    %271 = vector.load %arg5[%c0_101, %c110_102] : memref<1x512xf32, #tpu.memory_space<vmem>>, vector<1x256xf32>
    %272 = vector.broadcast %267 : f32 to vector<1x256xf32>
    %273 = arith.mulf %272, %271 : vector<1x256xf32>
    %274 = arith.addf %270, %273 : vector<1x256xf32>
    %cst_103 = arith.constant 0.000000e+00 : f32
    %275 = vector.broadcast %cst_103 : f32 to vector<1x256xf32>
    %276 = arith.select %49, %274, %275 : vector<1x256xi1>, vector<1x256xf32>
    %277 = arith.addf %229, %276 : vector<1x256xf32>
    %c16 = arith.constant 16 : index
    %278 = memref.load %arg2[%c16] : memref<98xf32, #tpu.memory_space<smem>>
    %c65 = arith.constant 65 : index
    %279 = memref.load %arg2[%c65] : memref<98xf32, #tpu.memory_space<smem>>
    %c0_104 = arith.constant 0 : index
    %c111 = arith.constant 111 : index
    %280 = vector.load %arg4[%c0_104, %c111] : memref<1x512xf32, #tpu.memory_space<vmem>>, vector<1x256xf32>
    %281 = vector.broadcast %278 : f32 to vector<1x256xf32>
    %282 = arith.mulf %281, %280 : vector<1x256xf32>
    %c0_105 = arith.constant 0 : index
    %c111_106 = arith.constant 111 : index
    %283 = vector.load %arg5[%c0_105, %c111_106] : memref<1x512xf32, #tpu.memory_space<vmem>>, vector<1x256xf32>
    %284 = vector.broadcast %279 : f32 to vector<1x256xf32>
    %285 = arith.mulf %284, %283 : vector<1x256xf32>
    %286 = arith.addf %282, %285 : vector<1x256xf32>
    %cst_107 = arith.constant 0.000000e+00 : f32
    %287 = vector.broadcast %cst_107 : f32 to vector<1x256xf32>
    %288 = arith.select %58, %286, %287 : vector<1x256xi1>, vector<1x256xf32>
    %289 = arith.addf %241, %288 : vector<1x256xf32>
    %c17 = arith.constant 17 : index
    %290 = memref.load %arg2[%c17] : memref<98xf32, #tpu.memory_space<smem>>
    %c66 = arith.constant 66 : index
    %291 = memref.load %arg2[%c66] : memref<98xf32, #tpu.memory_space<smem>>
    %c0_108 = arith.constant 0 : index
    %c112 = arith.constant 112 : index
    %292 = vector.load %arg4[%c0_108, %c112] : memref<1x512xf32, #tpu.memory_space<vmem>>, vector<1x256xf32>
    %293 = vector.broadcast %290 : f32 to vector<1x256xf32>
    %294 = arith.mulf %293, %292 : vector<1x256xf32>
    %c0_109 = arith.constant 0 : index
    %c112_110 = arith.constant 112 : index
    %295 = vector.load %arg5[%c0_109, %c112_110] : memref<1x512xf32, #tpu.memory_space<vmem>>, vector<1x256xf32>
    %296 = vector.broadcast %291 : f32 to vector<1x256xf32>
    %297 = arith.mulf %296, %295 : vector<1x256xf32>
    %298 = arith.addf %294, %297 : vector<1x256xf32>
    %299 = arith.addf %253, %298 : vector<1x256xf32>
    %c18 = arith.constant 18 : index
    %300 = memref.load %arg2[%c18] : memref<98xf32, #tpu.memory_space<smem>>
    %c67 = arith.constant 67 : index
    %301 = memref.load %arg2[%c67] : memref<98xf32, #tpu.memory_space<smem>>
    %c0_111 = arith.constant 0 : index
    %c113 = arith.constant 113 : index
    %302 = vector.load %arg4[%c0_111, %c113] : memref<1x512xf32, #tpu.memory_space<vmem>>, vector<1x256xf32>
    %303 = vector.broadcast %300 : f32 to vector<1x256xf32>
    %304 = arith.mulf %303, %302 : vector<1x256xf32>
    %c0_112 = arith.constant 0 : index
    %c113_113 = arith.constant 113 : index
    %305 = vector.load %arg5[%c0_112, %c113_113] : memref<1x512xf32, #tpu.memory_space<vmem>>, vector<1x256xf32>
    %306 = vector.broadcast %301 : f32 to vector<1x256xf32>
    %307 = arith.mulf %306, %305 : vector<1x256xf32>
    %308 = arith.addf %304, %307 : vector<1x256xf32>
    %cst_114 = arith.constant 0.000000e+00 : f32
    %309 = vector.broadcast %cst_114 : f32 to vector<1x256xf32>
    %310 = arith.select %67, %308, %309 : vector<1x256xi1>, vector<1x256xf32>
    %311 = arith.addf %265, %310 : vector<1x256xf32>
    %c19 = arith.constant 19 : index
    %312 = memref.load %arg2[%c19] : memref<98xf32, #tpu.memory_space<smem>>
    %c68 = arith.constant 68 : index
    %313 = memref.load %arg2[%c68] : memref<98xf32, #tpu.memory_space<smem>>
    %c0_115 = arith.constant 0 : index
    %c114 = arith.constant 114 : index
    %314 = vector.load %arg4[%c0_115, %c114] : memref<1x512xf32, #tpu.memory_space<vmem>>, vector<1x256xf32>
    %315 = vector.broadcast %312 : f32 to vector<1x256xf32>
    %316 = arith.mulf %315, %314 : vector<1x256xf32>
    %c0_116 = arith.constant 0 : index
    %c114_117 = arith.constant 114 : index
    %317 = vector.load %arg5[%c0_116, %c114_117] : memref<1x512xf32, #tpu.memory_space<vmem>>, vector<1x256xf32>
    %318 = vector.broadcast %313 : f32 to vector<1x256xf32>
    %319 = arith.mulf %318, %317 : vector<1x256xf32>
    %320 = arith.addf %316, %319 : vector<1x256xf32>
    %cst_118 = arith.constant 0.000000e+00 : f32
    %321 = vector.broadcast %cst_118 : f32 to vector<1x256xf32>
    %322 = arith.select %76, %320, %321 : vector<1x256xi1>, vector<1x256xf32>
    %323 = arith.addf %277, %322 : vector<1x256xf32>
    %c20 = arith.constant 20 : index
    %324 = memref.load %arg2[%c20] : memref<98xf32, #tpu.memory_space<smem>>
    %c69 = arith.constant 69 : index
    %325 = memref.load %arg2[%c69] : memref<98xf32, #tpu.memory_space<smem>>
    %c0_119 = arith.constant 0 : index
    %c115 = arith.constant 115 : index
    %326 = vector.load %arg4[%c0_119, %c115] : memref<1x512xf32, #tpu.memory_space<vmem>>, vector<1x256xf32>
    %327 = vector.broadcast %324 : f32 to vector<1x256xf32>
    %328 = arith.mulf %327, %326 : vector<1x256xf32>
    %c0_120 = arith.constant 0 : index
    %c115_121 = arith.constant 115 : index
    %329 = vector.load %arg5[%c0_120, %c115_121] : memref<1x512xf32, #tpu.memory_space<vmem>>, vector<1x256xf32>
    %330 = vector.broadcast %325 : f32 to vector<1x256xf32>
    %331 = arith.mulf %330, %329 : vector<1x256xf32>
    %332 = arith.addf %328, %331 : vector<1x256xf32>
    %cst_122 = arith.constant 0.000000e+00 : f32
    %333 = vector.broadcast %cst_122 : f32 to vector<1x256xf32>
    %334 = arith.select %85, %332, %333 : vector<1x256xi1>, vector<1x256xf32>
    %335 = arith.addf %289, %334 : vector<1x256xf32>
    %c21 = arith.constant 21 : index
    %336 = memref.load %arg2[%c21] : memref<98xf32, #tpu.memory_space<smem>>
    %c70 = arith.constant 70 : index
    %337 = memref.load %arg2[%c70] : memref<98xf32, #tpu.memory_space<smem>>
    %c0_123 = arith.constant 0 : index
    %c125 = arith.constant 125 : index
    %338 = vector.load %arg4[%c0_123, %c125] : memref<1x512xf32, #tpu.memory_space<vmem>>, vector<1x256xf32>
    %339 = vector.broadcast %336 : f32 to vector<1x256xf32>
    %340 = arith.mulf %339, %338 : vector<1x256xf32>
    %c0_124 = arith.constant 0 : index
    %c125_125 = arith.constant 125 : index
    %341 = vector.load %arg5[%c0_124, %c125_125] : memref<1x512xf32, #tpu.memory_space<vmem>>, vector<1x256xf32>
    %342 = vector.broadcast %337 : f32 to vector<1x256xf32>
    %343 = arith.mulf %342, %341 : vector<1x256xf32>
    %344 = arith.addf %340, %343 : vector<1x256xf32>
    %cst_126 = arith.constant 0.000000e+00 : f32
    %345 = vector.broadcast %cst_126 : f32 to vector<1x256xf32>
    %346 = arith.select %40, %344, %345 : vector<1x256xi1>, vector<1x256xf32>
    %347 = arith.addf %299, %346 : vector<1x256xf32>
    %c22 = arith.constant 22 : index
    %348 = memref.load %arg2[%c22] : memref<98xf32, #tpu.memory_space<smem>>
    %c71 = arith.constant 71 : index
    %349 = memref.load %arg2[%c71] : memref<98xf32, #tpu.memory_space<smem>>
    %c0_127 = arith.constant 0 : index
    %c126 = arith.constant 126 : index
    %350 = vector.load %arg4[%c0_127, %c126] : memref<1x512xf32, #tpu.memory_space<vmem>>, vector<1x256xf32>
    %351 = vector.broadcast %348 : f32 to vector<1x256xf32>
    %352 = arith.mulf %351, %350 : vector<1x256xf32>
    %c0_128 = arith.constant 0 : index
    %c126_129 = arith.constant 126 : index
    %353 = vector.load %arg5[%c0_128, %c126_129] : memref<1x512xf32, #tpu.memory_space<vmem>>, vector<1x256xf32>
    %354 = vector.broadcast %349 : f32 to vector<1x256xf32>
    %355 = arith.mulf %354, %353 : vector<1x256xf32>
    %356 = arith.addf %352, %355 : vector<1x256xf32>
    %cst_130 = arith.constant 0.000000e+00 : f32
    %357 = vector.broadcast %cst_130 : f32 to vector<1x256xf32>
    %358 = arith.select %49, %356, %357 : vector<1x256xi1>, vector<1x256xf32>
    %359 = arith.addf %311, %358 : vector<1x256xf32>
    %c23 = arith.constant 23 : index
    %360 = memref.load %arg2[%c23] : memref<98xf32, #tpu.memory_space<smem>>
    %c72 = arith.constant 72 : index
    %361 = memref.load %arg2[%c72] : memref<98xf32, #tpu.memory_space<smem>>
    %c0_131 = arith.constant 0 : index
    %c127 = arith.constant 127 : index
    %362 = vector.load %arg4[%c0_131, %c127] : memref<1x512xf32, #tpu.memory_space<vmem>>, vector<1x256xf32>
    %363 = vector.broadcast %360 : f32 to vector<1x256xf32>
    %364 = arith.mulf %363, %362 : vector<1x256xf32>
    %c0_132 = arith.constant 0 : index
    %c127_133 = arith.constant 127 : index
    %365 = vector.load %arg5[%c0_132, %c127_133] : memref<1x512xf32, #tpu.memory_space<vmem>>, vector<1x256xf32>
    %366 = vector.broadcast %361 : f32 to vector<1x256xf32>
    %367 = arith.mulf %366, %365 : vector<1x256xf32>
    %368 = arith.addf %364, %367 : vector<1x256xf32>
    %cst_134 = arith.constant 0.000000e+00 : f32
    %369 = vector.broadcast %cst_134 : f32 to vector<1x256xf32>
    %370 = arith.select %58, %368, %369 : vector<1x256xi1>, vector<1x256xf32>
    %371 = arith.addf %323, %370 : vector<1x256xf32>
    %c24 = arith.constant 24 : index
    %372 = memref.load %arg2[%c24] : memref<98xf32, #tpu.memory_space<smem>>
    %c73 = arith.constant 73 : index
    %373 = memref.load %arg2[%c73] : memref<98xf32, #tpu.memory_space<smem>>
    %c0_135 = arith.constant 0 : index
    %c128_136 = arith.constant 128 : index
    %374 = vector.load %arg4[%c0_135, %c128_136] : memref<1x512xf32, #tpu.memory_space<vmem>>, vector<1x256xf32>
    %375 = vector.broadcast %372 : f32 to vector<1x256xf32>
    %376 = arith.mulf %375, %374 : vector<1x256xf32>
    %c0_137 = arith.constant 0 : index
    %c128_138 = arith.constant 128 : index
    %377 = vector.load %arg5[%c0_137, %c128_138] : memref<1x512xf32, #tpu.memory_space<vmem>>, vector<1x256xf32>
    %378 = vector.broadcast %373 : f32 to vector<1x256xf32>
    %379 = arith.mulf %378, %377 : vector<1x256xf32>
    %380 = arith.addf %376, %379 : vector<1x256xf32>
    %381 = arith.addf %335, %380 : vector<1x256xf32>
    %c25 = arith.constant 25 : index
    %382 = memref.load %arg2[%c25] : memref<98xf32, #tpu.memory_space<smem>>
    %c74 = arith.constant 74 : index
    %383 = memref.load %arg2[%c74] : memref<98xf32, #tpu.memory_space<smem>>
    %c0_139 = arith.constant 0 : index
    %c129 = arith.constant 129 : index
    %384 = vector.load %arg4[%c0_139, %c129] : memref<1x512xf32, #tpu.memory_space<vmem>>, vector<1x256xf32>
    %385 = vector.broadcast %382 : f32 to vector<1x256xf32>
    %386 = arith.mulf %385, %384 : vector<1x256xf32>
    %c0_140 = arith.constant 0 : index
    %c129_141 = arith.constant 129 : index
    %387 = vector.load %arg5[%c0_140, %c129_141] : memref<1x512xf32, #tpu.memory_space<vmem>>, vector<1x256xf32>
    %388 = vector.broadcast %383 : f32 to vector<1x256xf32>
    %389 = arith.mulf %388, %387 : vector<1x256xf32>
    %390 = arith.addf %386, %389 : vector<1x256xf32>
    %cst_142 = arith.constant 0.000000e+00 : f32
    %391 = vector.broadcast %cst_142 : f32 to vector<1x256xf32>
    %392 = arith.select %67, %390, %391 : vector<1x256xi1>, vector<1x256xf32>
    %393 = arith.addf %347, %392 : vector<1x256xf32>
    %c26 = arith.constant 26 : index
    %394 = memref.load %arg2[%c26] : memref<98xf32, #tpu.memory_space<smem>>
    %c75 = arith.constant 75 : index
    %395 = memref.load %arg2[%c75] : memref<98xf32, #tpu.memory_space<smem>>
    %c0_143 = arith.constant 0 : index
    %c130 = arith.constant 130 : index
    %396 = vector.load %arg4[%c0_143, %c130] : memref<1x512xf32, #tpu.memory_space<vmem>>, vector<1x256xf32>
    %397 = vector.broadcast %394 : f32 to vector<1x256xf32>
    %398 = arith.mulf %397, %396 : vector<1x256xf32>
    %c0_144 = arith.constant 0 : index
    %c130_145 = arith.constant 130 : index
    %399 = vector.load %arg5[%c0_144, %c130_145] : memref<1x512xf32, #tpu.memory_space<vmem>>, vector<1x256xf32>
    %400 = vector.broadcast %395 : f32 to vector<1x256xf32>
    %401 = arith.mulf %400, %399 : vector<1x256xf32>
    %402 = arith.addf %398, %401 : vector<1x256xf32>
    %cst_146 = arith.constant 0.000000e+00 : f32
    %403 = vector.broadcast %cst_146 : f32 to vector<1x256xf32>
    %404 = arith.select %76, %402, %403 : vector<1x256xi1>, vector<1x256xf32>
    %405 = arith.addf %359, %404 : vector<1x256xf32>
    %c27 = arith.constant 27 : index
    %406 = memref.load %arg2[%c27] : memref<98xf32, #tpu.memory_space<smem>>
    %c76 = arith.constant 76 : index
    %407 = memref.load %arg2[%c76] : memref<98xf32, #tpu.memory_space<smem>>
    %c0_147 = arith.constant 0 : index
    %c131 = arith.constant 131 : index
    %408 = vector.load %arg4[%c0_147, %c131] : memref<1x512xf32, #tpu.memory_space<vmem>>, vector<1x256xf32>
    %409 = vector.broadcast %406 : f32 to vector<1x256xf32>
    %410 = arith.mulf %409, %408 : vector<1x256xf32>
    %c0_148 = arith.constant 0 : index
    %c131_149 = arith.constant 131 : index
    %411 = vector.load %arg5[%c0_148, %c131_149] : memref<1x512xf32, #tpu.memory_space<vmem>>, vector<1x256xf32>
    %412 = vector.broadcast %407 : f32 to vector<1x256xf32>
    %413 = arith.mulf %412, %411 : vector<1x256xf32>
    %414 = arith.addf %410, %413 : vector<1x256xf32>
    %cst_150 = arith.constant 0.000000e+00 : f32
    %415 = vector.broadcast %cst_150 : f32 to vector<1x256xf32>
    %416 = arith.select %85, %414, %415 : vector<1x256xi1>, vector<1x256xf32>
    %417 = arith.addf %371, %416 : vector<1x256xf32>
    %c28 = arith.constant 28 : index
    %418 = memref.load %arg2[%c28] : memref<98xf32, #tpu.memory_space<smem>>
    %c77_151 = arith.constant 77 : index
    %419 = memref.load %arg2[%c77_151] : memref<98xf32, #tpu.memory_space<smem>>
    %c0_152 = arith.constant 0 : index
    %c141 = arith.constant 141 : index
    %420 = vector.load %arg4[%c0_152, %c141] : memref<1x512xf32, #tpu.memory_space<vmem>>, vector<1x256xf32>
    %421 = vector.broadcast %418 : f32 to vector<1x256xf32>
    %422 = arith.mulf %421, %420 : vector<1x256xf32>
    %c0_153 = arith.constant 0 : index
    %c141_154 = arith.constant 141 : index
    %423 = vector.load %arg5[%c0_153, %c141_154] : memref<1x512xf32, #tpu.memory_space<vmem>>, vector<1x256xf32>
    %424 = vector.broadcast %419 : f32 to vector<1x256xf32>
    %425 = arith.mulf %424, %423 : vector<1x256xf32>
    %426 = arith.addf %422, %425 : vector<1x256xf32>
    %cst_155 = arith.constant 0.000000e+00 : f32
    %427 = vector.broadcast %cst_155 : f32 to vector<1x256xf32>
    %428 = arith.select %40, %426, %427 : vector<1x256xi1>, vector<1x256xf32>
    %429 = arith.addf %381, %428 : vector<1x256xf32>
    %c29 = arith.constant 29 : index
    %430 = memref.load %arg2[%c29] : memref<98xf32, #tpu.memory_space<smem>>
    %c78_156 = arith.constant 78 : index
    %431 = memref.load %arg2[%c78_156] : memref<98xf32, #tpu.memory_space<smem>>
    %c0_157 = arith.constant 0 : index
    %c142 = arith.constant 142 : index
    %432 = vector.load %arg4[%c0_157, %c142] : memref<1x512xf32, #tpu.memory_space<vmem>>, vector<1x256xf32>
    %433 = vector.broadcast %430 : f32 to vector<1x256xf32>
    %434 = arith.mulf %433, %432 : vector<1x256xf32>
    %c0_158 = arith.constant 0 : index
    %c142_159 = arith.constant 142 : index
    %435 = vector.load %arg5[%c0_158, %c142_159] : memref<1x512xf32, #tpu.memory_space<vmem>>, vector<1x256xf32>
    %436 = vector.broadcast %431 : f32 to vector<1x256xf32>
    %437 = arith.mulf %436, %435 : vector<1x256xf32>
    %438 = arith.addf %434, %437 : vector<1x256xf32>
    %cst_160 = arith.constant 0.000000e+00 : f32
    %439 = vector.broadcast %cst_160 : f32 to vector<1x256xf32>
    %440 = arith.select %49, %438, %439 : vector<1x256xi1>, vector<1x256xf32>
    %441 = arith.addf %393, %440 : vector<1x256xf32>
    %c30 = arith.constant 30 : index
    %442 = memref.load %arg2[%c30] : memref<98xf32, #tpu.memory_space<smem>>
    %c79_161 = arith.constant 79 : index
    %443 = memref.load %arg2[%c79_161] : memref<98xf32, #tpu.memory_space<smem>>
    %c0_162 = arith.constant 0 : index
    %c143 = arith.constant 143 : index
    %444 = vector.load %arg4[%c0_162, %c143] : memref<1x512xf32, #tpu.memory_space<vmem>>, vector<1x256xf32>
    %445 = vector.broadcast %442 : f32 to vector<1x256xf32>
    %446 = arith.mulf %445, %444 : vector<1x256xf32>
    %c0_163 = arith.constant 0 : index
    %c143_164 = arith.constant 143 : index
    %447 = vector.load %arg5[%c0_163, %c143_164] : memref<1x512xf32, #tpu.memory_space<vmem>>, vector<1x256xf32>
    %448 = vector.broadcast %443 : f32 to vector<1x256xf32>
    %449 = arith.mulf %448, %447 : vector<1x256xf32>
    %450 = arith.addf %446, %449 : vector<1x256xf32>
    %cst_165 = arith.constant 0.000000e+00 : f32
    %451 = vector.broadcast %cst_165 : f32 to vector<1x256xf32>
    %452 = arith.select %58, %450, %451 : vector<1x256xi1>, vector<1x256xf32>
    %453 = arith.addf %405, %452 : vector<1x256xf32>
    %c31 = arith.constant 31 : index
    %454 = memref.load %arg2[%c31] : memref<98xf32, #tpu.memory_space<smem>>
    %c80_166 = arith.constant 80 : index
    %455 = memref.load %arg2[%c80_166] : memref<98xf32, #tpu.memory_space<smem>>
    %c0_167 = arith.constant 0 : index
    %c144 = arith.constant 144 : index
    %456 = vector.load %arg4[%c0_167, %c144] : memref<1x512xf32, #tpu.memory_space<vmem>>, vector<1x256xf32>
    %457 = vector.broadcast %454 : f32 to vector<1x256xf32>
    %458 = arith.mulf %457, %456 : vector<1x256xf32>
    %c0_168 = arith.constant 0 : index
    %c144_169 = arith.constant 144 : index
    %459 = vector.load %arg5[%c0_168, %c144_169] : memref<1x512xf32, #tpu.memory_space<vmem>>, vector<1x256xf32>
    %460 = vector.broadcast %455 : f32 to vector<1x256xf32>
    %461 = arith.mulf %460, %459 : vector<1x256xf32>
    %462 = arith.addf %458, %461 : vector<1x256xf32>
    %463 = arith.addf %417, %462 : vector<1x256xf32>
    %c32 = arith.constant 32 : index
    %464 = memref.load %arg2[%c32] : memref<98xf32, #tpu.memory_space<smem>>
    %c81_170 = arith.constant 81 : index
    %465 = memref.load %arg2[%c81_170] : memref<98xf32, #tpu.memory_space<smem>>
    %c0_171 = arith.constant 0 : index
    %c145 = arith.constant 145 : index
    %466 = vector.load %arg4[%c0_171, %c145] : memref<1x512xf32, #tpu.memory_space<vmem>>, vector<1x256xf32>
    %467 = vector.broadcast %464 : f32 to vector<1x256xf32>
    %468 = arith.mulf %467, %466 : vector<1x256xf32>
    %c0_172 = arith.constant 0 : index
    %c145_173 = arith.constant 145 : index
    %469 = vector.load %arg5[%c0_172, %c145_173] : memref<1x512xf32, #tpu.memory_space<vmem>>, vector<1x256xf32>
    %470 = vector.broadcast %465 : f32 to vector<1x256xf32>
    %471 = arith.mulf %470, %469 : vector<1x256xf32>
    %472 = arith.addf %468, %471 : vector<1x256xf32>
    %cst_174 = arith.constant 0.000000e+00 : f32
    %473 = vector.broadcast %cst_174 : f32 to vector<1x256xf32>
    %474 = arith.select %67, %472, %473 : vector<1x256xi1>, vector<1x256xf32>
    %475 = arith.addf %429, %474 : vector<1x256xf32>
    %c33 = arith.constant 33 : index
    %476 = memref.load %arg2[%c33] : memref<98xf32, #tpu.memory_space<smem>>
    %c82_175 = arith.constant 82 : index
    %477 = memref.load %arg2[%c82_175] : memref<98xf32, #tpu.memory_space<smem>>
    %c0_176 = arith.constant 0 : index
    %c146 = arith.constant 146 : index
    %478 = vector.load %arg4[%c0_176, %c146] : memref<1x512xf32, #tpu.memory_space<vmem>>, vector<1x256xf32>
    %479 = vector.broadcast %476 : f32 to vector<1x256xf32>
    %480 = arith.mulf %479, %478 : vector<1x256xf32>
    %c0_177 = arith.constant 0 : index
    %c146_178 = arith.constant 146 : index
    %481 = vector.load %arg5[%c0_177, %c146_178] : memref<1x512xf32, #tpu.memory_space<vmem>>, vector<1x256xf32>
    %482 = vector.broadcast %477 : f32 to vector<1x256xf32>
    %483 = arith.mulf %482, %481 : vector<1x256xf32>
    %484 = arith.addf %480, %483 : vector<1x256xf32>
    %cst_179 = arith.constant 0.000000e+00 : f32
    %485 = vector.broadcast %cst_179 : f32 to vector<1x256xf32>
    %486 = arith.select %76, %484, %485 : vector<1x256xi1>, vector<1x256xf32>
    %487 = arith.addf %441, %486 : vector<1x256xf32>
    %c34 = arith.constant 34 : index
    %488 = memref.load %arg2[%c34] : memref<98xf32, #tpu.memory_space<smem>>
    %c83_180 = arith.constant 83 : index
    %489 = memref.load %arg2[%c83_180] : memref<98xf32, #tpu.memory_space<smem>>
    %c0_181 = arith.constant 0 : index
    %c147 = arith.constant 147 : index
    %490 = vector.load %arg4[%c0_181, %c147] : memref<1x512xf32, #tpu.memory_space<vmem>>, vector<1x256xf32>
    %491 = vector.broadcast %488 : f32 to vector<1x256xf32>
    %492 = arith.mulf %491, %490 : vector<1x256xf32>
    %c0_182 = arith.constant 0 : index
    %c147_183 = arith.constant 147 : index
    %493 = vector.load %arg5[%c0_182, %c147_183] : memref<1x512xf32, #tpu.memory_space<vmem>>, vector<1x256xf32>
    %494 = vector.broadcast %489 : f32 to vector<1x256xf32>
    %495 = arith.mulf %494, %493 : vector<1x256xf32>
    %496 = arith.addf %492, %495 : vector<1x256xf32>
    %cst_184 = arith.constant 0.000000e+00 : f32
    %497 = vector.broadcast %cst_184 : f32 to vector<1x256xf32>
    %498 = arith.select %85, %496, %497 : vector<1x256xi1>, vector<1x256xf32>
    %499 = arith.addf %453, %498 : vector<1x256xf32>
    %c35 = arith.constant 35 : index
    %500 = memref.load %arg2[%c35] : memref<98xf32, #tpu.memory_space<smem>>
    %c84 = arith.constant 84 : index
    %501 = memref.load %arg2[%c84] : memref<98xf32, #tpu.memory_space<smem>>
    %c0_185 = arith.constant 0 : index
    %c157 = arith.constant 157 : index
    %502 = vector.load %arg4[%c0_185, %c157] : memref<1x512xf32, #tpu.memory_space<vmem>>, vector<1x256xf32>
    %503 = vector.broadcast %500 : f32 to vector<1x256xf32>
    %504 = arith.mulf %503, %502 : vector<1x256xf32>
    %c0_186 = arith.constant 0 : index
    %c157_187 = arith.constant 157 : index
    %505 = vector.load %arg5[%c0_186, %c157_187] : memref<1x512xf32, #tpu.memory_space<vmem>>, vector<1x256xf32>
    %506 = vector.broadcast %501 : f32 to vector<1x256xf32>
    %507 = arith.mulf %506, %505 : vector<1x256xf32>
    %508 = arith.addf %504, %507 : vector<1x256xf32>
    %cst_188 = arith.constant 0.000000e+00 : f32
    %509 = vector.broadcast %cst_188 : f32 to vector<1x256xf32>
    %510 = arith.select %40, %508, %509 : vector<1x256xi1>, vector<1x256xf32>
    %511 = arith.addf %463, %510 : vector<1x256xf32>
    %c36 = arith.constant 36 : index
    %512 = memref.load %arg2[%c36] : memref<98xf32, #tpu.memory_space<smem>>
    %c85 = arith.constant 85 : index
    %513 = memref.load %arg2[%c85] : memref<98xf32, #tpu.memory_space<smem>>
    %c0_189 = arith.constant 0 : index
    %c158 = arith.constant 158 : index
    %514 = vector.load %arg4[%c0_189, %c158] : memref<1x512xf32, #tpu.memory_space<vmem>>, vector<1x256xf32>
    %515 = vector.broadcast %512 : f32 to vector<1x256xf32>
    %516 = arith.mulf %515, %514 : vector<1x256xf32>
    %c0_190 = arith.constant 0 : index
    %c158_191 = arith.constant 158 : index
    %517 = vector.load %arg5[%c0_190, %c158_191] : memref<1x512xf32, #tpu.memory_space<vmem>>, vector<1x256xf32>
    %518 = vector.broadcast %513 : f32 to vector<1x256xf32>
    %519 = arith.mulf %518, %517 : vector<1x256xf32>
    %520 = arith.addf %516, %519 : vector<1x256xf32>
    %cst_192 = arith.constant 0.000000e+00 : f32
    %521 = vector.broadcast %cst_192 : f32 to vector<1x256xf32>
    %522 = arith.select %49, %520, %521 : vector<1x256xi1>, vector<1x256xf32>
    %523 = arith.addf %475, %522 : vector<1x256xf32>
    %c37 = arith.constant 37 : index
    %524 = memref.load %arg2[%c37] : memref<98xf32, #tpu.memory_space<smem>>
    %c86 = arith.constant 86 : index
    %525 = memref.load %arg2[%c86] : memref<98xf32, #tpu.memory_space<smem>>
    %c0_193 = arith.constant 0 : index
    %c159 = arith.constant 159 : index
    %526 = vector.load %arg4[%c0_193, %c159] : memref<1x512xf32, #tpu.memory_space<vmem>>, vector<1x256xf32>
    %527 = vector.broadcast %524 : f32 to vector<1x256xf32>
    %528 = arith.mulf %527, %526 : vector<1x256xf32>
    %c0_194 = arith.constant 0 : index
    %c159_195 = arith.constant 159 : index
    %529 = vector.load %arg5[%c0_194, %c159_195] : memref<1x512xf32, #tpu.memory_space<vmem>>, vector<1x256xf32>
    %530 = vector.broadcast %525 : f32 to vector<1x256xf32>
    %531 = arith.mulf %530, %529 : vector<1x256xf32>
    %532 = arith.addf %528, %531 : vector<1x256xf32>
    %cst_196 = arith.constant 0.000000e+00 : f32
    %533 = vector.broadcast %cst_196 : f32 to vector<1x256xf32>
    %534 = arith.select %58, %532, %533 : vector<1x256xi1>, vector<1x256xf32>
    %535 = arith.addf %487, %534 : vector<1x256xf32>
    %c38 = arith.constant 38 : index
    %536 = memref.load %arg2[%c38] : memref<98xf32, #tpu.memory_space<smem>>
    %c87 = arith.constant 87 : index
    %537 = memref.load %arg2[%c87] : memref<98xf32, #tpu.memory_space<smem>>
    %c0_197 = arith.constant 0 : index
    %c160 = arith.constant 160 : index
    %538 = vector.load %arg4[%c0_197, %c160] : memref<1x512xf32, #tpu.memory_space<vmem>>, vector<1x256xf32>
    %539 = vector.broadcast %536 : f32 to vector<1x256xf32>
    %540 = arith.mulf %539, %538 : vector<1x256xf32>
    %c0_198 = arith.constant 0 : index
    %c160_199 = arith.constant 160 : index
    %541 = vector.load %arg5[%c0_198, %c160_199] : memref<1x512xf32, #tpu.memory_space<vmem>>, vector<1x256xf32>
    %542 = vector.broadcast %537 : f32 to vector<1x256xf32>
    %543 = arith.mulf %542, %541 : vector<1x256xf32>
    %544 = arith.addf %540, %543 : vector<1x256xf32>
    %545 = arith.addf %499, %544 : vector<1x256xf32>
    %c39 = arith.constant 39 : index
    %546 = memref.load %arg2[%c39] : memref<98xf32, #tpu.memory_space<smem>>
    %c88 = arith.constant 88 : index
    %547 = memref.load %arg2[%c88] : memref<98xf32, #tpu.memory_space<smem>>
    %c0_200 = arith.constant 0 : index
    %c161 = arith.constant 161 : index
    %548 = vector.load %arg4[%c0_200, %c161] : memref<1x512xf32, #tpu.memory_space<vmem>>, vector<1x256xf32>
    %549 = vector.broadcast %546 : f32 to vector<1x256xf32>
    %550 = arith.mulf %549, %548 : vector<1x256xf32>
    %c0_201 = arith.constant 0 : index
    %c161_202 = arith.constant 161 : index
    %551 = vector.load %arg5[%c0_201, %c161_202] : memref<1x512xf32, #tpu.memory_space<vmem>>, vector<1x256xf32>
    %552 = vector.broadcast %547 : f32 to vector<1x256xf32>
    %553 = arith.mulf %552, %551 : vector<1x256xf32>
    %554 = arith.addf %550, %553 : vector<1x256xf32>
    %cst_203 = arith.constant 0.000000e+00 : f32
    %555 = vector.broadcast %cst_203 : f32 to vector<1x256xf32>
    %556 = arith.select %67, %554, %555 : vector<1x256xi1>, vector<1x256xf32>
    %557 = arith.addf %511, %556 : vector<1x256xf32>
    %c40 = arith.constant 40 : index
    %558 = memref.load %arg2[%c40] : memref<98xf32, #tpu.memory_space<smem>>
    %c89 = arith.constant 89 : index
    %559 = memref.load %arg2[%c89] : memref<98xf32, #tpu.memory_space<smem>>
    %c0_204 = arith.constant 0 : index
    %c162 = arith.constant 162 : index
    %560 = vector.load %arg4[%c0_204, %c162] : memref<1x512xf32, #tpu.memory_space<vmem>>, vector<1x256xf32>
    %561 = vector.broadcast %558 : f32 to vector<1x256xf32>
    %562 = arith.mulf %561, %560 : vector<1x256xf32>
    %c0_205 = arith.constant 0 : index
    %c162_206 = arith.constant 162 : index
    %563 = vector.load %arg5[%c0_205, %c162_206] : memref<1x512xf32, #tpu.memory_space<vmem>>, vector<1x256xf32>
    %564 = vector.broadcast %559 : f32 to vector<1x256xf32>
    %565 = arith.mulf %564, %563 : vector<1x256xf32>
    %566 = arith.addf %562, %565 : vector<1x256xf32>
    %cst_207 = arith.constant 0.000000e+00 : f32
    %567 = vector.broadcast %cst_207 : f32 to vector<1x256xf32>
    %568 = arith.select %76, %566, %567 : vector<1x256xi1>, vector<1x256xf32>
    %569 = arith.addf %523, %568 : vector<1x256xf32>
    %c41 = arith.constant 41 : index
    %570 = memref.load %arg2[%c41] : memref<98xf32, #tpu.memory_space<smem>>
    %c90 = arith.constant 90 : index
    %571 = memref.load %arg2[%c90] : memref<98xf32, #tpu.memory_space<smem>>
    %c0_208 = arith.constant 0 : index
    %c163 = arith.constant 163 : index
    %572 = vector.load %arg4[%c0_208, %c163] : memref<1x512xf32, #tpu.memory_space<vmem>>, vector<1x256xf32>
    %573 = vector.broadcast %570 : f32 to vector<1x256xf32>
    %574 = arith.mulf %573, %572 : vector<1x256xf32>
    %c0_209 = arith.constant 0 : index
    %c163_210 = arith.constant 163 : index
    %575 = vector.load %arg5[%c0_209, %c163_210] : memref<1x512xf32, #tpu.memory_space<vmem>>, vector<1x256xf32>
    %576 = vector.broadcast %571 : f32 to vector<1x256xf32>
    %577 = arith.mulf %576, %575 : vector<1x256xf32>
    %578 = arith.addf %574, %577 : vector<1x256xf32>
    %cst_211 = arith.constant 0.000000e+00 : f32
    %579 = vector.broadcast %cst_211 : f32 to vector<1x256xf32>
    %580 = arith.select %85, %578, %579 : vector<1x256xi1>, vector<1x256xf32>
    %581 = arith.addf %535, %580 : vector<1x256xf32>
    %c42 = arith.constant 42 : index
    %582 = memref.load %arg2[%c42] : memref<98xf32, #tpu.memory_space<smem>>
    %c91 = arith.constant 91 : index
    %583 = memref.load %arg2[%c91] : memref<98xf32, #tpu.memory_space<smem>>
    %c0_212 = arith.constant 0 : index
    %c173 = arith.constant 173 : index
    %584 = vector.load %arg4[%c0_212, %c173] : memref<1x512xf32, #tpu.memory_space<vmem>>, vector<1x256xf32>
    %585 = vector.broadcast %582 : f32 to vector<1x256xf32>
    %586 = arith.mulf %585, %584 : vector<1x256xf32>
    %c0_213 = arith.constant 0 : index
    %c173_214 = arith.constant 173 : index
    %587 = vector.load %arg5[%c0_213, %c173_214] : memref<1x512xf32, #tpu.memory_space<vmem>>, vector<1x256xf32>
    %588 = vector.broadcast %583 : f32 to vector<1x256xf32>
    %589 = arith.mulf %588, %587 : vector<1x256xf32>
    %590 = arith.addf %586, %589 : vector<1x256xf32>
    %cst_215 = arith.constant 0.000000e+00 : f32
    %591 = vector.broadcast %cst_215 : f32 to vector<1x256xf32>
    %592 = arith.select %40, %590, %591 : vector<1x256xi1>, vector<1x256xf32>
    %593 = arith.addf %545, %592 : vector<1x256xf32>
    %c43 = arith.constant 43 : index
    %594 = memref.load %arg2[%c43] : memref<98xf32, #tpu.memory_space<smem>>
    %c92 = arith.constant 92 : index
    %595 = memref.load %arg2[%c92] : memref<98xf32, #tpu.memory_space<smem>>
    %c0_216 = arith.constant 0 : index
    %c174 = arith.constant 174 : index
    %596 = vector.load %arg4[%c0_216, %c174] : memref<1x512xf32, #tpu.memory_space<vmem>>, vector<1x256xf32>
    %597 = vector.broadcast %594 : f32 to vector<1x256xf32>
    %598 = arith.mulf %597, %596 : vector<1x256xf32>
    %c0_217 = arith.constant 0 : index
    %c174_218 = arith.constant 174 : index
    %599 = vector.load %arg5[%c0_217, %c174_218] : memref<1x512xf32, #tpu.memory_space<vmem>>, vector<1x256xf32>
    %600 = vector.broadcast %595 : f32 to vector<1x256xf32>
    %601 = arith.mulf %600, %599 : vector<1x256xf32>
    %602 = arith.addf %598, %601 : vector<1x256xf32>
    %cst_219 = arith.constant 0.000000e+00 : f32
    %603 = vector.broadcast %cst_219 : f32 to vector<1x256xf32>
    %604 = arith.select %49, %602, %603 : vector<1x256xi1>, vector<1x256xf32>
    %605 = arith.addf %557, %604 : vector<1x256xf32>
    %c44 = arith.constant 44 : index
    %606 = memref.load %arg2[%c44] : memref<98xf32, #tpu.memory_space<smem>>
    %c93_220 = arith.constant 93 : index
    %607 = memref.load %arg2[%c93_220] : memref<98xf32, #tpu.memory_space<smem>>
    %c0_221 = arith.constant 0 : index
    %c175 = arith.constant 175 : index
    %608 = vector.load %arg4[%c0_221, %c175] : memref<1x512xf32, #tpu.memory_space<vmem>>, vector<1x256xf32>
    %609 = vector.broadcast %606 : f32 to vector<1x256xf32>
    %610 = arith.mulf %609, %608 : vector<1x256xf32>
    %c0_222 = arith.constant 0 : index
    %c175_223 = arith.constant 175 : index
    %611 = vector.load %arg5[%c0_222, %c175_223] : memref<1x512xf32, #tpu.memory_space<vmem>>, vector<1x256xf32>
    %612 = vector.broadcast %607 : f32 to vector<1x256xf32>
    %613 = arith.mulf %612, %611 : vector<1x256xf32>
    %614 = arith.addf %610, %613 : vector<1x256xf32>
    %cst_224 = arith.constant 0.000000e+00 : f32
    %615 = vector.broadcast %cst_224 : f32 to vector<1x256xf32>
    %616 = arith.select %58, %614, %615 : vector<1x256xi1>, vector<1x256xf32>
    %617 = arith.addf %569, %616 : vector<1x256xf32>
    %c45 = arith.constant 45 : index
    %618 = memref.load %arg2[%c45] : memref<98xf32, #tpu.memory_space<smem>>
    %c94_225 = arith.constant 94 : index
    %619 = memref.load %arg2[%c94_225] : memref<98xf32, #tpu.memory_space<smem>>
    %c0_226 = arith.constant 0 : index
    %c176 = arith.constant 176 : index
    %620 = vector.load %arg4[%c0_226, %c176] : memref<1x512xf32, #tpu.memory_space<vmem>>, vector<1x256xf32>
    %621 = vector.broadcast %618 : f32 to vector<1x256xf32>
    %622 = arith.mulf %621, %620 : vector<1x256xf32>
    %c0_227 = arith.constant 0 : index
    %c176_228 = arith.constant 176 : index
    %623 = vector.load %arg5[%c0_227, %c176_228] : memref<1x512xf32, #tpu.memory_space<vmem>>, vector<1x256xf32>
    %624 = vector.broadcast %619 : f32 to vector<1x256xf32>
    %625 = arith.mulf %624, %623 : vector<1x256xf32>
    %626 = arith.addf %622, %625 : vector<1x256xf32>
    %627 = arith.addf %581, %626 : vector<1x256xf32>
    %c46 = arith.constant 46 : index
    %628 = memref.load %arg2[%c46] : memref<98xf32, #tpu.memory_space<smem>>
    %c95_229 = arith.constant 95 : index
    %629 = memref.load %arg2[%c95_229] : memref<98xf32, #tpu.memory_space<smem>>
    %c0_230 = arith.constant 0 : index
    %c177 = arith.constant 177 : index
    %630 = vector.load %arg4[%c0_230, %c177] : memref<1x512xf32, #tpu.memory_space<vmem>>, vector<1x256xf32>
    %631 = vector.broadcast %628 : f32 to vector<1x256xf32>
    %632 = arith.mulf %631, %630 : vector<1x256xf32>
    %c0_231 = arith.constant 0 : index
    %c177_232 = arith.constant 177 : index
    %633 = vector.load %arg5[%c0_231, %c177_232] : memref<1x512xf32, #tpu.memory_space<vmem>>, vector<1x256xf32>
    %634 = vector.broadcast %629 : f32 to vector<1x256xf32>
    %635 = arith.mulf %634, %633 : vector<1x256xf32>
    %636 = arith.addf %632, %635 : vector<1x256xf32>
    %cst_233 = arith.constant 0.000000e+00 : f32
    %637 = vector.broadcast %cst_233 : f32 to vector<1x256xf32>
    %638 = arith.select %67, %636, %637 : vector<1x256xi1>, vector<1x256xf32>
    %639 = arith.addf %593, %638 : vector<1x256xf32>
    %c47 = arith.constant 47 : index
    %640 = memref.load %arg2[%c47] : memref<98xf32, #tpu.memory_space<smem>>
    %c96_234 = arith.constant 96 : index
    %641 = memref.load %arg2[%c96_234] : memref<98xf32, #tpu.memory_space<smem>>
    %c0_235 = arith.constant 0 : index
    %c178 = arith.constant 178 : index
    %642 = vector.load %arg4[%c0_235, %c178] : memref<1x512xf32, #tpu.memory_space<vmem>>, vector<1x256xf32>
    %643 = vector.broadcast %640 : f32 to vector<1x256xf32>
    %644 = arith.mulf %643, %642 : vector<1x256xf32>
    %c0_236 = arith.constant 0 : index
    %c178_237 = arith.constant 178 : index
    %645 = vector.load %arg5[%c0_236, %c178_237] : memref<1x512xf32, #tpu.memory_space<vmem>>, vector<1x256xf32>
    %646 = vector.broadcast %641 : f32 to vector<1x256xf32>
    %647 = arith.mulf %646, %645 : vector<1x256xf32>
    %648 = arith.addf %644, %647 : vector<1x256xf32>
    %cst_238 = arith.constant 0.000000e+00 : f32
    %649 = vector.broadcast %cst_238 : f32 to vector<1x256xf32>
    %650 = arith.select %76, %648, %649 : vector<1x256xi1>, vector<1x256xf32>
    %651 = arith.addf %605, %650 : vector<1x256xf32>
    %c48 = arith.constant 48 : index
    %652 = memref.load %arg2[%c48] : memref<98xf32, #tpu.memory_space<smem>>
    %c97_239 = arith.constant 97 : index
    %653 = memref.load %arg2[%c97_239] : memref<98xf32, #tpu.memory_space<smem>>
    %c0_240 = arith.constant 0 : index
    %c179 = arith.constant 179 : index
    %654 = vector.load %arg4[%c0_240, %c179] : memref<1x512xf32, #tpu.memory_space<vmem>>, vector<1x256xf32>
    %655 = vector.broadcast %652 : f32 to vector<1x256xf32>
    %656 = arith.mulf %655, %654 : vector<1x256xf32>
    %c0_241 = arith.constant 0 : index
    %c179_242 = arith.constant 179 : index
    %657 = vector.load %arg5[%c0_241, %c179_242] : memref<1x512xf32, #tpu.memory_space<vmem>>, vector<1x256xf32>
    %658 = vector.broadcast %653 : f32 to vector<1x256xf32>
    %659 = arith.mulf %658, %657 : vector<1x256xf32>
    %660 = arith.addf %656, %659 : vector<1x256xf32>
    %cst_243 = arith.constant 0.000000e+00 : f32
    %661 = vector.broadcast %cst_243 : f32 to vector<1x256xf32>
    %662 = arith.select %85, %660, %661 : vector<1x256xi1>, vector<1x256xf32>
    %663 = arith.addf %617, %662 : vector<1x256xf32>
    %664 = arith.addf %663, %627 : vector<1x256xf32>
    %665 = arith.addf %664, %639 : vector<1x256xf32>
    %666 = arith.addf %665, %651 : vector<1x256xf32>
    %cst_244 = arith.constant 0.000000e+00 : f32
    %667 = vector.broadcast %cst_244 : f32 to vector<1x256xf32>
    %668 = arith.maximumf %666, %667 : vector<1x256xf32>
    %669 = arith.negf %668 : vector<1x256xf32>
    %670 = math.exp %669 : vector<1x256xf32>
    %cst_245 = arith.constant 1.000000e+00 : f32
    %671 = vector.broadcast %cst_245 : f32 to vector<1x256xf32>
    %672 = arith.addf %671, %670 : vector<1x256xf32>
    %673 = arith.divf %671, %672 : vector<1x256xf32>
    %cst_246 = arith.constant 1.000000e+00 : f32
    %674 = vector.broadcast %cst_246 : f32 to vector<1x256xf32>
    %675 = arith.addf %673, %674 : vector<1x256xf32>
    %c0_247 = arith.constant 0 : index
    %c0_248 = arith.constant 0 : index
    %c0_249 = arith.constant 0 : index
    %676 = vector.load %arg1[%c0_247, %c0_248, %c0_249] : memref<1x4x256xf32, #tpu.memory_space<vmem>>, vector<1x4x256xf32>
    %677 = vector.shape_cast %676 : vector<1x4x256xf32> to vector<4x256xf32>
    %678 = vector.broadcast %675 : vector<1x256xf32> to vector<4x256xf32>
    %679 = arith.mulf %677, %678 : vector<4x256xf32>
    %c0_250 = arith.constant 0 : index
    %c0_251 = arith.constant 0 : index
    %c0_252 = arith.constant 0 : index
    %680 = vector.load %arg3[%c0_250, %c0_251, %c0_252] : memref<1x4x256xf32, #tpu.memory_space<vmem>>, vector<1x4x256xf32>
    %681 = vector.shape_cast %680 : vector<1x4x256xf32> to vector<4x256xf32>
    %682 = vector.shape_cast %679 : vector<4x256xf32> to vector<1x4x256xf32>
    tpu.vector_store %arg3[%c0_250, %c0_251, %c0_252], %682 {strides = array<i32>} : memref<1x4x256xf32, #tpu.memory_space<vmem>>, vector<1x4x256xf32>,
    return
  }
  func.func @transform_0(%arg0: i32) -> (i32, i32, i32) {
    %c0_i32 = arith.constant 0 : i32
    %c0_i32_0 = arith.constant 0 : i32
    %c0_i32_1 = arith.constant 0 : i32
    return %arg0, %c0_i32, %c0_i32_0 : i32, i32, i32
  }
  func.func @transform_1(%arg0: i32) -> i32 {
    %c0_i32 = arith.constant 0 : i32
    %c0_i32_0 = arith.constant 0 : i32
    return %c0_i32 : i32
  }
  func.func @transform_2(%arg0: i32) -> (i32, i32, i32) {
    %c0_i32 = arith.constant 0 : i32
    %c0_i32_0 = arith.constant 0 : i32
    %c0_i32_1 = arith.constant 0 : i32
    return %arg0, %c0_i32, %c0_i32_0 : i32, i32, i32
  }
}

</mosaic_0001>

<bundles_post_ra>
// kernel: tpu_custom_call.1
= control target key start
LH: loop header
LB: loop body
LE: loop exit
PB: predicated region body
PF: predicated region fallthrough
CT: control target
= control target key end

     0   :  { %7 = vsyncpa [#allocation5], 0  ;;  %s3924_s0 = inlined_call_operand.hbm [shape: f32[2,4,256], index: 0, kind: input, shape index: {}]   ;;  %s3925_s1 = inlined_call_operand.vmem [shape: f32[98], index: 1, kind: input, shape index: {}]   ;;  %s3926_s2 = inlined_call_operand.hbm [shape: f32[2,4,256], index: 2, kind: output, shape index: {}]  }
   0x1   :  { %9 = vsyncpa [#allocation5 + $0x1], 0 }
   0x2   :  { %10 = vsyncpa [#allocation7], 0 }
   0x3   :  { %11 = vsyncpa [#allocation6], 0 }
   0x4   :  { %13 = vsyncpa [#allocation6 + $0x1], 0  ;;  %s2800_s9 = smov 0   ;;  %s2802_s10 = smov 0  }
   0x5   :  { %s2804_s11 = smov 0   ;;  %s2806_s12 = smov 0  }
   0x6 LB: > { %s2821_s13 = sadd.s32 4294967295, %s2730_s12   ;;  %s2370_s14 = sadd.s32 4294967294, %s2730_s12   ;;  %s2730_s12 = sphi %s2806_s12, %s3994_s12   ;;  %s2726_s11 = sphi %s2804_s11, %s3993_s11   ;;  %s2722_s10 = sphi %s2802_s10, %s3992_s10   ;;  %s2718_s9 = sphi %s2800_s9, %s3991_s9  }
   0x7   : > { %p39_p0 = scmp.ne.s32.totalorder %s2722_s10, %s2718_s9  ;;  %p3927_p1 = scmp.eq.s32.totalorder %s2821_s13, 0 }
   0x8   : > { %p90_p3 = scmp.eq.s32.totalorder %s2370_s14, 1  ;;  %p2371_p5 = scmp.ge.s32.totalorder %s2730_s12, 1 }
   0x9   : > { %p2830_p4 = por %p3927_p1, %p39_p0  ;;  %p97_p7 = scmp.lt.s32.totalorder %s2730_s12, 3 }
   0xa   : > { %p2835_p6 = por %p90_p3, %p39_p0  ;;  %s110_s19 = sshll.u32 %s3925_s1, 4  ;;  %s111_s19 = int_to_ptr.vmem [resolvable:$true] %s110_s19 }
   0xb   : > { %s3940_s15 = scalar_select %p2830_p4, 1, 0 }
   0xc   : > { %s3941_s16 = scalar_select %p2835_p6, 1, 0 }
   0xd   : > { %p2843_p8 = pnand %p2371_p5, %p97_p7  ;;  %s2851_s21 = sadd.s32 1, %s2730_s12  }
   0xe   : > { %s23_s23 = ssub.s32 %s2730_s12, %s2851_s21  ;;  %s26_s25 = sadd.s32 1, %s2726_s11 }
   0xf   : > { %p2495_p10 = pneg %p2843_p8  ;;  %p2861_p12 = scmp.eq.s32.totalorder %s23_s23, 0 }
  0x10   : > { %p33_p13 = scmp.ne.s32.totalorder %s2726_s11, %s2722_s10  ;;  %s2615_s26 = scalar_lea.vmem %s111_s19, 16 }
  0x11   : > { %p2855_p11 = pnand %p2495_p10, %p3927_p1  ;;  %p2616_p0 = scmp.ne.s32.totalorder %s111_s19, %s2615_s26 }
  0x12   : > { %p2623_p9 = scmp.lt.s32.totalorder %s111_s19, %s111_s19  ;;  %p2624_p2 = scmp.lt.s32.totalorder %s2615_s26, %s2615_s26 }
  0x13   : > { %p2617_p3 = pneg %p2855_p11 }
  0x14   : > { %p2625_p10 = por %p2624_p2, %p2623_p9 }
  0x15   : > { %p2618_p5 = pnand %p2617_p3, %p2616_p0 }
  0x17   : > { %p2619_p7 = pneg %p2618_p5 }
  0x19   : > { %p2626_p1 = pnand %p2625_p10, %p2619_p7 }
  0x1b   : > { %2629 = shalt.err (!%p2626_p1)
}
  0x1c   : > { %s2732_s27 = smov [#allocation8]   ;;  %p34_p2 = scmp.eq.s32.totalorder %s2730_s12, 0 }
  0x1d   : > { %2498 = dma.vmem_to_smem (!%p2855_p11), %s111_s19, 16, %s2732_s27, [#allocation7]  }
  0x1e   : > { %s2875_s28 = scalar_select %p2861_p12, %s2726_s11, %s26_s25  }
  0x1f   : > { %p3945_p1 = scmp.eq.s32.totalorder %s2821_s13, 1  ;;  %p2508_p0 = scmp.lt.s32.totalorder %s2730_s12, 2 }
  0x20   : > { %s121_s30 = sand.u32 1, %s2726_s11   ;;  %p35_p3 = por %p34_p2, %p33_p13 }
  0x21   : > { %p2883_p9 = por %p3945_p1, %p33_p13  ;;  %s2374_s3 = sshll.u32 %s121_s30, 3 }
  0x22   : > { %s2485_s4 = sshll.u32 %s2730_s12, 7  ;;  %s125_s8 = scalar_lea.vmem [#allocation4], %s2374_s3 }
  0x23   : > { %s3946_s29 = scalar_select %p2883_p9, 1, 0 }
  0x24   : > { %s2896_s7 = scalar_lea.hbm %s3924_s0, %s2485_s4  ;;  %s133_s14 = sshll.u32 %s125_s8, 4  ;;  %s2902_s14 = int_to_ptr.vmem [resolvable:$true] %s133_s14 }
  0x25   : > { %p2898_p11 = pnand %p2508_p0, %p35_p3  ;;  %s122_s18 = scalar_lea.sflag [#allocation5], %s121_s30 }
  0x26   : > { %s2630_s19 = scalar_lea.hbm %s2896_s7, 128  ;;  %s2635_s24 = scalar_lea.hbm %s3924_s0, 256 }
  0x27   : > { %p2631_p12 = scmp.ne.s32.totalorder %s2896_s7, %s2630_s19  ;;  %p2632_p13 = pneg %p2898_p11 }
  0x28   : > { %p2636_p10 = scmp.lt.u32.totalorder %s2896_s7, %s3924_s0  ;;  %p2637_p2 = scmp.lt.u32.totalorder %s2635_s24, %s2630_s19 }
  0x29   : > { %p2633_p5 = pnand %p2632_p13, %p2631_p12  ;;  %p2639_p0 = scmp.lt.u32.totalorder %s2630_s19, %s2896_s7 }
  0x2a   : > { %p2638_p1 = por %p2637_p2, %p2636_p10 }
  0x2b   : > { %p2634_p7 = pneg %p2633_p5 }
  0x2c   : > { %p2640_p3 = por %p2639_p0, %p2638_p1 }
  0x2e   : > { %p2641_p6 = pnand %p2640_p3, %p2634_p7 }
  0x30   : > { %2644 = shalt.err (!%p2641_p6)
}
  0x31   : > { %s2645_s27 = scalar_lea.vmem %s2902_s14, 128  ;;  %s2733_s30 = smov [#allocation4]  }
  0x32   : > { %p2646_p12 = scmp.ne.s32.totalorder %s2902_s14, %s2645_s27  ;;  %s2650_s3 = sshll.u32 %s2733_s30, 4  ;;  %s2651_s3 = int_to_ptr.vmem [resolvable:$false] %s2650_s3 }
  0x33   : > { %s2652_s4 = scalar_lea.vmem %s2651_s3, 256  ;;  %p2653_p4 = scmp.lt.s32.totalorder %s2902_s14, %s2651_s3 }
  0x34   : > { %p2648_p5 = pnand %p2646_p12, %p2632_p13  ;;  %p2654_p10 = scmp.lt.s32.totalorder %s2652_s4, %s2645_s27 }
  0x36   : > { %p2649_p9 = pneg %p2648_p5  ;;  %p2655_p2 = por %p2654_p10, %p2653_p4 }
  0x38   : > { %p2656_p1 = pnand %p2655_p2, %p2649_p9 }
  0x3a   : > { %2659 = shalt.err (!%p2656_p1)
}
  0x3b   : > { %2502 = dma.hbm_to_vmem [thread:$0]  (!%p2898_p11), %s2896_s7, 128, %s2902_s14, %s122_s18  }
  0x3c   : > { %142 = sbr.rel (%p2843_p8) target bundleno = 654 (0x28e), region = 28 }
  0x43   : > { %s2932_s5 = sand.u32 1, %s2722_s10   ;;  %p3948_p4 = scmp.ne.s32.totalorder %s3940_s15, 0 }
  0x44   : > { %s2378_s6 = sshll.u32 %s2932_s5, 3  ;;  %s145_s8 = scalar_lea.sflag [#allocation5], %s2932_s5 }
  0x45   : > { %s2938_s19 = scalar_lea.vmem [#allocation4], %s2378_s6 }
  0x46   : > { %2705 = dma.done.wait (%p3948_p4), %s145_s8, 128  }
  0x47   : > { %2707 = vsyncadd (%p3948_p4), %s145_s8, 4294967168  ;;  %p3949_p6 = scmp.eq.s32.totalorder %s2821_s13, 0 }
  0x49   : > { %2709 = dma.done.wait (%p3949_p6), [#allocation7], 16   ;;  %p3950_p8 = pmov %p3949_p6 }
  0x4b   : > { %2711 = vsyncadd (%p3950_p8), [#allocation7], 4294967280 }
  0x4c   : > { %157 = sfence }
  0x4d   : > { %v174_v0 = vlaneseq  ;;  %v182_v1 = vld [vmem:[%s2938_s19] sm:$0xff]  ;;  %vm186_vm0 = vcmask 1043456   ;;  %v2734_v6 = vmov 0.0   ;;  %v2735_v16 = vmov 1966171168   ;;  %s2381_s15 = sld [smem:[#allocation8 + $0x31]] }
  0x4e   : > { %v184_v2 = vcombine.high %v182_v1, %v182_v1  ;;  %v187_v3 = vsel %vm186_vm0, %v182_v1, 0.0  ;;  %v225_v4 = vsel %vm186_vm0, %v182_v1, -inf  ;;  %v208_v17 = vunpack.c.l.s4 %v2735_v16  ;;  %s2383_s20 = sld [smem:[#allocation8 + $0x32]]  ;;  %s333_s7 = sld [smem:[#allocation8]] }
  0x4f   : > { %vm176_vm1 = vcmp.lt.s32.totalorder %v174_v0, 128  ;;  %v188_v5 = vrot.slane %v187_v3, 4  ;;  %v226_v8 = vrot.slane %v225_v4, 4  ;;  %v211_v23 = vshrl.u32 %v174_v0, 7  ;;  %s2382_s14 = sld [smem:[#allocation8 + $0x1]]  ;;  %s2385_s17 = sld [smem:[#allocation8 + $0x33]] }
  0x50   : > { %178 = vst.msk [vmem:[#allocation2] sm:$0x1] %vm176_vm1, %v2734_v6  ;;  %180 = vst.msk [vmem:[#allocation3] sm:$0x1] %vm176_vm1, %v2734_v6  ;;  %v194_v7 = vsel %vm186_vm0, %v184_v2, 0.0  ;;  %v232_v9 = vsel %vm186_vm0, %v184_v2, -inf  ;;  %v209_v27 = vunpack.c.0.s8 %v208_v17 }
  0x51   : > { %179 = vst.msk [vmem:[#allocation2 + $0x3] sm:$0x1] %vm176_vm1, %v2734_v6  ;;  %181 = vst.msk [vmem:[#allocation3 + $0x3] sm:$0x1] %vm176_vm1, %v2734_v6  ;;  %v189_v10 = vadd.f32 %v188_v5, %v187_v3  ;;  %v195_v11 = vrot.slane %v194_v7, 4  ;;  %v233_v12 = vrot.slane %v232_v9, 4  ;;  %v227_v13 = vmax.f32 %v225_v4, %v226_v8 }
  0x52   : > { %v2951_v36 = vsub.s32 %v209_v27, %v211_v23  ;;  %vm222_vm2 = vcmp.lt.s32.totalorder %v174_v0, 256  ;;  %s2384_s18 = sld [smem:[#allocation8 + $0x2]]  ;;  %s2388_s22 = sld [smem:[#allocation8 + $0x4]]  ;;  %v2965_v54 = vsub.s32 0, %v211_v23  ;;  %v2967_v55 = vsub.s32 2, %v211_v23 }
  0x53   : > { %v190_v14 = vrot.slane %v189_v10, 2  ;;  %v196_v15 = vadd.f32 %v195_v11, %v194_v7  ;;  %v234_v18 = vmax.f32 %v232_v9, %v233_v12  ;;  %v228_v19 = vrot.slane %v227_v13, 2  ;;  %s2389_s23 = sld [smem:[#allocation8 + $0x35]]  ;;  %s2736_s24 = smov 51  }
  0x54   : > { %v339_v45 = vstv %s2381_s15  ;;  %v374_v46 = vstv %s2383_s20  ;;  %v336_v47 = vstv %s333_s7  ;;  %v2970_v58 = vsub.s32 1, %v211_v23  ;;  %s2391_s25 = sld [smem:[#allocation8 + $0x36]]  ;;  %s2390_s26 = sld [smem:[#allocation8 + $0x5]] }
  0x55   : > { %v191_v20 = vadd.f32 %v190_v14, %v189_v10  ;;  %v197_v21 = vrot.slane %v196_v15, 2  ;;  %v235_v22 = vrot.slane %v234_v18, 2  ;;  %v229_v24 = vmax.f32 %v227_v13, %v228_v19  ;;  %s2392_s27 = sld [smem:[#allocation8 + $0x6]]  ;;  %s2737_s30 = smov 50  }
  0x56   : > { %v372_v49 = vstv %s2382_s14  ;;  %v409_v60 = vstv %s2385_s17  ;;  %s2393_s3 = sld [smem:[#allocation8 + $0x37]]  ;;  %s2738_s8 = smov 49   ;;  %vm579_vm3 = vcmask 285696   ;;  %vm741_vm6 = vcmask 252928  }
  0x57   : > { %v192_v25 = vrot.slane %v191_v20, 1  ;;  %v198_v26 = vadd.f32 %v197_v21, %v196_v15  ;;  %v236_v28 = vmax.f32 %v234_v18, %v235_v22  ;;  %v230_v29 = vrot.slane %v229_v24, 1  ;;  %s2394_s4 = sld [smem:[#allocation8 + $0x7]]  ;;  %s2395_s15 = sld [smem:[#allocation8 + $0x38]] }
  0x58   : > { %v407_v61 = vstv %s2384_s18  ;;  %v450_v2 = vstv %s2388_s22  ;;  %s2739_s20 = smov 47   ;;  %s2396_s7 = sld [smem:[#allocation8 + $0x8]]  ;;  %vm904_vm9 = vcmask 146432   ;;  %vm1065_vm12 = vcmask 113664  }
  0x59   : > { %v193_v30 = vadd.f32 %v192_v25, %v191_v20  ;;  %v199_v31 = vrot.slane %v198_v26, 1  ;;  %v237_v32 = vrot.slane %v236_v28, 1  ;;  %v231_v33 = vmax.f32 %v229_v24, %v230_v29  ;;  %s2397_s14 = sld [smem:[#allocation8 + $0x39]]  ;;  %s2408_s18 = sld [smem:[#allocation8 + $0xe]] }
  0x5a   : > { %v452_v6 = vstv %s2389_s23  ;;  %v487_v15 = vstv %s2391_s25  ;;  %v485_v16 = vstv %s2390_s26  ;;  %s2994_s17 = sld [smem:[#allocation8 + $0x9]]  ;;  %s2996_s22 = sld [smem:[#allocation8 + $0x3a]]  ;;  %vm1228_vm15 = vcmask 7168  }
  0x5b   : > { %v200_v34 = vadd.f32 %v199_v31, %v198_v26  ;;  %v202_v35 = vmul.f32 0.25, %v193_v30  ;;  %v238_v37 = vmax.f32 %v236_v28, %v237_v32  ;;  %v520_v18 = vstv %s2392_s27  ;;  %s2998_s23 = sld [smem:[#allocation8 + $0x3f]]  ;;  %s2741_s25 = smov 45  }
  0x5c   : > { %v522_v22 = vstv %s2393_s3  ;;  %s3010_s26 = sld [smem:[#allocation8 + $0xb]]  ;;  %s3012_s27 = sld [smem:[#allocation8 + $0x3c]] }
  0x5d   : > { %v203_v38 = vmul.f32 0.25, %v200_v34  ;;  %v241_v39 = vcombine.low %v231_v33, %v238_v37  ;;  %v555_v28 = vstv %s2394_s4  ;;  %v557_v32 = vstv %s2395_s15  ;;  %s3021_s3 = sld [smem:[#allocation8 + $0x3b]]  ;;  %s3025_s4 = sld [smem:[#allocation8 + $0xf]] }
  0x5e   : > { %s2411_s15 = sld [smem:[#allocation8 + $0x40]]  ;;  %p3988_p11 = scmp.ne.s32.totalorder %s3946_s29, 0 }
  0x5f   : > { %v206_v40 = vcombine.low %v202_v35, %v203_v38  ;;  %v248_v41 = vrot.slane %v241_v39, %v2951_v36  ;;  %v613_v39 = vstv %s2396_s7  ;;  %s2743_s7 = smov 34  }
  0x61   : > { %v213_v42 = vrot.slane %v206_v40, %v2951_v36  ;;  %v255_v43 = vrot.slane %v248_v41, %v2951_v36  ;;  %v616_v41 = vstv %s2397_s14  ;;  %s2419_s14 = sld [smem:[#allocation8 + $0x44]] }
  0x63   : > { %v220_v44 = vrot.slane %v213_v42, %v2951_v36  ;;  %257 = vst.msk [vmem:[#allocation3 + $0x1] sm:$0x3] %vm222_vm2, %v255_v43 }
  0x65   : > { %224 = vst.msk [vmem:[#allocation2 + $0x1] sm:$0x3] %vm222_vm2, %v220_v44  ;;  %vm1378_vm2 = vcmask 1022976  }
  0x6a   : > { %v2958_v48 = vld [vmem:[#allocation3] sm:$0x7] }
  0x6b   : > { %v340_v50 = vmul.f32 %v339_v45, %v2958_v48  ;;  %v375_v51 = vmul.f32 %v374_v46, %v2958_v48  ;;  %v410_v1 = vmul.f32 %v409_v60, %v2958_v48  ;;  %v453_v8 = vmul.f32 %v452_v6, %v2958_v48  ;;  %v615_v40 = vld [vmem:[#allocation3] sm:$0x7] }
  0x6c   : > { %v2962_v52 = vld [vmem:[#allocation2] sm:$0x7]  ;;  %v488_v17 = vmul.f32 %v487_v15, %v2958_v48  ;;  %v523_v24 = vmul.f32 %v522_v22, %v2958_v48  ;;  %v558_v34 = vmul.f32 %v557_v32, %v2958_v48  ;;  %v617_v44 = vmul.f32 %v616_v41, %v615_v40 }
  0x6d   : > { %v337_v53 = vmul.f32 %v336_v47, %v2962_v52  ;;  %v373_v56 = vmul.f32 %v372_v49, %v2962_v52  ;;  %v408_v5 = vmul.f32 %v407_v61, %v2962_v52  ;;  %v451_v7 = vmul.f32 %v450_v2, %v2962_v52  ;;  %v612_v38 = vld [vmem:[#allocation2] sm:$0x7] }
  0x6e   : > { %v486_v21 = vmul.f32 %v485_v16, %v2962_v52  ;;  %v521_v23 = vmul.f32 %v520_v18, %v2962_v52  ;;  %v556_v33 = vmul.f32 %v555_v28, %v2962_v52  ;;  %v614_v43 = vmul.f32 %v613_v39, %v612_v38  ;;  %v3006_v47 = vld [vmem:[#allocation2] sm:$0x7]  ;;  %v3062_v39 = vld [vmem:[#allocation3] sm:$0x7] }
  0x6f   : > { %v341_v57 = vadd.f32 %v340_v50, %v337_v53  ;;  %v376_v59 = vadd.f32 %v375_v51, %v373_v56  ;;  %v411_v11 = vadd.f32 %v410_v1, %v408_v5  ;;  %v454_v14 = vadd.f32 %v453_v8, %v451_v7  ;;  %v3016_v53 = vld [vmem:[#allocation3] sm:$0x7] }
  0x70   : > { %v489_v27 = vadd.f32 %v488_v17, %v486_v21  ;;  %v524_v31 = vadd.f32 %v523_v24, %v521_v23  ;;  %v559_v42 = vadd.f32 %v558_v34, %v556_v33  ;;  %v845_v48 = vstv %s2408_s18  ;;  %s2426_s18 = sld [smem:[#allocation8 + $0x17]] }
  0x71   : > { %v354_v62 = vrot.slane %v341_v57, %v2967_v55  ;;  %v346_v63 = vrot.slane %v341_v57, %v2965_v54  ;;  %v381_v3 = vrot.slane %v376_v59, %v2965_v54  ;;  %v350_v4 = vrot.slane %v341_v57, %v2970_v58 }
  0x72   : > { %v389_v9 = vrot.slane %v376_v59, %v2967_v55  ;;  %v385_v10 = vrot.slane %v376_v59, %v2970_v58  ;;  %v420_v12 = vrot.slane %v411_v11, %v2970_v58  ;;  %v416_v13 = vrot.slane %v411_v11, %v2965_v54 }
  0x73   : > { %359 = vrot.lane.b32.xlu1 %v354_v62, %s2736_s24  ;;  %355 = vrot.lane.b32.xlu0 %v346_v63, %s2736_s24  ;;  %v459_v19 = vrot.slane %v454_v14, %v2965_v54  ;;  %v424_v20 = vrot.slane %v411_v11, %v2967_v55  ;;  %v467_v25 = vrot.slane %v454_v14, %v2967_v55  ;;  %v649_v49 = vstv %s2994_s17  ;;  %s2744_s17 = smov 33  }
  0x74   : > { %v463_v26 = vrot.slane %v454_v14, %v2970_v58  ;;  %v498_v29 = vrot.slane %v489_v27, %v2970_v58  ;;  %v494_v30 = vrot.slane %v489_v27, %v2965_v54  ;;  %v529_v35 = vrot.slane %v524_v31, %v2965_v54 }
  0x75   : > { %v502_v37 = vrot.slane %v489_v27, %v2967_v55  ;;  %v537_v45 = vrot.slane %v524_v31, %v2967_v55  ;;  %v533_v46 = vrot.slane %v524_v31, %v2970_v58  ;;  %v651_v50 = vstv %s2996_s22  ;;  %s2427_s22 = sld [smem:[#allocation8 + $0x48]] }
  0x76   : > { %v846_v51 = vmul.f32 %v845_v48, %v3006_v47  ;;  %v847_v52 = vstv %s2998_s23  ;;  %v568_v56 = vrot.slane %v559_v42, %v2970_v58  ;;  %v618_v57 = vadd.f32 %v617_v44, %v614_v43  ;;  %s2745_s23 = smov 31   ;;  %v3070_v48 = vld [vmem:[#allocation3 + $0x1] sm:$0x7] }
  0x77   : > { %390 = vrot.lane.b32.xlu1 %v381_v3, %s2737_s30  ;;  %357 = vrot.lane.b32.xlu0 %v350_v4, %s2736_s24  ;;  %s2740_s24 = smov 46   ;;  %v848_v59 = vmul.f32 %v847_v52, %v3016_v53  ;;  %v564_v60 = vrot.slane %v559_v42, %v2965_v54  ;;  %v650_v61 = vmul.f32 %v649_v49, %v612_v38  ;;  %v717_v4 = vstv %s3010_s26  ;;  %s2746_s26 = smov 32  }
  0x78   : > { %v652_v62 = vmul.f32 %v651_v50, %v615_v40  ;;  %v627_v1 = vrot.slane %v618_v57, %v2970_v58  ;;  %v572_v2 = vrot.slane %v559_v42, %v2967_v55  ;;  %v719_v5 = vstv %s3012_s27  ;;  %s2747_s27 = smov 18  }
  0x79   : > { %v3023_v63 = vadd.f32 %v848_v59, %v846_v51  ;;  %v623_v6 = vrot.slane %v618_v57, %v2965_v54  ;;  %v718_v8 = vmul.f32 %v717_v4, %v612_v38  ;;  %v686_v11 = vstv %s3021_s3  ;;  %s2451_s3 = sld [smem:[#allocation8 + $0x54]] }
  0x7a   : > { %v653_v3 = vadd.f32 %v652_v62, %v650_v61  ;;  %v880_v14 = vstv %s3025_s4  ;;  %v687_v17 = vmul.f32 %v686_v11, %v615_v40  ;;  %v882_v18 = vstv %s2411_s15  ;;  %s2748_s4 = smov 14   ;;  %s2459_s15 = sld [smem:[#allocation8 + $0x58]]  ;;  %v3079_v62 = vld [vmem:[#allocation2 + $0x1] sm:$0x7] }
  0x7b   : > { %394 = vrot.lane.b32.xlu1 %v389_v9, %s2737_s30  ;;  %392 = vrot.lane.b32.xlu0 %v385_v10, %s2737_s30  ;;  %s2400_s30 = sld [smem:[#allocation8 + $0xa]]  ;;  %v720_v9 = vmul.f32 %v719_v5, %v615_v40  ;;  %v1043_v27 = vstv %s2419_s14  ;;  %v1206_v40 = vstv %s2427_s22  ;;  %3951 = vst [vmem:[#allocation13_spill] sm:$0xff] %v3079_v62  ;;  %s2467_s14 = sld [smem:[#allocation8 + $0x5c]] }
  0x7c   : > { %v658_v7 = vrot.slane %v653_v3, %v2965_v54  ;;  %v666_v15 = vrot.slane %v653_v3, %v2967_v55  ;;  %v662_v23 = vrot.slane %v653_v3, %v2970_v58  ;;  %v1207_v44 = vmul.f32 %v1206_v40, %v3062_v39  ;;  %s2475_s22 = sld [smem:[#allocation8 + $0x60]] }
  0x7d   : > { %v721_v16 = vadd.f32 %v720_v9, %v718_v8  ;;  %v1693_v8 = vld [vmem:[#allocation2 + $0x1] sm:$0x7] }
  0x7f   : > { %427 = vrot.lane.b32.xlu1 %v420_v12, %s2738_s8  ;;  %425 = vrot.lane.b32.xlu0 %v416_v13, %s2738_s8  ;;  %v631_v12 = vrot.slane %v618_v57, %v2967_v55  ;;  %v726_v22 = vrot.slane %v721_v16, %v2965_v54  ;;  %v730_v34 = vrot.slane %v721_v16, %v2970_v58  ;;  %v1639_v3 = vstv %s2451_s3  ;;  %s2406_s3 = sld [smem:[#allocation8 + $0xd]] }
  0x80   : > { %v1800_v11 = vstv %s2459_s15  ;;  %s2754_s15 = smov 78  }
  0x81   : > { %v684_v10 = vstv %s2400_s30  ;;  %s2450_s30 = sld [smem:[#allocation8 + $0x23]] }
  0x82   : > { %v685_v13 = vmul.f32 %v684_v10, %v612_v38  ;;  %v1204_v38 = vstv %s2426_s18  ;;  %v1696_v10 = vld [vmem:[#allocation3 + $0x1] sm:$0x7]  ;;  %s2474_s18 = sld [smem:[#allocation8 + $0x2f]] }
  0x83   : > { %468 = vrot.lane.b32.xlu1 %v459_v19, %s2739_s20  ;;  %429 = vrot.lane.b32.xlu0 %v424_v20, %s2738_s8  ;;  %s2742_s8 = smov 35   ;;  %v881_v19 = vmul.f32 %v880_v14, %v3006_v47  ;;  %v883_v20 = vmul.f32 %v882_v18, %v3016_v53 }
  0x84   : > { %v3044_v24 = vadd.f32 %v687_v17, %v685_v13 }
  0x85   : > { %v884_v32 = vadd.f32 %v883_v20, %v881_v19  ;;  %v1854_v20 = vld [vmem:[#allocation2 + $0x1] sm:$0x7] }
  0x86   : > { %v693_v31 = vrot.slane %v3044_v24, %v2965_v54 }
  0x87   : > { %472 = vrot.lane.b32.xlu1 %v467_v25, %s2739_s20  ;;  %470 = vrot.lane.b32.xlu0 %v463_v26, %s2739_s20  ;;  %s3032_s20 = sld [smem:[#allocation8 + $0x13]]  ;;  %v3046_v25 = vld [vmem:[#allocation2] sm:$0x7]  ;;  %v3048_v26 = vld [vmem:[#allocation3] sm:$0x7]  ;;  %v893_v33 = vrot.slane %v884_v32, %v2970_v58  ;;  %v889_v43 = vrot.slane %v884_v32, %v2965_v54  ;;  %v897_v50 = vrot.slane %v884_v32, %v2967_v55 }
  0x88   : > { %v2121_v32 = vstv %s2474_s18  ;;  %s2414_s18 = sld [smem:[#allocation8 + $0x11]] }
  0x8b   : > { %505 = vrot.lane.b32.xlu1 %v498_v29, %s2740_s24  ;;  %503 = vrot.lane.b32.xlu0 %v494_v30, %s2740_s24  ;;  %v1044_v29 = vmul.f32 %v1043_v27, %v3048_v26  ;;  %v734_v30 = vrot.slane %v721_v16, %v2967_v55  ;;  %v1801_v16 = vmul.f32 %v1800_v11, %v1696_v10 }
  0x8d   : > { %v1041_v21 = vstv %s3032_s20  ;;  %s2749_s20 = smov 1  }
  0x8e   : > { %v1042_v28 = vmul.f32 %v1041_v21, %v3046_v25 }
  0x8f   : > { %538 = vrot.lane.b32.xlu1 %v529_v35, %s2741_s25  ;;  %507 = vrot.lane.b32.xlu0 %v502_v37, %s2740_s24  ;;  %s2434_s24 = sld [smem:[#allocation8 + $0x1b]]  ;;  %v3060_v37 = vld [vmem:[#allocation2] sm:$0x7] }
  0x90   : > { %v1045_v35 = vadd.f32 %v1044_v29, %v1042_v28  ;;  %v1205_v41 = vmul.f32 %v1204_v38, %v3060_v37 }
  0x92   : > { %v1050_v42 = vrot.slane %v1045_v35, %v2965_v54  ;;  %v1058_v52 = vrot.slane %v1045_v35, %v2967_v55 }
  0x93   : > { %542 = vrot.lane.b32.xlu1 %v537_v45, %s2741_s25  ;;  %540 = vrot.lane.b32.xlu0 %v533_v46, %s2741_s25  ;;  %s3055_s25 = sld [smem:[#allocation8 + $0x4c]]  ;;  %v3068_v45 = vld [vmem:[#allocation2 + $0x1] sm:$0x7] }
  0x95   : > { %v1354_v46 = vstv %s2434_s24  ;;  %s2752_s24 = smov 95  }
  0x96   : > { %v1355_v51 = vmul.f32 %v1354_v46, %v3068_v45 }
  0x97   : > { %575 = vrot.lane.b32.xlu1 %v568_v56, %s2742_s8  ;;  %573 = vrot.lane.b32.xlu0 %v564_v60, %s2742_s8  ;;  %v1208_v56 = vadd.f32 %v1207_v44, %v1205_v41  ;;  %v1054_v60 = vrot.slane %v1045_v35, %v2970_v58 }
  0x99   : > { %v1356_v49 = vstv %s3055_s25  ;;  %v1217_v59 = vrot.slane %v1208_v56, %v2970_v58  ;;  %s2404_s25 = sld [smem:[#allocation8 + $0xc]] }
  0x9a   : > { %v1357_v57 = vmul.f32 %v1356_v49, %v3070_v48 }
  0x9b   : > { %634 = vrot.lane.b32.xlu1 %v627_v1, %s2743_s7  ;;  %577 = vrot.lane.b32.xlu0 %v572_v2, %s2742_s8  ;;  %s2458_s8 = sld [smem:[#allocation8 + $0x27]]  ;;  %v1637_v1 = vstv %s2450_s30  ;;  %v3081_v2 = vld [vmem:[#allocation3 + $0x1] sm:$0x7]  ;;  %s2753_s30 = smov 82  }
  0x9c   : > { %v1358_v61 = vadd.f32 %v1357_v57, %v1355_v51  ;;  %3952 = vst [vmem:[#allocation14_spill] sm:$0xff] %v3081_v2  ;;  %v1638_v4 = vmul.f32 %v1637_v1, %v3079_v62 }
  0x9e   : > { %v1363_v5 = vrot.slane %v1358_v61, %v2965_v54  ;;  %v1371_v14 = vrot.slane %v1358_v61, %v2967_v55  ;;  %v1367_v18 = vrot.slane %v1358_v61, %v2970_v58  ;;  %v701_v61 = vrot.slane %v3044_v24, %v2967_v55 }
  0x9f   : > { %667 = vrot.lane.b32.xlu1 %v658_v7, %s2744_s17  ;;  %632 = vrot.lane.b32.xlu0 %v623_v6, %s2743_s7  ;;  %v1213_v6 = vrot.slane %v1208_v56, %v2965_v54  ;;  %v1640_v7 = vmul.f32 %v1639_v3, %v3081_v2  ;;  %v774_v51 = vstv %s2404_s25  ;;  %s2759_s25 = smov 17  }
  0xa1   : > { %v1798_v9 = vstv %s2458_s8  ;;  %s2442_s8 = sld [smem:[#allocation8 + $0x1f]] }
  0xa2   : > { %v1799_v13 = vmul.f32 %v1798_v9, %v1693_v8 }
  0xa3   : > { %671 = vrot.lane.b32.xlu1 %v666_v15, %s2744_s17  ;;  %636 = vrot.lane.b32.xlu0 %v631_v12, %s2743_s7  ;;  %s2466_s7 = sld [smem:[#allocation8 + $0x2b]]  ;;  %v1221_v12 = vrot.slane %v1208_v56, %v2967_v55  ;;  %v1641_v15 = vadd.f32 %v1640_v7, %v1638_v4  ;;  %v810_v4 = vstv %s2406_s3  ;;  %s3290_s3 = sld [smem:[#allocation8 + $0x12]] }
  0xa4   : > { %v1802_v19 = vadd.f32 %v1801_v16, %v1799_v13  ;;  %v811_v10 = vmul.f32 %v810_v4, %v3006_v47 }
  0xa5   : > { %v1650_v17 = vrot.slane %v1641_v15, %v2970_v58  ;;  %v1646_v29 = vrot.slane %v1641_v15, %v2965_v54  ;;  %v1654_v35 = vrot.slane %v1641_v15, %v2967_v55 }
  0xa6   : > { %v1807_v28 = vrot.slane %v1802_v19, %v2965_v54  ;;  %v1815_v40 = vrot.slane %v1802_v19, %v2967_v55  ;;  %v1811_v44 = vrot.slane %v1802_v19, %v2970_v58 }
  0xa7   : > { %735 = vrot.lane.b32.xlu1 %v726_v22, %s2745_s23  ;;  %669 = vrot.lane.b32.xlu0 %v662_v23, %s2744_s17  ;;  %s2750_s17 = smov 125   ;;  %v1857_v22 = vld [vmem:[#allocation3 + $0x1] sm:$0x7]  ;;  %v1963_v23 = vstv %s2467_s14  ;;  %v1517_v7 = vstv %s2442_s8  ;;  %s2413_s14 = sld [smem:[#allocation8 + $0x41]] }
  0xa8   : > { %s3300_s8 = sld [smem:[#allocation8 + $0x14]] }
  0xa9   : > { %v1961_v21 = vstv %s2466_s7  ;;  %s2412_s7 = sld [smem:[#allocation8 + $0x10]] }
  0xaa   : > { %v1962_v27 = vmul.f32 %v1961_v21, %v1854_v20 }
  0xab   : > { %739 = vrot.lane.b32.xlu1 %v734_v30, %s2745_s23  ;;  %702 = vrot.lane.b32.xlu0 %v693_v31, %s2746_s26  ;;  %v1964_v30 = vmul.f32 %v1963_v23, %v1857_v22  ;;  %v2017_v31 = vld [vmem:[#allocation2 + $0x1] sm:$0x7] }
  0xac   : > { %v2122_v38 = vmul.f32 %v2121_v32, %v2017_v31  ;;  %v858_v31 = vrot.slane %v3023_v63, %v2970_v58  ;;  %v854_v32 = vrot.slane %v3023_v63, %v2965_v54 }
  0xad   : > { %v1965_v41 = vadd.f32 %v1964_v30, %v1962_v27  ;;  %v940_v19 = vstv %s2413_s14  ;;  %s3314_s14 = sld [smem:[#allocation8 + $0x16]] }
  0xaf   : > { %900 = vrot.lane.b32.xlu1 %v893_v33, %s2747_s27  ;;  %737 = vrot.lane.b32.xlu0 %v730_v34, %s2745_s23  ;;  %s2751_s23 = smov 99   ;;  %v2020_v33 = vld [vmem:[#allocation3 + $0x1] sm:$0x7]  ;;  %v2123_v34 = vstv %s2475_s22  ;;  %v1978_v56 = vrot.slane %v1965_v41, %v2967_v55  ;;  %s2415_s22 = sld [smem:[#allocation8 + $0x42]] }
  0xb3   : > { %1059 = vrot.lane.b32.xlu1 %v1050_v42, %s2748_s4  ;;  %898 = vrot.lane.b32.xlu0 %v889_v43, %s2747_s27  ;;  %v2124_v42 = vmul.f32 %v2123_v34, %v2020_v33  ;;  %v1974_v43 = vrot.slane %v1965_v41, %v2970_v58  ;;  %v973_v34 = vstv %s2414_s18  ;;  %s3361_s18 = sld [smem:[#allocation8 + $0x19]] }
  0xb5   : > { %v2125_v46 = vadd.f32 %v2124_v42, %v2122_v38 }
  0xb7   : > { %1063 = vrot.lane.b32.xlu1 %v1058_v52, %s2748_s4  ;;  %902 = vrot.lane.b32.xlu0 %v897_v50, %s2747_s27  ;;  %s2405_s27 = sld [smem:[#allocation8 + $0x3d]]  ;;  %v2130_v49 = vrot.slane %v2125_v46, %v2965_v54  ;;  %v1970_v50 = vrot.slane %v1965_v41, %v2965_v54  ;;  %v2138_v57 = vrot.slane %v2125_v46, %v2967_v55 }
  0xb8   : > { %v2134_v1 = vrot.slane %v2125_v46, %v2970_v58  ;;  %v862_v41 = vrot.slane %v3023_v63, %v2967_v55 }
  0xbb   : > { %1224 = vrot.lane.b32.xlu1 %v1217_v59, %s2749_s20  ;;  %1061 = vrot.lane.b32.xlu0 %v1054_v60, %s2748_s4  ;;  %s2407_s4 = sld [smem:[#allocation8 + $0x3e]]  ;;  %v775_v59 = vmul.f32 %v774_v51, %v3006_v47 }
  0xbd   : > { %v777_v52 = vstv %s2405_s27  ;;  %s2760_s27 = smov 16  }
  0xbe   : > { %v778_v60 = vmul.f32 %v777_v52, %v3016_v53 }
  0xbf   : > { %1372 = vrot.lane.b32.xlu1 %v1363_v5, %s2750_s17  ;;  %1222 = vrot.lane.b32.xlu0 %v1213_v6, %s2749_s20  ;;  %v697_v6 = vrot.slane %v3044_v24, %v2970_v58 }
  0xc0   : > { %v779_v3 = vadd.f32 %v778_v60, %v775_v59 }
  0xc1   : > { %v812_v5 = vstv %s2407_s4  ;;  %s3292_s4 = sld [smem:[#allocation8 + $0x43]] }
  0xc2   : > { %v784_v8 = vrot.slane %v779_v3, %v2965_v54  ;;  %v813_v11 = vmul.f32 %v812_v5, %v3016_v53  ;;  %v792_v24 = vrot.slane %v779_v3, %v2967_v55 }
  0xc3   : > { %1376 = vrot.lane.b32.xlu1 %v1371_v14, %s2750_s17  ;;  %1226 = vrot.lane.b32.xlu0 %v1221_v12, %s2749_s20  ;;  %s2443_s20 = sld [smem:[#allocation8 + $0x50]]  ;;  %v1518_v12 = vmul.f32 %v1517_v7, %v3079_v62  ;;  %v788_v14 = vrot.slane %v779_v3, %v2970_v58 }
  0xc4   : > { %v814_v15 = vadd.f32 %v813_v11, %v811_v10 }
  0xc6   : > { %v827_v22 = vrot.slane %v814_v15, %v2967_v55  ;;  %v823_v23 = vrot.slane %v814_v15, %v2970_v58 }
  0xc7   : > { %1657 = vrot.lane.b32.xlu1 %v1650_v17, %s2751_s23  ;;  %1374 = vrot.lane.b32.xlu0 %v1367_v18, %s2750_s17  ;;  %s2755_s17 = smov 30   ;;  %v819_v17 = vrot.slane %v814_v15, %v2965_v54  ;;  %v937_v18 = vstv %s2412_s7  ;;  %s3312_s7 = sld [smem:[#allocation8 + $0x46]] }
  0xc8   : > { %v938_v27 = vmul.f32 %v937_v18, %v3046_v25 }
  0xc9   : > { %v1519_v9 = vstv %s2443_s20  ;;  %s3310_s20 = sld [smem:[#allocation8 + $0x15]] }
  0xca   : > { %v1520_v13 = vmul.f32 %v1519_v9, %v3081_v2 }
  0xcb   : > { %1816 = vrot.lane.b32.xlu1 %v1807_v28, %s2752_s24  ;;  %1655 = vrot.lane.b32.xlu0 %v1646_v29, %s2751_s23  ;;  %v941_v28 = vmul.f32 %v940_v19, %v3048_v26 }
  0xcc   : > { %v1521_v53 = vadd.f32 %v1520_v13, %v1518_v12 }
  0xcd   : > { %v942_v33 = vadd.f32 %v941_v28, %v938_v27 }
  0xcf   : > { %1820 = vrot.lane.b32.xlu1 %v1815_v40, %s2752_s24  ;;  %1659 = vrot.lane.b32.xlu0 %v1654_v35, %s2751_s23  ;;  %s2757_s23 = smov 29   ;;  %v975_v35 = vstv %s2415_s22  ;;  %v947_v42 = vrot.slane %v942_v33, %v2965_v54  ;;  %v951_v63 = vrot.slane %v942_v33, %v2970_v58  ;;  %s3371_s22 = sld [smem:[#allocation8 + $0x4a]] }
  0xd3   : > { %1981 = vrot.lane.b32.xlu1 %v1974_v43, %s2753_s30  ;;  %1818 = vrot.lane.b32.xlu0 %v1811_v44, %s2752_s24  ;;  %s2758_s24 = smov 19   ;;  %v974_v43 = vmul.f32 %v973_v34, %v3046_v25  ;;  %v976_v44 = vmul.f32 %v975_v35, %v3048_v26 }
  0xd5   : > { %v3153_v51 = vadd.f32 %v976_v44, %v974_v43 }
  0xd7   : > { %2139 = vrot.lane.b32.xlu1 %v2130_v49, %s2754_s15  ;;  %1979 = vrot.lane.b32.xlu0 %v1970_v50, %s2753_s30  ;;  %v955_v50 = vrot.slane %v942_v33, %v2967_v55  ;;  %v982_v59 = vrot.slane %v3153_v51, %v2965_v54 }
  0xdb   : > { %2143 = vrot.lane.b32.xlu1 %v2138_v57, %s2754_s15  ;;  %1983 = vrot.lane.b32.xlu0 %v1978_v56, %s2753_s30  ;;  %v986_v57 = vrot.slane %v3153_v51, %v2970_v58  ;;  %s2761_s30 = smov 80  }
  0xdf   : > { %706 = vrot.lane.b32.xlu1 %v701_v61, %s2746_s26  ;;  %2141 = vrot.lane.b32.xlu0 %v2134_v1, %s2754_s15  ;;  %v259_v1 = vand.u32 127, %v174_v0  ;;  %s3304_s15 = sld [smem:[#allocation8 + $0x45]] }
  0xe1   : > { %v260_v5 = vadd.s32 128, %v259_v1 }
  0xe3   : > { %793 = vrot.lane.b32.xlu1 %v784_v8, %s2755_s17  ;;  %704 = vrot.lane.b32.xlu0 %v697_v6, %s2746_s26  ;;  %s2756_s26 = smov 64   ;;  %v3178_v8 = vand.u32 15, %v259_v1  ;;  %v3180_v9 = vand.u32 15, %v260_v5 }
  0xe5   : > { %v3117_v16 = vpop.permute.xlu1 %359  ;;  %v3119_v47 = vpop.permute.xlu0 %355  ;;  %v3183_v11 = vadd.s32 4294967293, %v3178_v8  ;;  %v3186_v12 = vadd.s32 4294967293, %v3180_v9 }
  0xe7   : > { %797 = vrot.lane.b32.xlu1 %v792_v24, %s2755_s17  ;;  %795 = vrot.lane.b32.xlu0 %v788_v14, %s2755_s17  ;;  %vm287_vm4 = vcmp.ge.s32.totalorder %v3183_v11, 0  ;;  %vm3939_vm5 = vcmp.ge.s32.totalorder %v3186_v12, 0  ;;  %s3316_s17 = sld [smem:[#allocation8 + $0x47]] }
  0xe9   : > { %v3122_v20 = vpop.permute.xlu1 %390  ;;  %v3124_v21 = vpop.permute.xlu0 %357 }
  0xeb   : > { %1523 = vrot.lane.b32.xlu1 %v1521_v53, %s2756_s26  ;;  %828 = vrot.lane.b32.xlu0 %v819_v17, %s2757_s23  ;;  %s2762_s26 = smov 15  }
  0xed   : > { %v3130_v29 = vpop.permute.xlu1 %394  ;;  %v3132_v30 = vpop.permute.xlu0 %392 }
  0xee   : > { %3953 = vst [vmem:[#allocation15_spill] sm:$0xff] %v3130_v29 }
  0xef   : > { %832 = vrot.lane.b32.xlu1 %v827_v22, %s2757_s23  ;;  %830 = vrot.lane.b32.xlu0 %v823_v23, %s2757_s23  ;;  %s3405_s23 = sld [smem:[#allocation8 + $0x1c]] }
  0xf1   : > { %v3138_v38 = vpop.permute.xlu1 %427  ;;  %v3140_v40 = vpop.permute.xlu0 %425 }
  0xf3   : > { %865 = vrot.lane.b32.xlu1 %v858_v31, %s2758_s24  ;;  %863 = vrot.lane.b32.xlu0 %v854_v32, %s2758_s24 }
  0xf5   : > { %v3147_v46 = vpop.permute.xlu1 %468  ;;  %v3149_v49 = vpop.permute.xlu0 %429 }
  0xf7   : > { %956 = vrot.lane.b32.xlu1 %v947_v42, %s2759_s25  ;;  %867 = vrot.lane.b32.xlu0 %v862_v41, %s2758_s24  ;;  %v3212_v41 = vadd.s32 1, %v3178_v8  ;;  %v3215_v42 = vadd.s32 1, %v3180_v9  ;;  %s3416_s24 = sld [smem:[#allocation8 + $0x4d]] }
  0xf9   : > { %v3155_v52 = vpop.permute.xlu1 %472  ;;  %v3157_v56 = vpop.permute.xlu0 %470  ;;  %vm3938_vm7 = vcmp.lt.s32.totalorder %v3212_v41, 16  ;;  %vm3937_vm8 = vcmp.lt.s32.totalorder %v3215_v42, 16 }
  0xfb   : > { %960 = vrot.lane.b32.xlu1 %v955_v50, %s2759_s25  ;;  %958 = vrot.lane.b32.xlu0 %v951_v63, %s2759_s25  ;;  %s2763_s25 = smov 13  }
  0xfd   : > { %v3163_v60 = vpop.permute.xlu1 %505  ;;  %v3165_v61 = vpop.permute.xlu0 %503 }
  0xff   : > { %993 = vrot.lane.b32.xlu1 %v986_v57, %s2760_s27  ;;  %991 = vrot.lane.b32.xlu0 %v982_v59, %s2760_s27 }
 0x101   : > { %v3170_v3 = vpop.permute.xlu1 %538  ;;  %v3172_v4 = vpop.permute.xlu0 %507 }
 0x102   : > { %3954 = vst [vmem:[#allocation16_spill] sm:$0xff] %v3172_v4  ;;  %v1098_v4 = vstv %s3300_s8  ;;  %s2765_s8 = smov 2  }
 0x105   : > { %v3174_v6 = vpop.permute.xlu1 %542  ;;  %v3176_v7 = vpop.permute.xlu0 %540 }
 0x109   : > { %v576_v10 = vpop.permute.xlu1 %575  ;;  %v574_v0 = vpop.permute.xlu0 %573 }
 0x10a   : > { %v580_v13 = vsel %vm579_vm3, %v574_v0, %v576_v10  ;;  %v3224_v0 = vadd.s32 4294967294, %v3178_v8 }
 0x10b   : > { %v584_v53 = vsel %vm287_vm4, %v580_v13, 0.0  ;;  %v3227_v13 = vadd.s32 4294967294, %v3180_v9 }
 0x10c   : > { %vm295_vm10 = vcmp.ge.s32.totalorder %v3224_v0, 0 }
 0x10d   : > { %v3188_v24 = vpop.permute.xlu1 %634  ;;  %v578_v14 = vpop.permute.xlu0 %577  ;;  %vm3935_vm11 = vcmp.ge.s32.totalorder %v3227_v13, 0 }
 0x10e   : > { %v581_v15 = vsel %vm579_vm3, %v576_v10, %v578_v14 }
 0x10f   : > { %v585_v17 = vsel %vm3939_vm5, %v581_v15, 0.0 }
 0x110   : > { %v588_v18 = vcombine.low %v584_v53, %v585_v17  ;;  %v3232_v17 = vadd.s32 2, %v3178_v8 }
 0x111   : > { %v3196_v19 = vpop.permute.xlu1 %667  ;;  %v3198_v22 = vpop.permute.xlu0 %632 }
 0x112   : > { %v595_v23 = vrot.slane %v588_v18, %v2951_v36  ;;  %vm3934_vm13 = vcmp.lt.s32.totalorder %v3232_v17, 16 }
 0x114   : > { %v602_v27 = vrot.slane %v595_v23, %v2951_v36 }
 0x115   : > { %v3202_v28 = vpop.permute.xlu1 %671  ;;  %v3204_v31 = vpop.permute.xlu0 %636 }
 0x116   : > { %3955 = vst [vmem:[#allocation17_spill] sm:$0xff] %v3202_v28  ;;  %603 = vrot.lane.b32.xlu1 %v602_v27, %s2761_s30  ;;  %v3237_v27 = vadd.s32 2, %v3180_v9 }
 0x118   : > { %vm3933_vm14 = vcmp.lt.s32.totalorder %v3237_v27, 16 }
 0x119   : > { %v736_v32 = vpop.permute.xlu1 %735  ;;  %v3207_v33 = vpop.permute.xlu0 %669 }
 0x11d   : > { %v740_v34 = vpop.permute.xlu1 %739  ;;  %v3209_v35 = vpop.permute.xlu0 %702 }
 0x121   : > { %v901_v43 = vpop.permute.xlu1 %900  ;;  %v738_v44 = vpop.permute.xlu0 %737 }
 0x122   : > { %v742_v50 = vsel %vm741_vm6, %v736_v32, %v738_v44  ;;  %v743_v63 = vsel %vm741_vm6, %v738_v44, %v740_v34 }
 0x123   : > { %v746_v57 = vsel %vm3938_vm7, %v742_v50, 0.0  ;;  %v747_v59 = vsel %vm3937_vm8, %v743_v63, 0.0 }
 0x124   : > { %v750_v1 = vcombine.low %v746_v57, %v747_v59 }
 0x125   : > { %v1060_v5 = vpop.permute.xlu1 %1059  ;;  %v899_v10 = vpop.permute.xlu0 %898 }
 0x126   : > { %v757_v14 = vrot.slane %v750_v1, %v2951_v36  ;;  %v905_v15 = vsel %vm904_vm9, %v899_v10, %v901_v43 }
 0x127   : > { %v909_v34 = vsel %vm295_vm10, %v905_v15, 0.0 }
 0x128   : > { %v764_v53 = vrot.slane %v757_v14, %v2951_v36 }
 0x129   : > { %v1064_v18 = vpop.permute.xlu1 %1063  ;;  %v903_v23 = vpop.permute.xlu0 %902 }
 0x12a   : > { %v906_v32 = vsel %vm904_vm9, %v901_v43, %v903_v23  ;;  %765 = vrot.lane.b32.xlu0 %v764_v53, %s2761_s30  ;;  %vm1661_vm9 = vcmask 809984  }
 0x12b   : > { %v910_v44 = vsel %vm3935_vm11, %v906_v32, 0.0 }
 0x12c   : > { %v913_v50 = vcombine.low %v909_v34, %v910_v44  ;;  %v3253_v34 = vadd.s32 4294967295, %v3178_v8  ;;  %v3256_v44 = vadd.s32 4294967295, %v3180_v9 }
 0x12d   : > { %v1225_v63 = vpop.permute.xlu1 %1224  ;;  %v1062_v57 = vpop.permute.xlu0 %1061 }
 0x12e   : > { %v920_v59 = vrot.slane %v913_v50, %v2951_v36  ;;  %v1066_v1 = vsel %vm1065_vm12, %v1060_v5, %v1062_v57  ;;  %v1067_v43 = vsel %vm1065_vm12, %v1062_v57, %v1064_v18  ;;  %v3262_v57 = vadd.s32 3, %v3178_v8 }
 0x12f   : > { %v1070_v10 = vsel %vm3934_vm13, %v1066_v1, 0.0  ;;  %v1071_v14 = vsel %vm3933_vm14, %v1067_v43, 0.0  ;;  %vm303_vm0 = vcmp.ge.s32.totalorder %v3253_v34, 0  ;;  %vm3936_vm1 = vcmp.ge.s32.totalorder %v3256_v44, 0 }
 0x130   : > { %v1074_v15 = vcombine.low %v1070_v10, %v1071_v14  ;;  %v927_v53 = vrot.slane %v920_v59, %v2951_v36  ;;  %v3267_v43 = vadd.s32 3, %v3180_v9  ;;  %vm329_vm3 = vcmp.lt.s32.totalorder %v3262_v57, 16 }
 0x131   : > { %v1373_v23 = vpop.permute.xlu1 %1372  ;;  %v1223_v32 = vpop.permute.xlu0 %1222  ;;  %vm1822_vm12 = vcmask 777216  }
 0x132   : > { %928 = vrot.lane.b32.xlu1 %v927_v53, %s2761_s30  ;;  %v1081_v5 = vrot.slane %v1074_v15, %v2951_v36  ;;  %v1229_v18 = vsel %vm1228_vm15, %v1223_v32, %v1225_v63  ;;  %vm330_vm6 = vcmp.lt.s32.totalorder %v3267_v43, 16 }
 0x133   : > { %v1233_v14 = vsel %vm303_vm0, %v1229_v18, 0.0 }
 0x134   : > { %v1088_v50 = vrot.slane %v1081_v5, %v2951_v36 }
 0x135   : > { %v1377_v59 = vpop.permute.xlu1 %1376  ;;  %v1227_v1 = vpop.permute.xlu0 %1226 }
 0x136   : > { %v1230_v10 = vsel %vm1228_vm15, %v1225_v63, %v1227_v1  ;;  %1089 = vrot.lane.b32.xlu0 %v1088_v50, %s2761_s30  ;;  %vm1985_vm15 = vcmask 670720  }
 0x137   : > { %v1234_v15 = vsel %vm3936_vm1, %v1230_v10, 0.0  ;;  %vm638_vm1 = vcmask 277504  }
 0x138   : > { %v1237_v8 = vcombine.low %v1233_v14, %v1234_v15 }
 0x139   : > { %v1658_v53 = vpop.permute.xlu1 %1657  ;;  %v1375_v32 = vpop.permute.xlu0 %1374 }
 0x13a   : > { %v1244_v9 = vrot.slane %v1237_v8, %v2951_v36  ;;  %v1379_v5 = vsel %vm1378_vm2, %v1373_v23, %v1375_v32  ;;  %v1380_v63 = vsel %vm1378_vm2, %v1375_v32, %v1377_v59  ;;  %vm2145_vm2 = vcmask 637952  }
 0x13b   : > { %v1383_v50 = vsel %vm329_vm3, %v1379_v5, 0.0  ;;  %v1384_v18 = vsel %vm330_vm6, %v1380_v63, 0.0 }
 0x13c   : > { %v1387_v1 = vcombine.low %v1383_v50, %v1384_v18  ;;  %v1251_v10 = vrot.slane %v1244_v9, %v2951_v36 }
 0x13d   : > { %v1817_v14 = vpop.permute.xlu1 %1816  ;;  %v1656_v15 = vpop.permute.xlu0 %1655 }
 0x13e   : > { %1252 = vrot.lane.b32.xlu1 %v1251_v10, %s2761_s30  ;;  %v1394_v28 = vrot.slane %v1387_v1, %v2951_v36  ;;  %v1662_v29 = vsel %vm1661_vm9, %v1656_v15, %v1658_v53 }
 0x13f   : > { %v1666_v5 = vsel %vm287_vm4, %v1662_v29, 0.0 }
 0x140   : > { %v1401_v23 = vrot.slane %v1394_v28, %v2951_v36 }
 0x141   : > { %v1821_v59 = vpop.permute.xlu1 %1820  ;;  %v1660_v8 = vpop.permute.xlu0 %1659 }
 0x142   : > { %v1663_v32 = vsel %vm1661_vm9, %v1658_v53, %v1660_v8  ;;  %1402 = vrot.lane.b32.xlu0 %v1401_v23, %s2761_s30  ;;  %vm708_vm9 = vcmask 261120  }
 0x143   : > { %v1667_v9 = vsel %vm3939_vm5, %v1663_v32, 0.0 }
 0x144   : > { %v1670_v63 = vcombine.low %v1666_v5, %v1667_v9  ;;  %v1006_v9 = vstv %s3290_s3  ;;  %s3493_s3 = sld [smem:[#allocation8 + $0x1a]] }
 0x145   : > { %v1982_v50 = vpop.permute.xlu1 %1981  ;;  %v1819_v18 = vpop.permute.xlu0 %1818 }
 0x146   : > { %v1677_v28 = vrot.slane %v1670_v63, %v2951_v36  ;;  %v1823_v53 = vsel %vm1822_vm12, %v1817_v14, %v1819_v18  ;;  %v1824_v1 = vsel %vm1822_vm12, %v1819_v18, %v1821_v59  ;;  %v1008_v63 = vstv %s3292_s4  ;;  %s3495_s4 = sld [smem:[#allocation8 + $0x4b]] }
 0x147   : > { %v1827_v29 = vsel %vm3938_vm7, %v1823_v53, 0.0  ;;  %v1828_v10 = vsel %vm3937_vm8, %v1824_v1, 0.0  ;;  %vm799_vm12 = vcmask 244736   ;;  %vm869_vm8 = vcmask 154624  }
 0x148   : > { %v1831_v15 = vcombine.low %v1827_v29, %v1828_v10  ;;  %v1684_v23 = vrot.slane %v1677_v28, %v2951_v36  ;;  %v1007_v10 = vmul.f32 %v1006_v9, %v3046_v25 }
 0x149   : > { %v2140_v8 = vpop.permute.xlu1 %2139  ;;  %v1980_v32 = vpop.permute.xlu0 %1979 }
 0x14a   : > { %1685 = vrot.lane.b32.xlu0 %v1684_v23, %s2761_s30  ;;  %v1838_v14 = vrot.slane %v1831_v15, %v2951_v36  ;;  %v1986_v59 = vsel %vm1985_vm15, %v1980_v32, %v1982_v50  ;;  %v1009_v15 = vmul.f32 %v1008_v63, %v3048_v26 }
 0x14b   : > { %v1990_v1 = vsel %vm295_vm10, %v1986_v59, 0.0  ;;  %v1101_v59 = vstv %s3304_s15  ;;  %s3524_s15 = sld [smem:[#allocation8 + $0x1d]] }
 0x14c   : > { %v1845_v5 = vrot.slane %v1838_v14, %v2951_v36  ;;  %v3333_v26 = vadd.f32 %v1009_v15, %v1007_v10  ;;  %v990_v15 = vrot.slane %v3153_v51, %v2967_v55 }
 0x14d   : > { %v2144_v18 = vpop.permute.xlu1 %2143  ;;  %v1984_v28 = vpop.permute.xlu0 %1983 }
 0x14e   : > { %v1987_v53 = vsel %vm1985_vm15, %v1982_v50, %v1984_v28  ;;  %1846 = vrot.lane.b32.xlu1 %v1845_v5, %s2761_s30  ;;  %vm361_vm15 = vcmask 416768  }
 0x14f   : > { %v1991_v29 = vsel %vm3935_vm11, %v1987_v53, 0.0  ;;  %vm544_vm11 = vcmask 367616  }
 0x150   : > { %v1994_v23 = vcombine.low %v1990_v1, %v1991_v29  ;;  %v1134_v1 = vstv %s3310_s20  ;;  %v1136_v29 = vstv %s3312_s7  ;;  %s3526_s20 = sld [smem:[#allocation8 + $0x4e]]  ;;  %s2766_s7 = smov 127  }
 0x151   : > { %v707_v32 = vpop.permute.xlu1 %706  ;;  %v2142_v14 = vpop.permute.xlu0 %2141 }
 0x152   : > { %v2001_v50 = vrot.slane %v1994_v23, %v2951_v36  ;;  %v2146_v5 = vsel %vm2145_vm2, %v2140_v8, %v2142_v14  ;;  %v2147_v28 = vsel %vm2145_vm2, %v2142_v14, %v2144_v18  ;;  %v1099_v8 = vmul.f32 %v1098_v4, %v3060_v37 }
 0x153   : > { %v2150_v53 = vsel %vm3934_vm13, %v2146_v5, 0.0  ;;  %v2151_v25 = vsel %vm3933_vm14, %v2147_v28, 0.0  ;;  %v1102_v18 = vmul.f32 %v1101_v59, %v3062_v39  ;;  %v1169_v14 = vstv %s3314_s14  ;;  %s2444_s14 = sld [smem:[#allocation8 + $0x20]] }
 0x154   : > { %v2154_v9 = vcombine.low %v2150_v53, %v2151_v25  ;;  %v2008_v63 = vrot.slane %v2001_v50, %v2951_v36  ;;  %v1171_v5 = vstv %s3316_s17  ;;  %v1135_v50 = vmul.f32 %v1134_v1, %v3060_v37  ;;  %s2445_s17 = sld [smem:[#allocation8 + $0x51]] }
 0x155   : > { %v794_v23 = vpop.permute.xlu1 %793  ;;  %v3338_v2 = vpop.permute.xlu0 %704  ;;  %v1137_v4 = vmul.f32 %v1136_v29, %v3062_v39  ;;  %v1170_v59 = vmul.f32 %v1169_v14, %v3060_v37  ;;  %v1172_v53 = vmul.f32 %v1171_v5, %v3062_v39  ;;  %vm396_vm2 = vcmask 408576  }
 0x156   : > { %v2161_v62 = vrot.slane %v2154_v9, %v2951_v36  ;;  %v3347_v10 = vsel %vm708_vm9, %v3338_v2, %v707_v32  ;;  %2009 = vrot.lane.b32.xlu0 %v2008_v63, %s2761_s30  ;;  %v1019_v9 = vrot.slane %v3333_v26, %v2970_v58  ;;  %v3359_v63 = vadd.f32 %v1102_v18, %v1099_v8 }
 0x157   : > { %vm431_vm14 = vcmask 400384   ;;  %vm474_vm13 = vcmask 384000   ;;  %v3373_v37 = vadd.f32 %v1137_v4, %v1135_v50  ;;  %v362_v39 = vsel %vm361_vm15, %v3119_v47, %v3124_v21 }
 0x158   : > { %v2168_v28 = vrot.slane %v2161_v62, %v2951_v36  ;;  %v1015_v36 = vrot.slane %v3333_v26, %v2965_v54  ;;  %v3378_v62 = vadd.f32 %v1172_v53, %v1170_v59  ;;  %v363_v29 = vsel %vm361_vm15, %v3124_v21, %v3117_v16 }
 0x159   : > { %v798_v25 = vpop.permute.xlu1 %797  ;;  %v796_v32 = vpop.permute.xlu0 %795  ;;  %v1108_v18 = vrot.slane %v3359_v63, %v2965_v54  ;;  %v1023_v14 = vrot.slane %v3333_v26, %v2967_v55  ;;  %v1116_v47 = vrot.slane %v3359_v63, %v2967_v55  ;;  %v397_v5 = vsel %vm396_vm2, %v3122_v20, %v3132_v30 }
 0x15a   : > { %v3363_v51 = vsel %vm799_vm12, %v794_v23, %v796_v32  ;;  %v3365_v1 = vsel %vm799_vm12, %v796_v32, %v798_v25  ;;  %995 = vrot.lane.b32.xlu0 %v990_v15, %s2760_s27  ;;  %2169 = vrot.lane.b32.xlu1 %v2168_v28, %s2761_s30  ;;  %v545_v16 = vsel %vm544_vm11, %v3170_v3, %v3176_v7  ;;  %vm673_vm15 = vcmask 269312   ;;  %s2764_s27 = smov 3  }
 0x15b   : > { %vm834_vm12 = vcmask 236544   ;;  %v1112_v21 = vrot.slane %v3359_v63, %v2970_v58  ;;  %v366_v26 = vsel %vm287_vm4, %v362_v39, 0.0  ;;  %v1147_v20 = vrot.slane %v3373_v37, %v2970_v58 }
 0x15c   : > { %v1143_v15 = vrot.slane %v3373_v37, %v2965_v54  ;;  %v367_v3 = vsel %vm3939_vm5, %v363_v29, 0.0  ;;  %v432_v50 = vsel %vm431_vm14, %v3140_v40, %v3138_v38  ;;  %v1178_v4 = vrot.slane %v3378_v62, %v2965_v54 }
 0x15d   : > { %v3383_v23 = vpop.permute.xlu1 %1523  ;;  %v829_v8 = vpop.permute.xlu0 %828  ;;  %v1151_v28 = vrot.slane %v3373_v37, %v2967_v55  ;;  %v3420_v59 = vsel %vm295_vm10, %v397_v5, 0.0  ;;  %v475_v53 = vsel %vm474_vm13, %v3147_v46, %v3157_v56  ;;  %v549_v40 = vsel %vm329_vm3, %v545_v16, 0.0 }
 0x15e   : > { %1026 = vrot.lane.b32.xlu0 %v1019_v9, %s2762_s26  ;;  %1024 = vrot.lane.b32.xlu1 %v1015_v36, %s2762_s26  ;;  %v1283_v9 = vstv %s3361_s18  ;;  %v546_v63 = vsel %vm544_vm11, %v3176_v7, %v3174_v6  ;;  %v1286_v46 = vstv %s3371_s22  ;;  %v436_v29 = vsel %vm303_vm0, %v432_v50, 0.0  ;;  %s2767_s18 = smov 115   ;;  %s2440_s22 = sld [smem:[#allocation8 + $0x1e]] }
 0x15f   : > { %v476_v5 = vsel %vm474_vm13, %v3157_v56, %v3155_v52  ;;  %v709_v6 = vsel %vm708_vm9, %v3209_v35, %v3338_v2  ;;  %vm962_vm11 = vcmask 138240   ;;  %v1186_v7 = vrot.slane %v3378_v62, %v2967_v55 }
 0x160   : > { %v1284_v16 = vmul.f32 %v1283_v9, %v3068_v45  ;;  %v479_v52 = vsel %vm3938_vm7, %v475_v53, 0.0  ;;  %v550_v2 = vsel %vm330_vm6, %v546_v63, 0.0  ;;  %v639_v56 = vsel %vm638_vm1, %v3198_v22, %v3188_v24 }
 0x161   : > { %v833_v25 = vpop.permute.xlu1 %832  ;;  %v831_v32 = vpop.permute.xlu0 %830  ;;  %vm3956_vm13 = vcmp.lt.s32.totalorder %v3215_v42, 16  ;;  %v640_v45 = vsel %vm638_vm1, %v3188_v24, %v3204_v31  ;;  %vm3958_vm9 = vcmask 375808   ;;  %v643_v9 = vsel %vm295_vm10, %v639_v56, 0.0 }
 0x162   : > { %v3432_v36 = vsel %vm834_vm12, %v829_v8, %v831_v32  ;;  %v3435_v39 = vsel %vm834_vm12, %v831_v32, %v833_v25  ;;  %1117 = vrot.lane.b32.xlu0 %v1108_v18, %s2763_s25  ;;  %1028 = vrot.lane.b32.xlu1 %v1023_v14, %s2762_s26  ;;  %v433_v8 = vsel %vm431_vm14, %v3138_v38, %v3149_v49  ;;  %v480_v50 = vsel %vm3956_vm13, %v476_v5, 0.0  ;;  %s2441_s26 = sld [smem:[#allocation8 + $0x4f]] }
 0x163   : > { %v551_v18 = vadd.f32 %v549_v40, %v436_v29  ;;  %v1182_v14 = vrot.slane %v3378_v62, %v2970_v58  ;;  %v1287_v49 = vmul.f32 %v1286_v46, %v3070_v48  ;;  %vm3957_vm14 = vcmp.ge.s32.totalorder %v3256_v44, 0 }
 0x164   : > { %v437_v22 = vsel %vm3957_vm14, %v433_v8, 0.0  ;;  %v510_v25 = vsel %vm3958_vm9, %v3165_v61, %v3163_v60  ;;  %v1411_v32 = vstv %s3405_s23  ;;  %v1414_v63 = vstv %s3416_s24  ;;  %s2768_s23 = smov 126   ;;  %s2446_s24 = sld [smem:[#allocation8 + $0x21]] }
 0x165   : > { %v866_v35 = vpop.permute.xlu1 %865  ;;  %v864_v38 = vpop.permute.xlu0 %863  ;;  %v713_v53 = vadd.f32 %v709_v6, %v551_v18  ;;  %v552_v24 = vadd.f32 %v550_v2, %v437_v22  ;;  %vm3959_vm1 = vcmp.ge.s32.totalorder %v3227_v13, 0  ;;  %v674_v61 = vsel %vm673_vm15, %v3196_v19, %v3207_v33 }
 0x166   : > { %v870_v40 = vsel %vm869_vm8, %v864_v38, %v866_v35  ;;  %1121 = vrot.lane.b32.xlu0 %v1116_v47, %s2763_s25  ;;  %1119 = vrot.lane.b32.xlu1 %v1112_v21, %s2763_s25  ;;  %v481_v47 = vadd.f32 %v479_v52, %v366_v26  ;;  %v482_v21 = vadd.f32 %v480_v50, %v367_v3  ;;  %v644_v46 = vsel %vm3959_vm1, %v640_v45, 0.0  ;;  %v3963_v50 = vld [vmem:[#allocation13_spill] sm:$0xff]  ;;  %s2447_s25 = sld [smem:[#allocation8 + $0x52]] }
 0x167   : > { %v874_v48 = vsel %vm287_vm4, %v870_v40, 0.0  ;;  %vm3960_vm12 = vcmp.lt.s32.totalorder %v3232_v17, 16  ;;  %v714_v8 = vadd.f32 %v3347_v10, %v552_v24  ;;  %vm3962_vm14 = vcmp.lt.s32.totalorder %v3237_v27, 16 }
 0x168   : > { %v3478_v31 = vadd.f32 %v874_v48, %v713_v53  ;;  %v514_v6 = vsel %vm3960_vm12, %v510_v25, 0.0  ;;  %vm3961_vm13 = vmmov %vm3960_vm12  ;;  %v645_v19 = vadd.f32 %v643_v9, %v481_v47  ;;  %v805_v3 = vsel %vm3962_vm14, %v3365_v1, 0.0  ;;  %v3964_v53 = vld [vmem:[#allocation14_spill] sm:$0xff] }
 0x169   : > { %v957_v29 = vpop.permute.xlu1 %956  ;;  %v868_v5 = vpop.permute.xlu0 %867  ;;  %v804_v18 = vsel %vm3961_vm13, %v3363_v51, 0.0  ;;  %vm997_vm9 = vcmask 130048   ;;  %v646_v52 = vadd.f32 %v644_v46, %v482_v21  ;;  %v678_v51 = vsel %vm303_vm0, %v674_v61, 0.0  ;;  %vm3969_vm1 = vmmov %vm3962_vm14 }
 0x16a   : > { %v871_v26 = vsel %vm869_vm8, %v866_v35, %v868_v5  ;;  %1154 = vrot.lane.b32.xlu0 %v1147_v20, %s2764_s27  ;;  %1152 = vrot.lane.b32.xlu1 %v1143_v15, %s2764_s27  ;;  %v1288_v20 = vadd.f32 %v1287_v49, %v1284_v16  ;;  %v516_v15 = vadd.f32 %v514_v6, %v3420_v59  ;;  %v839_v22 = vsel %vm329_vm3, %v3432_v36, 0.0  ;;  %v2604_v6 = vld [vmem:[#allocation3 + $0x1] sm:$0x7] }
 0x16b   : > { %v875_v10 = vsel %vm3939_vm5, %v871_v26, 0.0  ;;  %v806_v56 = vadd.f32 %v804_v18, %v645_v19  ;;  %v1412_v45 = vmul.f32 %v1411_v32, %v3963_v50  ;;  %v1415_v1 = vmul.f32 %v1414_v63, %v3964_v53 }
 0x16c   : > { %v3504_v2 = vadd.f32 %v875_v10, %v714_v8  ;;  %v807_v40 = vadd.f32 %v805_v3, %v646_v52  ;;  %v680_v59 = vadd.f32 %v678_v51, %v516_v15  ;;  %vm3965_vm8 = vcmp.ge.s32.totalorder %v3256_v44, 0  ;;  %v3554_v10 = vld [vmem:[#allocation2 + $0x1] sm:$0x7] }
 0x16d   : > { %v961_v35 = vpop.permute.xlu1 %960  ;;  %v959_v38 = vpop.permute.xlu0 %958  ;;  %v1297_v9 = vrot.slane %v1288_v20, %v2970_v58  ;;  %v1293_v24 = vrot.slane %v1288_v20, %v2965_v54  ;;  %v1416_v47 = vadd.f32 %v1415_v1, %v1412_v45  ;;  %v1319_v21 = vstv %s3493_s3  ;;  %v2606_v45 = vld [vmem:[#allocation3 + $0x1] sm:$0x7]  ;;  %s2452_s3 = sld [smem:[#allocation8 + $0x24]] }
 0x16e   : > { %v963_v25 = vsel %vm962_vm11, %v957_v29, %v959_v38  ;;  %v964_v48 = vsel %vm962_vm11, %v959_v38, %v961_v35  ;;  %1187 = vrot.lane.b32.xlu0 %v1178_v4, %s2765_s8  ;;  %1156 = vrot.lane.b32.xlu1 %v1151_v28, %s2764_s27  ;;  %v841_v32 = vadd.f32 %v839_v22, %v680_v59  ;;  %v1321_v46 = vstv %s3495_s4  ;;  %v2603_v29 = vld [vmem:[#allocation2 + $0x1] sm:$0x7]  ;;  %s2769_s27 = smov 114   ;;  %s2453_s4 = sld [smem:[#allocation8 + $0x55]] }
 0x16f   : > { %v967_v16 = vsel %vm303_vm0, %v963_v25, 0.0  ;;  %v968_v36 = vsel %vm3965_vm8, %v964_v48, 0.0  ;;  %v1320_v5 = vmul.f32 %v2603_v29, %v1319_v21  ;;  %v1322_v8 = vmul.f32 %v2604_v6, %v1321_v46 }
 0x170   : > { %v3528_v49 = vadd.f32 %v967_v16, %v806_v56  ;;  %v3530_v4 = vadd.f32 %v968_v36, %v807_v40  ;;  %v1301_v18 = vrot.slane %v1288_v20, %v2967_v55  ;;  %v1447_v62 = vstv %s3524_s15  ;;  %s2448_s15 = sld [smem:[#allocation8 + $0x22]] }
 0x171   : > { %v3532_v37 = vpop.permute.xlu1 %993  ;;  %v992_v28 = vpop.permute.xlu0 %991  ;;  %v1429_v26 = vrot.slane %v1416_v47, %v2967_v55  ;;  %v1323_v19 = vadd.f32 %v1322_v8, %v1320_v5  ;;  %v1425_v3 = vrot.slane %v1416_v47, %v2970_v58  ;;  %v1448_v52 = vmul.f32 %v3554_v10, %v1447_v62 }
 0x172   : > { %v998_v63 = vsel %vm997_vm9, %v992_v28, %v3532_v37  ;;  %1191 = vrot.lane.b32.xlu0 %v1186_v7, %s2765_s8  ;;  %1189 = vrot.lane.b32.xlu1 %v1182_v14, %s2765_s8  ;;  %v1421_v7 = vrot.slane %v1416_v47, %v2965_v54  ;;  %v1449_v14 = vstv %s3526_s20  ;;  %v1532_v35 = vstv %s2444_s14  ;;  %s2770_s8 = smov 111   ;;  %s2449_s20 = sld [smem:[#allocation8 + $0x53]] }
 0x173   : > { %v3546_v61 = vadd.f32 %v998_v63, %v841_v32  ;;  %v1450_v51 = vmul.f32 %v1449_v14, %v3964_v53  ;;  %v1332_v20 = vrot.slane %v1323_v19, %v2970_v58  ;;  %v1328_v15 = vrot.slane %v1323_v19, %v2965_v54  ;;  %v3573_v14 = vld [vmem:[#allocation2 + $0x1] sm:$0x7]  ;;  %s2454_s14 = sld [smem:[#allocation8 + $0x25]] }
 0x174   : > { %v1534_v38 = vstv %s2445_s17  ;;  %v1533_v50 = vmul.f32 %v3554_v10, %v1532_v35  ;;  %v1336_v40 = vrot.slane %v1323_v19, %v2967_v55  ;;  %v1482_v22 = vstv %s2440_s22  ;;  %v3576_v19 = vld [vmem:[#allocation3 + $0x1] sm:$0x7]  ;;  %s2455_s17 = sld [smem:[#allocation8 + $0x56]]  ;;  %s2460_s22 = sld [smem:[#allocation8 + $0x28]] }
 0x175   : > { %v1451_v56 = vadd.f32 %v1450_v51, %v1448_v52  ;;  %v1535_v1 = vmul.f32 %v2606_v45, %v1534_v38  ;;  %v1484_v25 = vstv %s2441_s26  ;;  %v1483_v36 = vmul.f32 %v3554_v10, %v1482_v22  ;;  %s2461_s26 = sld [smem:[#allocation8 + $0x59]] }
 0x176   : > { %1304 = vrot.lane.b32.xlu0 %v1297_v9, %s2766_s7  ;;  %1302 = vrot.lane.b32.xlu1 %v1293_v24, %s2766_s7  ;;  %v1485_v32 = vmul.f32 %v2606_v45, %v1484_v25  ;;  %v1567_v63 = vstv %s2446_s24  ;;  %v1569_v47 = vstv %s2447_s25  ;;  %s2462_s24 = sld [smem:[#allocation8 + $0x29]]  ;;  %s2463_s25 = sld [smem:[#allocation8 + $0x5a]]  ;;  %vm3967_vm11 = vcmask 375808  }
 0x177   : > { %v1456_v53 = vrot.slane %v1451_v56, %v2965_v54  ;;  %v1464_v48 = vrot.slane %v1451_v56, %v2967_v55  ;;  %v1536_v59 = vadd.f32 %v1535_v1, %v1533_v50  ;;  %v1460_v16 = vrot.slane %v1451_v56, %v2970_v58 }
 0x178   : > { %v1486_v24 = vadd.f32 %v1485_v32, %v1483_v36  ;;  %v1568_v21 = vmul.f32 %v3554_v10, %v1567_v63  ;;  %v1570_v46 = vmul.f32 %v2606_v45, %v1569_v47  ;;  %v1694_v6 = vstv %s2452_s3  ;;  %v3593_v63 = vld [vmem:[#allocation3 + $0x1] sm:$0x7]  ;;  %s2468_s3 = sld [smem:[#allocation8 + $0x2c]] }
 0x179   : > { %v1545_v28 = vrot.slane %v1536_v59, %v2970_v58  ;;  %v1541_v9 = vrot.slane %v1536_v59, %v2965_v54  ;;  %v1549_v5 = vrot.slane %v1536_v59, %v2967_v55  ;;  %v1697_v8 = vstv %s2453_s4  ;;  %s2469_s4 = sld [smem:[#allocation8 + $0x5d]] }
 0x17a   : > { %1430 = vrot.lane.b32.xlu0 %v1421_v7, %s2767_s18  ;;  %1306 = vrot.lane.b32.xlu1 %v1301_v18, %s2766_s7  ;;  %v1491_v29 = vrot.slane %v1486_v24, %v2965_v54  ;;  %v1499_v7 = vrot.slane %v1486_v24, %v2967_v55  ;;  %v1571_v18 = vadd.f32 %v1570_v46, %v1568_v21  ;;  %s2771_s7 = smov 113   ;;  %v1604_v56 = vstv %s2449_s20  ;;  %s2457_s20 = sld [smem:[#allocation8 + $0x57]] }
 0x17b   : > { %v1495_v62 = vrot.slane %v1486_v24, %v2970_v58  ;;  %v1605_v38 = vmul.f32 %v2606_v45, %v1604_v56  ;;  %v1855_v32 = vstv %s2460_s22  ;;  %s3618_s22 = sld [smem:[#allocation8 + $0x5b]]  ;;  %vm606_vm12 = vcmask 654336  }
 0x17c   : > { %v1580_v52 = vrot.slane %v1571_v18, %v2970_v58  ;;  %v1576_v51 = vrot.slane %v1571_v18, %v2965_v54  ;;  %v1584_v1 = vrot.slane %v1571_v18, %v2967_v55  ;;  %vm1030_vm13 = vcmask 121856  }
 0x17d   : > { %vm1526_vm14 = vcmask 523264  }
 0x17e   : > { %1434 = vrot.lane.b32.xlu0 %v1429_v26, %s2767_s18  ;;  %1432 = vrot.lane.b32.xlu1 %v1425_v3, %s2767_s18  ;;  %v1695_v26 = vmul.f32 %v3573_v14, %v1694_v6  ;;  %v1698_v3 = vmul.f32 %v3576_v19, %v1697_v8  ;;  %s2772_s18 = smov 110  }
 0x182   : > { %1339 = vrot.lane.b32.xlu0 %v1332_v20, %s2768_s23  ;;  %1337 = vrot.lane.b32.xlu1 %v1328_v15, %s2768_s23  ;;  %v1699_v20 = vadd.f32 %v1698_v3, %v1695_v26  ;;  %v1602_v15 = vstv %s2448_s15  ;;  %s2456_s15 = sld [smem:[#allocation8 + $0x26]] }
 0x183   : > { %v1603_v35 = vmul.f32 %v3554_v10, %v1602_v15  ;;  %v3608_v15 = vld [vmem:[#allocation2 + $0x1] sm:$0x7] }
 0x184   : > { %v1704_v50 = vrot.slane %v1699_v20, %v2965_v54  ;;  %v1712_v22 = vrot.slane %v1699_v20, %v2967_v55  ;;  %v1708_v10 = vrot.slane %v1699_v20, %v2970_v58  ;;  %v2021_v20 = vstv %s2469_s4  ;;  %s2779_s4 = smov 96  }
 0x185   : > { %v1606_v25 = vadd.f32 %v1605_v38, %v1603_v35  ;;  %v3611_v35 = vld [vmem:[#allocation3 + $0x1] sm:$0x7] }
 0x186   : > { %1465 = vrot.lane.b32.xlu0 %v1456_v53, %s2769_s27  ;;  %1341 = vrot.lane.b32.xlu1 %v1336_v40, %s2768_s23  ;;  %v1730_v53 = vstv %s2454_s14  ;;  %v1732_v40 = vstv %s2455_s17  ;;  %s2773_s23 = smov 98   ;;  %s3606_s14 = sld [smem:[#allocation8 + $0x34]]  ;;  %v2022_v38 = vmul.f32 %v3611_v35, %v2021_v20 }
 0x187   : > { %v1731_v45 = vmul.f32 %v3573_v14, %v1730_v53  ;;  %v1615_v59 = vrot.slane %v1606_v25, %v2970_v58  ;;  %v1619_v46 = vrot.slane %v1606_v25, %v2967_v55  ;;  %s2776_s17 = smov 94  }
 0x188   : > { %v1765_v53 = vstv %s2456_s15  ;;  %s3662_s15 = sld [smem:[#allocation8 + $0x5f]] }
 0x18a   : > { %1469 = vrot.lane.b32.xlu0 %v1464_v48, %s2769_s27  ;;  %1467 = vrot.lane.b32.xlu1 %v1460_v16, %s2769_s27  ;;  %v1733_v48 = vmul.f32 %v3576_v19, %v1732_v40  ;;  %v1611_v16 = vrot.slane %v1606_v25, %v2965_v54  ;;  %s2774_s27 = smov 109   ;;  %v1767_v40 = vstv %s2457_s20  ;;  %s2780_s20 = smov 83  }
 0x18c   : > { %v1734_v36 = vadd.f32 %v1733_v48, %v1731_v45  ;;  %v1766_v45 = vmul.f32 %v3573_v14, %v1765_v53  ;;  %v1768_v48 = vmul.f32 %v3576_v19, %v1767_v40  ;;  %v3970_v40 = vld [vmem:[#allocation17_spill] sm:$0xff] }
 0x18e   : > { %1552 = vrot.lane.b32.xlu0 %v1545_v28, %s2770_s8  ;;  %1550 = vrot.lane.b32.xlu1 %v1541_v9, %s2770_s8  ;;  %v1858_v28 = vstv %s2461_s26  ;;  %v3590_v9 = vld [vmem:[#allocation2 + $0x1] sm:$0x7]  ;;  %v1739_v21 = vrot.slane %v1734_v36, %v2965_v54  ;;  %v1747_v6 = vrot.slane %v1734_v36, %v2967_v55  ;;  %s2777_s26 = smov 93  }
 0x18f   : > { %v1856_v24 = vmul.f32 %v3590_v9, %v1855_v32  ;;  %v1859_v47 = vmul.f32 %v3593_v63, %v1858_v28 }
 0x191   : > { %v1860_v8 = vadd.f32 %v1859_v47, %v1856_v24  ;;  %v1769_v24 = vadd.f32 %v1768_v48, %v1766_v45 }
 0x192   : > { %1500 = vrot.lane.b32.xlu0 %v1491_v29, %s2771_s7  ;;  %1554 = vrot.lane.b32.xlu1 %v1549_v5, %s2770_s8  ;;  %v1891_v29 = vstv %s2462_s24  ;;  %v1893_v5 = vstv %s2463_s25  ;;  %s2775_s8 = smov 97   ;;  %s3626_s24 = sld [smem:[#allocation8 + $0x61]] }
 0x193   : > { %v1892_v18 = vmul.f32 %v3590_v9, %v1891_v29  ;;  %v1869_v26 = vrot.slane %v1860_v8, %v2970_v58  ;;  %v1865_v3 = vrot.slane %v1860_v8, %v2965_v54  ;;  %v2614_v29 = vld [vmem:[#allocation3] sm:$0x7]  ;;  %s3639_s25 = sld [smem:[#allocation8 + $0x2d]] }
 0x196   : > { %1504 = vrot.lane.b32.xlu0 %v1499_v7, %s2771_s7  ;;  %1502 = vrot.lane.b32.xlu1 %v1495_v62, %s2771_s7  ;;  %v1743_v7 = vrot.slane %v1734_v36, %v2970_v58  ;;  %v1894_v62 = vmul.f32 %v3593_v63, %v1893_v5  ;;  %s3604_s7 = sld [smem:[#allocation8 + $0x3]]  ;;  %v444_v36 = vstv %s3606_s14  ;;  %v604_v5 = vpop.permute.xlu1 %603  ;;  %s2782_s14 = smov 79  }
 0x197   : > { %v445_v19 = vmul.f32 %v2614_v29, %v444_v36 }
 0x19a   : > { %1587 = vrot.lane.b32.xlu0 %v1580_v52, %s2772_s18  ;;  %1585 = vrot.lane.b32.xlu1 %v1576_v51, %s2772_s18  ;;  %v1895_v52 = vadd.f32 %v1894_v62, %v1892_v18  ;;  %v2018_v51 = vstv %s2468_s3  ;;  %s3643_s3 = sld [smem:[#allocation8 + $0x5e]] }
 0x19b   : > { %v2019_v56 = vmul.f32 %v3608_v15, %v2018_v51  ;;  %v2177_v51 = vld [vmem:[#allocation2 + $0x1] sm:$0x7] }
 0x19d   : > { %v2023_v25 = vadd.f32 %v2022_v38, %v2019_v56  ;;  %v2180_v56 = vld [vmem:[#allocation3 + $0x1] sm:$0x7]  ;;  %v3968_v38 = vld [vmem:[#allocation15_spill] sm:$0xff] }
 0x19e   : > { %1713 = vrot.lane.b32.xlu0 %v1704_v50, %s2773_s23  ;;  %1589 = vrot.lane.b32.xlu1 %v1584_v1, %s2772_s18  ;;  %v1900_v50 = vrot.slane %v1895_v52, %v2965_v54  ;;  %v1873_v1 = vrot.slane %v1860_v8, %v2967_v55  ;;  %s3616_s18 = sld [smem:[#allocation8 + $0x2a]]  ;;  %v3966_v8 = vld [vmem:[#allocation16_spill] sm:$0xff] }
 0x19f   : > { %v2032_v32 = vrot.slane %v2023_v25, %v2970_v58  ;;  %v2028_v28 = vrot.slane %v2023_v25, %v2965_v54 }
 0x1a2   : > { %1717 = vrot.lane.b32.xlu0 %v1712_v22, %s2773_s23  ;;  %1715 = vrot.lane.b32.xlu1 %v1708_v10, %s2773_s23  ;;  %v1908_v22 = vrot.slane %v1895_v52, %v2967_v55  ;;  %v1904_v10 = vrot.slane %v1895_v52, %v2970_v58  ;;  %s3624_s23 = sld [smem:[#allocation8 + $0x30]]  ;;  %v605_v52 = vrot.slane %v604_v5, 7 }
 0x1a4   : > { %v1926_v47 = vstv %s3616_s18  ;;  %s3731_s18 = sld [smem:[#allocation8 + $0x49]] }
 0x1a5   : > { %v1927_v18 = vmul.f32 %v3590_v9, %v1926_v47  ;;  %v398_v9 = vsel %vm396_vm2, %v3132_v30, %v3968_v38  ;;  %v1778_v30 = vrot.slane %v1769_v24, %v2970_v58  ;;  %vm3971_vm2 = vcmp.ge.s32.totalorder %v3227_v13, 0 }
 0x1a6   : > { %1622 = vrot.lane.b32.xlu0 %v1615_v59, %s2774_s27  ;;  %1620 = vrot.lane.b32.xlu1 %v1611_v16, %s2774_s27  ;;  %v766_v59 = vpop.permute.xlu0 %765  ;;  %v442_v16 = vstv %s3604_s7  ;;  %v402_v36 = vsel %vm3971_vm2, %v398_v9, 0.0  ;;  %s2781_s7 = smov 77  }
 0x1a8   : > { %v2178_v20 = vstv %s3624_s23 }
 0x1a9   : > { %v2179_v48 = vmul.f32 %v2178_v20, %v2177_v51 }
 0x1aa   : > { %1748 = vrot.lane.b32.xlu0 %v1739_v21, %s2775_s8  ;;  %1624 = vrot.lane.b32.xlu1 %v1619_v46, %s2774_s27  ;;  %v1928_v21 = vstv %s3618_s22  ;;  %v2613_v46 = vld [vmem:[#allocation2] sm:$0x7]  ;;  %s2778_s27 = smov 81   ;;  %s2486_s22 = sshll.u32 %s2821_s13, 7 }
 0x1ab   : > { %v443_v14 = vmul.f32 %v2613_v46, %v442_v16  ;;  %v1929_v62 = vmul.f32 %v3593_v63, %v1928_v21  ;;  %s2784_s13 = smov [#allocation9]  }
 0x1ad   : > { %v1930_v45 = vadd.f32 %v1929_v62, %v1927_v18  ;;  %v2056_v18 = vstv %s3643_s3  ;;  %s2274_s3 = scalar_lea.sflag [#allocation6], %s2932_s5 }
 0x1ae   : > { %1752 = vrot.lane.b32.xlu0 %v1747_v6, %s2775_s8  ;;  %1750 = vrot.lane.b32.xlu1 %v1743_v7, %s2775_s8  ;;  %v1090_v6 = vpop.permute.xlu0 %1089  ;;  %v511_v7 = vsel %vm3967_vm11, %v3163_v60, %v3966_v8  ;;  %v2181_v60 = vstv %s3626_s24  ;;  %s3657_s8 = sld [smem:[#allocation8 + $0x2e]]  ;;  %v2057_v9 = vmul.f32 %v3611_v35, %v2056_v18  ;;  %vm1158_vm11 = vcmask 23552  }
 0x1af   : > { %v515_v63 = vsel %vm3969_vm1, %v511_v7, 0.0  ;;  %v2182_v16 = vmul.f32 %v2181_v60, %v2180_v56  ;;  %v1939_v29 = vrot.slane %v1930_v45, %v2970_v58  ;;  %v840_v56 = vsel %vm330_vm6, %v3435_v39, 0.0 }
 0x1b0   : > { %vm1193_vm1 = vcmask 15360  }
 0x1b1   : > { %v2183_v7 = vadd.f32 %v2182_v16, %v2179_v48 }
 0x1b2   : > { %1876 = vrot.lane.b32.xlu0 %v1869_v26, %s2776_s17  ;;  %1874 = vrot.lane.b32.xlu1 %v1865_v3, %s2776_s17  ;;  %v1774_v26 = vrot.slane %v1769_v24, %v2965_v54  ;;  %v2036_v3 = vrot.slane %v2023_v25, %v2967_v55  ;;  %v767_v25 = vrot.slane %v766_v59, 7 }
 0x1b3   : > { %v2192_v16 = vrot.slane %v2183_v7, %v2970_v58 }
 0x1b4   : > { %v1403_v53 = vpop.permute.xlu0 %1402 }
 0x1b5   : > { %v1404_v38 = vrot.slane %v1403_v53, 7 }
 0x1b6   : > { %1909 = vrot.lane.b32.xlu0 %v1900_v50, %s2777_s26  ;;  %1878 = vrot.lane.b32.xlu1 %v1873_v1, %s2776_s17  ;;  %v446_v50 = vadd.f32 %v445_v19, %v443_v14  ;;  %v929_v1 = vpop.permute.xlu1 %928  ;;  %v1091_v14 = vrot.slane %v1090_v6, 7  ;;  %v2054_v19 = vstv %s3639_s25  ;;  %s3729_s17 = sld [smem:[#allocation8 + $0x18]] }
 0x1b7   : > { %v2055_v20 = vmul.f32 %v3608_v15, %v2054_v19 }
 0x1b8   : > { %v1092_v60 = vsel %vm606_vm12, %v1091_v14, %v1090_v6  ;;  %v2196_v6 = vrot.slane %v2183_v7, %v2967_v55 }
 0x1ba   : > { %1913 = vrot.lane.b32.xlu0 %v1908_v22, %s2777_s26  ;;  %1911 = vrot.lane.b32.xlu1 %v1904_v10, %s2777_s26  ;;  %v675_v22 = vsel %vm673_vm15, %v3207_v33, %v3970_v40  ;;  %v1782_v10 = vrot.slane %v1769_v24, %v2967_v55  ;;  %v930_v33 = vrot.slane %v929_v1, 7  ;;  %vm3972_vm15 = vmmov %vm3965_vm8  ;;  %v1253_v21 = vpop.permute.xlu1 %1252  ;;  %v768_v24 = vsel %vm606_vm12, %v767_v25, %v766_v59  ;;  %s173_s26 = scalar_lea.vmem [#allocation9], %s2378_s6  ;;  %s2664_s6 = sshll.u32 %s2784_s13, 4  ;;  %s2665_s6 = int_to_ptr.vmem [resolvable:$false] %s2664_s6 }
 0x1bb   : > { %v679_v47 = vsel %vm3972_vm15, %v675_v22, 0.0  ;;  %v2086_v40 = vstv %s3657_s8  ;;  %v2088_v25 = vstv %s3662_s15  ;;  %vm3973_vm8 = vcmp.lt.s32.totalorder %v3215_v42, 16  ;;  %s2288_s23 = sshll.u32 %s173_s26, 4  ;;  %s3882_s23 = int_to_ptr.vmem [resolvable:$true] %s2288_s23 }
 0x1bc   : > { %v3666_v46 = vpop.permute.xlu0 %1685  ;;  %v931_v62 = vsel %vm606_vm12, %v930_v33, %v929_v1  ;;  %v1943_v1 = vrot.slane %v1930_v45, %v2967_v55  ;;  %v2058_v33 = vadd.f32 %v2057_v9, %v2055_v20  ;;  %vm1308_vm15 = vcmask 1039360   ;;  %p2667_p0 = scmp.lt.s32.totalorder %s3882_s23, %s2665_s6 }
 0x1bd   : > { %v1687_v14 = vrot.slane %v3666_v46, 7 }
 0x1be   : > { %2039 = vrot.lane.b32.xlu0 %v2032_v32, %s2778_s27  ;;  %2037 = vrot.lane.b32.xlu1 %v2028_v28, %s2778_s27  ;;  %v607_v32 = vsel %vm606_vm12, %v605_v52, %v604_v5  ;;  %v517_v28 = vadd.f32 %v515_v63, %v402_v36  ;;  %v1935_v5 = vrot.slane %v1930_v45, %v2965_v54 }
 0x1bf   : > { %v609_v8 = vadd.f32 %v607_v32, %v446_v50  ;;  %v2188_v50 = vrot.slane %v2183_v7, %v2965_v54  ;;  %v1405_v36 = vsel %vm606_vm12, %v1404_v38, %v1403_v53  ;;  %v2087_v45 = vmul.f32 %v3608_v15, %v2086_v40 }
 0x1c0   : > { %v1847_v51 = vpop.permute.xlu1 %1846 }
 0x1c1   : > { %v770_v52 = vadd.f32 %v768_v24, %v609_v8  ;;  %v1525_v24 = vrot.slane %v3383_v23, 7  ;;  %v1848_v19 = vrot.slane %v1847_v51, 7 }
 0x1c2   : > { %1783 = vrot.lane.b32.xlu0 %v1774_v26, %s2779_s4  ;;  %2041 = vrot.lane.b32.xlu1 %v2036_v3, %s2778_s27  ;;  %v1254_v26 = vrot.slane %v1253_v21, 7  ;;  %v681_v3 = vadd.f32 %v679_v47, %v517_v28  ;;  %s3880_s27 = scalar_lea.hbm %s3926_s2, %s2486_s22 }
 0x1c3   : > { %v933_v63 = vadd.f32 %v931_v62, %v770_v52  ;;  %v1527_v18 = vsel %vm1526_vm14, %v1525_v24, %v3383_v23  ;;  %v1688_v62 = vsel %vm606_vm12, %v1687_v14, %v3666_v46  ;;  %v2071_v46 = vrot.slane %v2058_v33, %v2967_v55 }
 0x1c4   : > { %v1255_v22 = vsel %vm606_vm12, %v1254_v26, %v1253_v21  ;;  %v2089_v21 = vmul.f32 %v3611_v35, %v2088_v25  ;;  %v2063_v35 = vrot.slane %v2058_v33, %v2965_v54  ;;  %vm1436_vm14 = vcmask 941056  }
 0x1c6   : > { %1787 = vrot.lane.b32.xlu0 %v1782_v10, %s2779_s4  ;;  %1785 = vrot.lane.b32.xlu1 %v1778_v30, %s2779_s4  ;;  %v842_v10 = vadd.f32 %v840_v56, %v681_v3  ;;  %v1094_v30 = vadd.f32 %v1092_v60, %v933_v63  ;;  %v2090_v7 = vadd.f32 %v2089_v21, %v2087_v45  ;;  %s2660_s4 = scalar_lea.vmem %s3882_s23, 128 }
 0x1c7   : > { %v1849_v60 = vsel %vm606_vm12, %v1848_v19, %v1847_v51  ;;  %v1260_v19 = vld [vmem:[#allocation2 + $0x1] sm:$0x3]  ;;  %p2661_p9 = scmp.ne.s32.totalorder %s3882_s23, %s2660_s4 }
 0x1c8   : > { %v3674_v59 = vpop.permute.xlu0 %2009  ;;  %v1257_v28 = vadd.f32 %v1255_v22, %v1094_v30 }
 0x1c9   : > { %v2011_v26 = vrot.slane %v3674_v59, 7  ;;  %p2662_p13 = pnand %p2661_p9, %p3988_p11 }
 0x1ca   : > { %1946 = vrot.lane.b32.xlu0 %v1939_v29, %s2780_s20  ;;  %1944 = vrot.lane.b32.xlu1 %v1935_v5, %s2780_s20  ;;  %v1407_v53 = vadd.f32 %v1405_v36, %v1257_v28  ;;  %v2067_v5 = vrot.slane %v2058_v33, %v2970_v58 }
 0x1cb   : > { %p2663_p7 = pneg %p2662_p13 }
 0x1cc   : > { %v2170_v39 = vpop.permute.xlu1 %2169  ;;  %v996_v48 = vpop.permute.xlu0 %995  ;;  %v1529_v52 = vadd.f32 %v1527_v18, %v1407_v53 }
 0x1cd   : > { %v999_v32 = vsel %vm997_vm9, %v3532_v37, %v996_v48  ;;  %v2171_v38 = vrot.slane %v2170_v39, 7  ;;  %vm1123_vm9 = vcmask 105472   ;;  %v2103_v48 = vrot.slane %v2090_v7, %v2967_v55 }
 0x1ce   : > { %v3693_v47 = vadd.f32 %v999_v32, %v842_v10  ;;  %2197 = vrot.lane.b32.xlu0 %v2188_v50, %s2781_s7  ;;  %1948 = vrot.lane.b32.xlu1 %v1943_v1, %s2780_s20  ;;  %v1690_v63 = vadd.f32 %v1688_v62, %v1529_v52  ;;  %v2012_v50 = vsel %vm606_vm12, %v2011_v26, %v3674_v59 }
 0x1cf   : > { %v2172_v25 = vsel %vm606_vm12, %v2171_v38, %v2170_v39 }
 0x1d0   : > { %v1025_v29 = vpop.permute.xlu1 %1024  ;;  %v1027_v37 = vpop.permute.xlu0 %1026  ;;  %v1851_v1 = vadd.f32 %v1849_v60, %v1690_v63 }
 0x1d1   : > { %v1031_v15 = vsel %vm1030_vm13, %v1025_v29, %v1027_v37 }
 0x1d2   : > { %v1035_v8 = vsel %vm3938_vm7, %v1031_v15, 0.0  ;;  %2201 = vrot.lane.b32.xlu0 %v2196_v6, %s2781_s7  ;;  %2199 = vrot.lane.b32.xlu1 %v2192_v16, %s2781_s7  ;;  %v2014_v6 = vadd.f32 %v2012_v50, %v1851_v1  ;;  %v1261_v15 = vstv %s3729_s17 }
 0x1d3   : > { %v3708_v3 = vadd.f32 %v1035_v8, %v3478_v31  ;;  %v2095_v31 = vrot.slane %v2090_v7, %v2965_v54  ;;  %v1263_v8 = vld [vmem:[#allocation3 + $0x1] sm:$0x3]  ;;  %v1262_v52 = vmul.f32 %v1261_v15, %v1260_v19 }
 0x1d4   : > { %v1029_v20 = vpop.permute.xlu1 %1028  ;;  %v1118_v56 = vpop.permute.xlu0 %1117  ;;  %v2174_v32 = vadd.f32 %v2172_v25, %v2014_v6 }
 0x1d5   : > { %v1032_v9 = vsel %vm1030_vm13, %v1027_v37, %v1029_v20  ;;  %vm3974_vm13 = vmmov %vm3973_vm8 }
 0x1d6   : > { %v1036_v23 = vsel %vm3973_vm8, %v1032_v9, 0.0  ;;  %2074 = vrot.lane.b32.xlu0 %v2067_v5, %s2761_s30  ;;  %2072 = vrot.lane.b32.xlu1 %v2063_v35, %s2761_s30  ;;  %v2220_v14 = vrot.slane %v2174_v32, %v2965_v54  ;;  %v1264_v5 = vstv %s3731_s18  ;;  %v2228_v35 = vrot.slane %v2174_v32, %v2967_v55 }
 0x1d7   : > { %v1038_v51 = vadd.f32 %v1036_v23, %v3504_v2  ;;  %v2099_v2 = vrot.slane %v2090_v7, %v2970_v58  ;;  %v1265_v20 = vmul.f32 %v1264_v5, %v1263_v8  ;;  %vm3975_vm8 = vcmp.lt.s32.totalorder %v3232_v17, 16 }
 0x1d8   : > { %v1120_v40 = vpop.permute.xlu1 %1119  ;;  %v1122_v22 = vpop.permute.xlu0 %1121 }
 0x1d9   : > { %v1124_v10 = vsel %vm1123_vm9, %v1118_v56, %v1120_v40  ;;  %v1125_v30 = vsel %vm1123_vm9, %v1120_v40, %v1122_v22  ;;  %v1266_v23 = vadd.f32 %v1265_v20, %v1262_v52  ;;  %vm1343_vm9 = vcmask 1031168  }
 0x1da   : > { %v1128_v16 = vsel %vm329_vm3, %v1124_v10, 0.0  ;;  %v1129_v36 = vsel %vm330_vm6, %v1125_v30, 0.0  ;;  %2104 = vrot.lane.b32.xlu0 %v2095_v31, %s2782_s14  ;;  %2076 = vrot.lane.b32.xlu1 %v2071_v46, %s2761_s30  ;;  %s2783_s30 = smov 48  }
 0x1db   : > { %v1130_v59 = vadd.f32 %v1128_v16, %v3528_v49  ;;  %v1131_v39 = vadd.f32 %v1129_v36, %v3530_v4  ;;  %v2224_v49 = vrot.slane %v2174_v32, %v2970_v58  ;;  %v1271_v22 = vrot.slane %v1266_v23, %v2965_v54 }
 0x1dc   : > { %v1153_v33 = vpop.permute.xlu1 %1152  ;;  %v1155_v45 = vpop.permute.xlu0 %1154  ;;  %v1275_v25 = vrot.slane %v1266_v23, %v2970_v58 }
 0x1dd   : > { %v1159_v28 = vsel %vm1158_vm11, %v1153_v33, %v1155_v45 }
 0x1de   : > { %v1163_v21 = vsel %vm287_vm4, %v1159_v28, 0.0  ;;  %2108 = vrot.lane.b32.xlu0 %v2103_v48, %s2782_s14  ;;  %2106 = vrot.lane.b32.xlu1 %v2099_v2, %s2782_s14  ;;  %v1278_v48 = vadd.f32 %v1271_v22, %v1130_v59  ;;  %v1279_v16 = vadd.f32 %v1275_v25, %v1131_v39 }
 0x1df   : > { %v1165_v24 = vadd.f32 %v1163_v21, %v3546_v61 }
 0x1e0   : > { %v1157_v53 = vpop.permute.xlu1 %1156  ;;  %v1188_v4 = vpop.permute.xlu0 %1187 }
 0x1e1   : > { %v1160_v29 = vsel %vm1158_vm11, %v1155_v45, %v1157_v53  ;;  %vm3976_vm11 = vcmp.lt.s32.totalorder %v3237_v27, 16 }
 0x1e2   : > { %v1164_v37 = vsel %vm3939_vm5, %v1160_v29, 0.0  ;;  %2231 = vrot.lane.b32.xlu0 %v2224_v49, %s2783_s30  ;;  %2229 = vrot.lane.b32.xlu1 %v2220_v14, %s2783_s30 }
 0x1e3   : > { %v1166_v61 = vadd.f32 %v1164_v37, %v3693_v47 }
 0x1e4   : > { %v1190_v7 = vpop.permute.xlu1 %1189  ;;  %v1192_v18 = vpop.permute.xlu0 %1191 }
 0x1e5   : > { %v1194_v62 = vsel %vm1193_vm1, %v1188_v4, %v1190_v7  ;;  %v1195_v26 = vsel %vm1193_vm1, %v1190_v7, %v1192_v18  ;;  %vm1471_vm1 = vcmask 932864  }
 0x1e6   : > { %v1198_v56 = vsel %vm295_vm10, %v1194_v62, 0.0  ;;  %v1199_v60 = vsel %vm3971_vm2, %v1195_v26, 0.0  ;;  %2233 = vrot.lane.b32.xlu1 %v2228_v35, %s2783_s30 }
 0x1e7   : > { %v1200_v38 = vadd.f32 %v1198_v56, %v3708_v3  ;;  %v1201_v9 = vadd.f32 %v1199_v60, %v1038_v51 }
 0x1e8   : > { %v1303_v47 = vpop.permute.xlu1 %1302  ;;  %v1305_v63 = vpop.permute.xlu0 %1304 }
 0x1e9   : > { %v1309_v55 = vsel %vm1308_vm15, %v1303_v47, %v1305_v63 }
 0x1ea   : > { %v1313_v31 = vsel %vm3938_vm7, %v1309_v55, 0.0 }
 0x1eb   : > { %v1315_v46 = vadd.f32 %v1313_v31, %v1165_v24 }
 0x1ec   : > { %v1307_v50 = vpop.permute.xlu1 %1306  ;;  %v1431_v1 = vpop.permute.xlu0 %1430 }
 0x1ed   : > { %v1310_v40 = vsel %vm1308_vm15, %v1305_v63, %v1307_v50  ;;  %vm1556_vm15 = vcmask 908288  }
 0x1ee   : > { %v1314_v10 = vsel %vm3974_vm13, %v1310_v40, 0.0 }
 0x1ef   : > { %v1316_v3 = vadd.f32 %v1314_v10, %v1166_v61 }
 0x1f0   : > { %v1433_v51 = vpop.permute.xlu1 %1432  ;;  %v1435_v30 = vpop.permute.xlu0 %1434 }
 0x1f1   : > { %v1437_v6 = vsel %vm1436_vm14, %v1431_v1, %v1433_v51  ;;  %v1438_v36 = vsel %vm1436_vm14, %v1433_v51, %v1435_v30  ;;  %vm1506_vm14 = vcmask 924672  }
 0x1f2   : > { %v1441_v2 = vsel %vm287_vm4, %v1437_v6, 0.0  ;;  %v1442_v32 = vsel %vm3939_vm5, %v1438_v36, 0.0  ;;  %vm1950_vm5 = vcmask 678912  }
 0x1f3   : > { %v1443_v33 = vadd.f32 %v1441_v2, %v1278_v48  ;;  %v1444_v58 = vadd.f32 %v1442_v32, %v1279_v16 }
 0x1f4   : > { %v1338_v45 = vpop.permute.xlu1 %1337  ;;  %v1340_v28 = vpop.permute.xlu0 %1339 }
 0x1f5   : > { %v1344_v21 = vsel %vm1343_vm9, %v1338_v45, %v1340_v28 }
 0x1f6   : > { %v1348_v24 = vsel %vm3975_vm8, %v1344_v21, 0.0  ;;  %vm1591_vm8 = vcmask 900096  }
 0x1f7   : > { %v1350_v14 = vadd.f32 %v1348_v24, %v1200_v38 }
 0x1f8   : > { %v1342_v59 = vpop.permute.xlu1 %1341  ;;  %v1466_v49 = vpop.permute.xlu0 %1465 }
 0x1f9   : > { %v1345_v39 = vsel %vm1343_vm9, %v1340_v28, %v1342_v59  ;;  %vm3977_vm9 = vcmp.ge.s32.totalorder %v3256_v44, 0 }
 0x1fa   : > { %v1349_v53 = vsel %vm3976_vm11, %v1345_v39, 0.0  ;;  %vm1719_vm11 = vcmask 801792  }
 0x1fb   : > { %v1351_v4 = vadd.f32 %v1349_v53, %v1201_v9 }
 0x1fc   : > { %v1468_v29 = vpop.permute.xlu1 %1467  ;;  %v1470_v37 = vpop.permute.xlu0 %1469 }
 0x1fd   : > { %v1472_v19 = vsel %vm1471_vm1, %v1466_v49, %v1468_v29  ;;  %v1473_v15 = vsel %vm1471_vm1, %v1468_v29, %v1470_v37  ;;  %vm1754_vm1 = vcmask 793600  }
 0x1fe   : > { %v1476_v8 = vsel %vm295_vm10, %v1472_v19, 0.0  ;;  %v1477_v5 = vsel %vm3971_vm2, %v1473_v15, 0.0  ;;  %vm1880_vm2 = vcmask 769024  }
 0x1ff   : > { %v3771_v61 = vadd.f32 %v1476_v8, %v1315_v46  ;;  %v3773_v35 = vadd.f32 %v1477_v5, %v1316_v3 }
 0x200   : > { %v1551_v7 = vpop.permute.xlu1 %1550  ;;  %v1553_v18 = vpop.permute.xlu0 %1552 }
 0x201   : > { %v1557_v62 = vsel %vm1556_vm15, %v1551_v7, %v1553_v18 }
 0x202   : > { %v1561_v26 = vsel %vm3938_vm7, %v1557_v62, 0.0  ;;  %vm1626_vm7 = vcmask 891904  }
 0x203   : > { %v3777_v52 = vadd.f32 %v1561_v26, %v1443_v33 }
 0x204   : > { %v1555_v20 = vpop.permute.xlu1 %1554  ;;  %v1501_v56 = vpop.permute.xlu0 %1500 }
 0x205   : > { %v1558_v60 = vsel %vm1556_vm15, %v1553_v18, %v1555_v20  ;;  %vm3978_vm15 = vcmp.lt.s32.totalorder %v3232_v17, 16 }
 0x206   : > { %v1562_v38 = vsel %vm3974_vm13, %v1558_v60, 0.0  ;;  %vm1915_vm13 = vcmask 760832  }
 0x207   : > { %v3781_v9 = vadd.f32 %v1562_v38, %v1444_v58 }
 0x208   : > { %v1503_v47 = vpop.permute.xlu1 %1502  ;;  %v1505_v63 = vpop.permute.xlu0 %1504 }
 0x209   : > { %v1507_v55 = vsel %vm1506_vm14, %v1501_v56, %v1503_v47  ;;  %v1508_v23 = vsel %vm1506_vm14, %v1503_v47, %v1505_v63  ;;  %vm2043_vm14 = vcmask 662528  }
 0x20a   : > { %v1511_v31 = vsel %vm303_vm0, %v1507_v55, 0.0  ;;  %v1512_v46 = vsel %vm3977_vm9, %v1508_v23, 0.0  ;;  %vm3979_vm9 = vcmp.lt.s32.totalorder %v3237_v27, 16 }
 0x20b   : > { %v3787_v50 = vadd.f32 %v1511_v31, %v1350_v14  ;;  %v3789_v1 = vadd.f32 %v1512_v46, %v1351_v4 }
 0x20c   : > { %v1586_v40 = vpop.permute.xlu1 %1585  ;;  %v1588_v22 = vpop.permute.xlu0 %1587 }
 0x20d   : > { %v1592_v4 = vsel %vm1591_vm8, %v1586_v40, %v1588_v22 }
 0x20e   : > { %v1596_v8 = vsel %vm3978_vm15, %v1592_v4, 0.0  ;;  %vm2203_vm15 = vcmask 629760  }
 0x20f   : > { %v1598_v60 = vadd.f32 %v1596_v8, %v3771_v61 }
 0x210   : > { %v1590_v25 = vpop.permute.xlu1 %1589  ;;  %v1714_v10 = vpop.permute.xlu0 %1713 }
 0x211   : > { %v1593_v19 = vsel %vm1591_vm8, %v1588_v22, %v1590_v25  ;;  %vm1789_vm8 = vcmask 785408  }
 0x212   : > { %v1597_v5 = vsel %vm3979_vm9, %v1593_v19, 0.0 }
 0x213   : > { %v1599_v63 = vadd.f32 %v1597_v5, %v3773_v35 }
 0x214   : > { %v1716_v3 = vpop.permute.xlu1 %1715  ;;  %v1718_v51 = vpop.permute.xlu0 %1717 }
 0x215   : > { %v1720_v15 = vsel %vm1719_vm11, %v1714_v10, %v1716_v3  ;;  %v1721_v56 = vsel %vm1719_vm11, %v1716_v3, %v1718_v51  ;;  %vm3981_vm11 = vcmp.ge.s32.totalorder %v3227_v13, 0 }
 0x216   : > { %v1724_v20 = vsel %vm295_vm10, %v1720_v15, 0.0  ;;  %vm3980_vm10 = vcmp.lt.s32.totalorder %v3232_v17, 16  ;;  %v1725_v61 = vsel %vm3981_vm11, %v1721_v56, 0.0 }
 0x217   : > { %v1726_v31 = vadd.f32 %v1724_v20, %v3777_v52 }
 0x218   : > { %v1621_v30 = vpop.permute.xlu1 %1620  ;;  %v3791_v48 = vpop.permute.xlu0 %1622 }
 0x219   : > { %v1627_v46 = vsel %vm1626_vm7, %v1621_v30, %v3791_v48 }
 0x21c   : > { %v1625_v6 = vpop.permute.xlu1 %1624  ;;  %v1749_v16 = vpop.permute.xlu0 %1748 }
 0x220   : > { %v1751_v36 = vpop.permute.xlu1 %1750  ;;  %v1753_v2 = vpop.permute.xlu0 %1752 }
 0x221   : > { %v1755_v7 = vsel %vm1754_vm1, %v1749_v16, %v1751_v36  ;;  %v1756_v23 = vsel %vm1754_vm1, %v1751_v36, %v1753_v2  ;;  %vm3982_vm1 = vcmp.ge.s32.totalorder %v3256_v44, 0  ;;  %v1727_v16 = vadd.f32 %v1725_v61, %v3781_v9 }
 0x222   : > { %v1759_v55 = vsel %vm303_vm0, %v1755_v7, 0.0  ;;  %v1760_v13 = vsel %vm3982_vm1, %v1756_v23, 0.0  ;;  %v1628_v36 = vsel %vm1626_vm7, %v3791_v48, %v1625_v6  ;;  %v1631_v9 = vsel %vm329_vm3, %v1627_v46, 0.0  ;;  %vm3984_vm7 = vmmov %vm3982_vm1 }
 0x223   : > { %v1761_v3 = vadd.f32 %v1759_v55, %v1598_v60  ;;  %v1632_v6 = vsel %vm330_vm6, %v1628_v36, 0.0  ;;  %v1633_v56 = vadd.f32 %v1631_v9, %v3787_v50 }
 0x224   : > { %v1875_v32 = vpop.permute.xlu1 %1874  ;;  %v1877_v33 = vpop.permute.xlu0 %1876 }
 0x225   : > { %v1881_v18 = vsel %vm1880_vm2, %v1875_v32, %v1877_v33 }
 0x226   : > { %v1885_v0 = vsel %vm3980_vm10, %v1881_v18, 0.0 }
 0x227   : > { %v1887_v51 = vadd.f32 %v1885_v0, %v1726_v31 }
 0x228   : > { %v1879_v58 = vpop.permute.xlu1 %1878  ;;  %v1910_v45 = vpop.permute.xlu0 %1909 }
 0x229   : > { %v1882_v40 = vsel %vm1880_vm2, %v1877_v33, %v1879_v58  ;;  %vm3983_vm2 = vmmov %vm3979_vm9 }
 0x22a   : > { %v1886_v2 = vsel %vm3983_vm2, %v1882_v40, 0.0 }
 0x22c   : > { %v1912_v28 = vpop.permute.xlu1 %1911  ;;  %v1914_v21 = vpop.permute.xlu0 %1913 }
 0x22d   : > { %v1916_v38 = vsel %vm1915_vm13, %v1910_v45, %v1912_v28  ;;  %v1917_v10 = vsel %vm1915_vm13, %v1912_v28, %v1914_v21 }
 0x22e   : > { %v1920_v25 = vsel %vm329_vm3, %v1916_v38, 0.0  ;;  %v1921_v33 = vsel %vm330_vm6, %v1917_v10, 0.0 }
 0x22f   : > { %v1922_v32 = vadd.f32 %v1920_v25, %v1761_v3 }
 0x230   : > { %v2038_v24 = vpop.permute.xlu1 %2037  ;;  %v2040_v14 = vpop.permute.xlu0 %2039 }
 0x231   : > { %v2044_v47 = vsel %vm2043_vm14, %v2038_v24, %v2040_v14  ;;  %v1762_v24 = vadd.f32 %v1760_v13, %v1599_v63 }
 0x232   : > { %v2048_v17 = vsel %vm303_vm0, %v2044_v47, 0.0  ;;  %vm3985_vm0 = vcmp.ge.s32.totalorder %v3186_v12, 0 }
 0x233   : > { %v2050_v58 = vadd.f32 %v2048_v17, %v1887_v51  ;;  %v1923_v19 = vadd.f32 %v1921_v33, %v1762_v24 }
 0x234   : > { %v2042_v59 = vpop.permute.xlu1 %2041  ;;  %v3793_v49 = vpop.permute.xlu0 %1783 }
 0x235   : > { %v2045_v30 = vsel %vm2043_vm14, %v2040_v14, %v2042_v59  ;;  %v1888_v14 = vadd.f32 %v1886_v2, %v1727_v16 }
 0x236   : > { %v2049_v27 = vsel %vm3984_vm7, %v2045_v30, 0.0 }
 0x237   : > { %v2051_v5 = vadd.f32 %v2049_v27, %v1888_v14 }
 0x238   : > { %v3795_v39 = vpop.permute.xlu1 %1785  ;;  %v3797_v53 = vpop.permute.xlu0 %1787 }
 0x239   : > { %v1790_v44 = vsel %vm1789_vm8, %v3793_v49, %v3795_v39  ;;  %v1791_v7 = vsel %vm1789_vm8, %v3795_v39, %v3797_v53 }
 0x23a   : > { %v1794_v38 = vadd.f32 %v1790_v44, %v1633_v56 }
 0x23c   : > { %v1945_v29 = vpop.permute.xlu1 %1944  ;;  %v1947_v37 = vpop.permute.xlu0 %1946 }
 0x23d   : > { %v1951_v15 = vsel %vm1950_vm5, %v1945_v29, %v1947_v37  ;;  %v1634_v29 = vadd.f32 %v1632_v6, %v3789_v1 }
 0x23e   : > { %v1955_v43 = vsel %vm287_vm4, %v1951_v15, 0.0  ;;  %vm2235_vm4 = vcmask 392192  }
 0x23f   : > { %v1795_v39 = vadd.f32 %v1791_v7, %v1634_v29  ;;  %v1957_v55 = vadd.f32 %v1955_v43, %v1794_v38 }
 0x240   : > { %v1949_v62 = vpop.permute.xlu1 %1948  ;;  %v2198_v26 = vpop.permute.xlu0 %2197 }
 0x241   : > { %v1952_v8 = vsel %vm1950_vm5, %v1947_v37, %v1949_v62  ;;  %vm2110_vm5 = vcmask 646144  }
 0x242   : > { %v1956_v49 = vsel %vm3985_vm0, %v1952_v8, 0.0 }
 0x243   : > { %v1958_v50 = vadd.f32 %v1956_v49, %v1795_v39 }
 0x244   : > { %v2200_v22 = vpop.permute.xlu1 %2199  ;;  %v2202_v35 = vpop.permute.xlu0 %2201 }
 0x245   : > { %v2204_v52 = vsel %vm2203_vm15, %v2198_v26, %v2200_v22  ;;  %v2205_v45 = vsel %vm2203_vm15, %v2200_v22, %v2202_v35 }
 0x246   : > { %v2208_v34 = vsel %vm329_vm3, %v2204_v52, 0.0  ;;  %v2209_v57 = vsel %vm330_vm6, %v2205_v45, 0.0  ;;  %vm3986_vm3 = vcmp.lt.s32.totalorder %v3212_v41, 16  ;;  %vm3987_vm6 = vcmp.lt.s32.totalorder %v3215_v42, 16 }
 0x247   : > { %v2210_v59 = vadd.f32 %v2208_v34, %v2050_v58  ;;  %v2211_v62 = vadd.f32 %v2209_v57, %v2051_v5 }
 0x248   : > { %v2073_v28 = vpop.permute.xlu1 %2072  ;;  %v2075_v21 = vpop.permute.xlu0 %2074 }
 0x249   : > { %v2078_v48 = vsel %vm606_vm12, %v2073_v28, %v2075_v21  ;;  %v2258_v28 = vld [vmem:[%s2938_s19] sm:$0xff]  ;;  %s2666_s19 = scalar_lea.vmem %s2665_s6, 256 }
 0x24a   : > { %v2082_v4 = vadd.f32 %v2078_v48, %v1922_v32  ;;  %p2668_p3 = scmp.lt.s32.totalorder %s2666_s19, %s2660_s4 }
 0x24c   : > { %v2212_v18 = vadd.f32 %v2210_v59, %v2082_v4  ;;  %v2077_v26 = vpop.permute.xlu1 %2076  ;;  %v2105_v20 = vpop.permute.xlu0 %2104  ;;  %p2669_p12 = por %p2668_p3, %p2667_p0 }
 0x24d   : > { %v2079_v37 = vsel %vm606_vm12, %v2075_v21, %v2077_v26 }
 0x24e   : > { %v2083_v60 = vadd.f32 %v2079_v37, %v1923_v19  ;;  %p2670_p5 = pnand %p2669_p12, %p2663_p7 }
 0x250   : > { %v2213_v53 = vadd.f32 %v2211_v62, %v2083_v60  ;;  %v2107_v47 = vpop.permute.xlu1 %2106  ;;  %v2109_v63 = vpop.permute.xlu0 %2108 }
 0x251   : > { %v2111_v23 = vsel %vm2110_vm5, %v2105_v20, %v2107_v47  ;;  %v2112_v1 = vsel %vm2110_vm5, %v2107_v47, %v2109_v63 }
 0x252   : > { %v2115_v0 = vsel %vm3986_vm3, %v2111_v23, 0.0  ;;  %v2116_v11 = vsel %vm3987_vm6, %v2112_v1, 0.0 }
 0x253   : > { %v2117_v12 = vadd.f32 %v2115_v0, %v1957_v55  ;;  %v2118_v31 = vadd.f32 %v2116_v11, %v1958_v50 }
 0x254   : > { %v2230_v61 = vpop.permute.xlu1 %2229  ;;  %v2232_v46 = vpop.permute.xlu0 %2231 }
 0x255   : > { %v2214_v40 = vadd.f32 %v2212_v18, %v2117_v12  ;;  %v2236_v22 = vsel %vm2235_vm4, %v2230_v61, %v2232_v46  ;;  %v2215_v35 = vadd.f32 %v2213_v53, %v2118_v31 }
 0x257   : > { %v2240_v25 = vadd.f32 %v2236_v22, %v2214_v40 }
 0x258   : > { %v2234_v10 = vpop.permute.xlu1 %2233 }
 0x259   : > { %v2242_v17 = vmax.f32 %v2240_v25, 0.0  ;;  %v2237_v52 = vsel %vm2235_vm4, %v2232_v46, %v2234_v10 }
 0x25a   : > { %v2241_v3 = vadd.f32 %v2237_v52, %v2215_v35 }
 0x25b   : > { %v2478_v13 = vmul.f32 -1.442695, %v2242_v17 }
 0x25c   : > { %v2243_v51 = vmax.f32 %v2241_v3, 0.0 }
 0x25d   : > { %2595 = vpow2.f32 %v2478_v13 }
 0x25e   : > { %v2479_v41 = vmul.f32 -1.442695, %v2243_v51 }
 0x260   : > { %2597 = vpow2.f32 %v2479_v41 }
 0x267   : > { %v2596_v42 = vpop.eup %2595 }
 0x268   : > { %v2250_v30 = vadd.f32 1.0, %v2596_v42 }
 0x26a   : > { %v2598_v16 = vpop.eup %2597  ;;  %2599 = vrcp.f32 %v2250_v30 }
 0x26b   : > { %v2251_v36 = vadd.f32 1.0, %v2598_v16 }
 0x26d   : > { %2601 = vrcp.f32 %v2251_v36 }
 0x274   : > { %v2600_v2 = vpop.eup %2599 }
 0x275   : > { %v2256_v34 = vadd.f32 1.0, %v2600_v2 }
 0x277   : > { %v2602_v32 = vpop.eup %2601  ;;  %v2262_v58 = vrot.slane %v2256_v34, %v2965_v54 }
 0x278   : > { %v2257_v33 = vadd.f32 1.0, %v2602_v32 }
 0x27a   : > { %v2266_v45 = vrot.slane %v2257_v33, %v2965_v54 }
 0x27c   : > { %v2269_v21 = vcombine.low %v2262_v58, %v2266_v45 }
 0x27e   : > { %v2271_v9 = vmul.f32 %v2269_v21, %v2258_v28 }
 0x280   : > { %2272 = vst [vmem:[%s173_s26] sm:$0xff] %v2271_v9 }
 0x281   : > { %2673 = shalt.err (!%p2670_p5)
}
 0x282   : > { %s2674_s5 = scalar_lea.hbm %s3880_s27, 128  ;;  %s2678_s20 = scalar_lea.hbm %s3926_s2, 256 }
 0x283   : > { %p2675_p10 = scmp.ne.s32.totalorder %s3880_s27, %s2674_s5  ;;  %p2679_p4 = scmp.lt.u32.totalorder %s3880_s27, %s3926_s2 }
 0x284   : > { %p2680_p6 = scmp.lt.u32.totalorder %s2678_s20, %s2674_s5  ;;  %p2682_p9 = scmp.lt.u32.totalorder %s2674_s5, %s3880_s27 }
 0x285   : > { %p2676_p2 = pnand %p2675_p10, %p3988_p11 }
 0x286   : > { %p2681_p8 = por %p2680_p6, %p2679_p4 }
 0x287   : > { %p2677_p1 = pneg %p2676_p2 }
 0x288   : > { %p2683_p13 = por %p2682_p9, %p2681_p8 }
 0x28a   : > { %p2684_p7 = pnand %p2683_p13, %p2677_p1 }
 0x28c   : > { %2687 = shalt.err (!%p2684_p7)
}
 0x28d   : > { %2493 = dma.vmem_to_hbm [thread:$0]  (%p3988_p11), %s3882_s23, 128, %s3880_s27, %s2274_s3  }
 0x28e PF: > { %s2300_s17 = sand.u32 1, %s2718_s9   ;;  %p3989_p0 = scmp.ne.s32.totalorder %s3941_s16, 0 }
 0x28f   : > { %p3990_p3 = scmp.ge.s32.totalorder %s2730_s12, 2  ;;  %s2301_s18 = scalar_lea.sflag [#allocation6], %s2300_s17 }
 0x291   : > { %p2504_p12 = pnand %p3990_p3, %p3989_p0 }
 0x293   : > { %2713 = dma.done.wait (!%p2504_p12), %s2301_s18, 128  }
 0x294   : > { %2715 = vsyncadd (!%p2504_p12), %s2301_s18, 4294967168  ;;  %p16_p5 = scmp.ge.s32.totalorder %s2851_s21, 4   ;;  %s3991_s9 = smov %s2722_s10 }
 0x295   : > { %s3992_s10 = smov %s2726_s11  ;;  %s3993_s11 = smov %s2875_s28 }
 0x296   : > { %s3994_s12 = smov %s2851_s21  ;;  %18 = sbr.rel (!%p16_p5) target bundleno = 6 (0x6), region = 78 }
 0x29d   :  { %2306 = vsyncpa [#allocation5], 1 }
 0x29e   :  { %2308 = vsyncpa [#allocation5 + $0x1], 1 }
 0x29f   :  { %2309 = vsyncpa [#allocation6], 1 }
 0x2a0   :  { %2311 = vsyncpa [#allocation6 + $0x1], 1 }
 0x2a1   :  { %2312 = vsyncpa [#allocation7], 1 }
 0x2a2   :  { %2314 = vsyncpa [#allocation7 + $0x1], 1 }

</bundles_post_ra>
